<compile_context>
chip_gen: v6e
topology: v6e:2x2x1
jax: 0.10.0
libtpu: 0.0.40
codegen_flags: <defaults>
</compile_context>

<pallas_src>
import functools

import jax
import jax.numpy as jnp
from jax import lax
from jax.experimental import pallas as pl
from jax.experimental.pallas import tpu as pltpu

KSIZE = 7
PAD = 3  # padding = 3 for kernel_size = 7


# ----------------------------------------------------------------------------
# Pass 1: attention map (channel mean/max -> 7x7 conv -> sigmoid)
# ----------------------------------------------------------------------------
def _make_attn_kernel(C, H, W):
    K = KSIZE
    HW = H * W

    def kernel(x_ref, w_ref, a_ref, mm_ref, pad_ref):
        # x_ref: (1, C, HW) native dtype; w_ref: SMEM (2*K*K,) f32
        # a_ref: (1, 1, H, W) f32; mm_ref: VMEM (2, HW) f32;
        # pad_ref: VMEM (2, H+2P, W+2P) f32
        x = x_ref[0]                                             # (C, HW)

        # Channel mean / max, lane-dense over the flattened spatial axis.
        mm_ref[0, :] = jnp.mean(x.astype(jnp.float32), axis=0)   # (HW,)
        mm_ref[1, :] = jnp.max(x, axis=0).astype(jnp.float32)    # (HW,)

        # Build the zero-padded (2, H+6, W+6) conv input row by row from the
        # flat maps (VMEM row loads; avoids an in-kernel (HW,)->(H,W) reshape).
        pad_ref[...] = jnp.zeros_like(pad_ref)
        for h in range(H):
            pad_ref[0, PAD + h, PAD:PAD + W] = mm_ref[0, h * W:(h + 1) * W]
            pad_ref[1, PAD + h, PAD:PAD + W] = mm_ref[1, h * W:(h + 1) * W]

        # 7x7 conv over the 2-channel [mean, max] map: 98 shifted MACs on the
        # VPU, weights read as SMEM scalars (no vreg extraction/broadcast).
        acc = jnp.zeros((H, W), jnp.float32)
        for ky in range(K):
            for kx in range(K):
                acc = acc + pad_ref[0, ky:ky + H, kx:kx + W] * w_ref[ky * K + kx]
                acc = acc + pad_ref[1, ky:ky + H, kx:kx + W] * w_ref[K * K + ky * K + kx]

        a_ref[0, 0] = jax.nn.sigmoid(acc)                         # (H, W) f32

    return kernel


# ----------------------------------------------------------------------------
# Pass 2: lane-dense elementwise apply  out = x * attn
# ----------------------------------------------------------------------------
def _apply_kernel(x_ref, a_ref, o_ref):
    # x_ref: (1, c_tile, HW) native dtype; a_ref: (1, 1, HW) f32
    attn = a_ref[0, 0]                                            # (HW,)
    o_ref[0] = x_ref[0] * attn[None, :].astype(o_ref.dtype)


def _pick_c_tile(C):
    """Channel tile: multiple of 8 dividing C, >=2 tiles when possible."""
    if C % 8 != 0:
        return C  # block equals full dim -> always legal (tiny-C case)
    for t in (128, 64, 32, 16, 8):
        if C % t == 0 and C // t >= 2:
            return t
    return C


def _vmem_limit(needed_bytes):
    return int(min(max(needed_bytes, 32 * (1 << 20)), 64 * (1 << 20)))


def spatial_attention(x, weight):
    """x: (N, C, H, W); weight: (1, 2, K, K) conv weight (no bias)."""
    N, C, H, W = x.shape
    HW = H * W
    xb = jnp.dtype(x.dtype).itemsize

    x_flat = x.reshape(N, C, HW)                     # free: contiguous NCHW
    w_flat = weight.astype(jnp.float32).reshape(2 * KSIZE * KSIZE)

    # ---------------- Pass 1: attention map ----------------
    # TODO(synk): for very large C*H*W (pass-1 input block > ~60 MiB on v7x),
    # tile the C axis with running sum/max accumulators instead of a full-C block.
    p1_needed = (2 * C * HW * xb                       # x block, double-buffered
                 + 2 * HW * 4                          # attn out, double-buffered
                 + 2 * HW * 4                          # mm scratch
                 + 2 * (H + 2 * PAD) * (W + 2 * PAD) * 4
                 + (2 << 20))
    attn = pl.pallas_call(
        _make_attn_kernel(C, H, W),
        out_shape=jax.ShapeDtypeStruct((N, 1, H, W), jnp.float32),
        grid_spec=pltpu.PrefetchScalarGridSpec(
            num_scalar_prefetch=0,
            grid=(N,),
            in_specs=[
                pl.BlockSpec((1, C, HW), lambda n: (n, 0, 0)),
                pl.BlockSpec(memory_space=pltpu.MemorySpace.SMEM),
            ],
            out_specs=pl.BlockSpec((1, 1, H, W), lambda n: (n, 0, 0, 0)),
            scratch_shapes=[
                pltpu.VMEM((2, HW), jnp.float32),
                pltpu.VMEM((2, H + 2 * PAD, W + 2 * PAD), jnp.float32),
            ],
        ),
        compiler_params=pltpu.CompilerParams(
            dimension_semantics=("parallel",),
            vmem_limit_bytes=_vmem_limit(p1_needed),
        ),
    )(x_flat, w_flat)

    attn_flat = attn.reshape(N, 1, HW)               # free: contiguous

    # ---------------- Pass 2: lane-dense apply ----------------
    c_tile = _pick_c_tile(C)
    p2_needed = (2 * (2 * c_tile * HW * xb)            # x + out blocks, double-buffered
                 + 2 * HW * 4                          # attn block
                 + (2 << 20))
    out_flat = pl.pallas_call(
        _apply_kernel,
        out_shape=jax.ShapeDtypeStruct((N, C, HW), x.dtype),
        grid_spec=pltpu.PrefetchScalarGridSpec(
            num_scalar_prefetch=0,
            grid=(N, C // c_tile),
            in_specs=[
                pl.BlockSpec((1, c_tile, HW), lambda n, c: (n, c, 0)),
                pl.BlockSpec((1, 1, HW), lambda n, c: (n, 0, 0)),
            ],
            out_specs=pl.BlockSpec((1, c_tile, HW), lambda n, c: (n, c, 0)),
        ),
        compiler_params=pltpu.CompilerParams(
            dimension_semantics=("parallel", "parallel"),
            vmem_limit_bytes=_vmem_limit(p2_needed),
        ),
    )(x_flat, attn_flat)

    return out_flat.reshape(N, C, H, W)


# ----------------------------------------------------------------------------
# Plain-JAX reference mirroring the PyTorch forward
# ----------------------------------------------------------------------------
def spatial_attention_ref(x, weight):
    xf = x.astype(jnp.float32)
    mean_map = jnp.mean(xf, axis=1, keepdims=True)        # (N,1,H,W)
    max_map = jnp.max(xf, axis=1, keepdims=True)          # (N,1,H,W)
    feat = jnp.concatenate([mean_map, max_map], axis=1)   # (N,2,H,W)
    conv = lax.conv_general_dilated(
        feat, weight.astype(jnp.float32),
        window_strides=(1, 1), padding=[(PAD, PAD), (PAD, PAD)],
        dimension_numbers=("NCHW", "OIHW", "NCHW"),
    )                                                      # (N,1,H,W)
    return (xf * jax.nn.sigmoid(conv)).astype(x.dtype)


if __name__ == "__main__":
    key = jax.random.PRNGKey(0)
    kx, kw = jax.random.split(key)

    # Small NCHW input consistent with the module.
    N, C, H, W = 2, 4, 16, 16
    x = jax.random.normal(kx, (N, C, H, W), dtype=jnp.float32)

    # PyTorch-default-like uniform init: fan_in = 2 * 7 * 7 = 98.
    fan_in = 2 * KSIZE * KSIZE
    bound = 1.0 / jnp.sqrt(jnp.float32(fan_in))
    weight = jax.random.uniform(
        kw, (1, 2, KSIZE, KSIZE), dtype=jnp.float32, minval=-bound, maxval=bound
    )

    out = spatial_attention(x, weight)
    out = jax.block_until_ready(out)

    ref = spatial_attention_ref(x, weight)
    assert out.shape == (N, C, H, W)
    assert jnp.allclose(out, ref, atol=1e-5, rtol=1e-5), "mismatch vs reference"

    print("KERNEL_OK")
</pallas_src>

<mosaic_0001>
module attributes {stable_mosaic.version = 11 : i64} {
  func.func @kernel(%arg0: i32, %arg1: memref<1x4x256xf32, #tpu.memory_space<vmem>>, %arg2: memref<98xf32, #tpu.memory_space<smem>>, %arg3: memref<1x1x16x16xf32, #tpu.memory_space<vmem>>, %arg4: memref<2x256xf32, #tpu.memory_space<vmem>>, %arg5: memref<2x22x22xf32, #tpu.memory_space<vmem>>) attributes {dimension_semantics = [#tpu.dimension_semantics<parallel>], iteration_bounds = array<i64: 2>, scalar_prefetch = 0 : i64, scratch_operands = 2 : i64, tpu.core_type = #tpu.core_type<tc>, window_params = [{transform_indices = @transform_0, window_bounds = array<i64: 1, 4, 256>}, {transform_indices = @transform_1, window_bounds = array<i64: 98>}, {transform_indices = @transform_2, window_bounds = array<i64: 1, 1, 16, 16>}]} {
    %c0 = arith.constant 0 : index
    %c0_0 = arith.constant 0 : index
    %c0_1 = arith.constant 0 : index
    %0 = vector.load %arg1[%c0, %c0_0, %c0_1] : memref<1x4x256xf32, #tpu.memory_space<vmem>>, vector<1x4x256xf32>
    %1 = vector.shape_cast %0 : vector<1x4x256xf32> to vector<4x256xf32>
    %cst = arith.constant dense<0.000000e+00> : vector<256xf32>
    %2 = vector.multi_reduction <add>, %1, %cst [0] : vector<4x256xf32> to vector<256xf32>
    %cst_2 = arith.constant 4.000000e+00 : f32
    %3 = vector.broadcast %cst_2 : f32 to vector<256xf32>
    %4 = arith.divf %2, %3 : vector<256xf32>
    %c0_3 = arith.constant 0 : index
    %c0_4 = arith.constant 0 : index
    %5 = vector.load %arg4[%c0_3, %c0_4] : memref<2x256xf32, #tpu.memory_space<vmem>>, vector<1x256xf32>
    %6 = vector.shape_cast %5 : vector<1x256xf32> to vector<256xf32>
    %7 = vector.shape_cast %4 : vector<256xf32> to vector<1x256xf32>
    tpu.vector_store %arg4[%c0_3, %c0_4], %7 {strides = array<i32>} : memref<2x256xf32, #tpu.memory_space<vmem>>, vector<1x256xf32>,
    %cst_5 = arith.constant dense<0xFF800000> : vector<256xf32>
    %8 = vector.multi_reduction <maximumf>, %1, %cst_5 [0] : vector<4x256xf32> to vector<256xf32>
    %c1 = arith.constant 1 : index
    %c0_6 = arith.constant 0 : index
    %9 = vector.load %arg4[%c1, %c0_6] : memref<2x256xf32, #tpu.memory_space<vmem>>, vector<1x256xf32>
    %10 = vector.shape_cast %9 : vector<1x256xf32> to vector<256xf32>
    %11 = vector.shape_cast %8 : vector<256xf32> to vector<1x256xf32>
    tpu.vector_store %arg4[%c1, %c0_6], %11 {strides = array<i32>} : memref<2x256xf32, #tpu.memory_space<vmem>>, vector<1x256xf32>,
    %cst_7 = arith.constant 0.000000e+00 : f32
    %12 = vector.broadcast %cst_7 : f32 to vector<2x22x22xf32>
    %c0_8 = arith.constant 0 : index
    %c0_9 = arith.constant 0 : index
    %c0_10 = arith.constant 0 : index
    %13 = vector.load %arg5[%c0_8, %c0_9, %c0_10] : memref<2x22x22xf32, #tpu.memory_space<vmem>>, vector<2x22x22xf32>
    tpu.vector_store %arg5[%c0_8, %c0_9, %c0_10], %12 {strides = array<i32>} : memref<2x22x22xf32, #tpu.memory_space<vmem>>, vector<2x22x22xf32>,
    %c0_11 = arith.constant 0 : index
    %c0_12 = arith.constant 0 : index
    %14 = vector.load %arg4[%c0_11, %c0_12] : memref<2x256xf32, #tpu.memory_space<vmem>>, vector<1x16xf32>
    %15 = vector.shape_cast %14 : vector<1x16xf32> to vector<16xf32>
    %c0_13 = arith.constant 0 : index
    %c3 = arith.constant 3 : index
    %c3_14 = arith.constant 3 : index
    %16 = vector.load %arg5[%c0_13, %c3, %c3_14] : memref<2x22x22xf32, #tpu.memory_space<vmem>>, vector<1x1x16xf32>
    %17 = vector.shape_cast %16 : vector<1x1x16xf32> to vector<16xf32>
    %18 = vector.shape_cast %15 : vector<16xf32> to vector<1x1x16xf32>
    tpu.vector_store %arg5[%c0_13, %c3, %c3_14], %18 {strides = array<i32>} : memref<2x22x22xf32, #tpu.memory_space<vmem>>, vector<1x1x16xf32>,
    %c1_15 = arith.constant 1 : index
    %c0_16 = arith.constant 0 : index
    %19 = vector.load %arg4[%c1_15, %c0_16] : memref<2x256xf32, #tpu.memory_space<vmem>>, vector<1x16xf32>
    %20 = vector.shape_cast %19 : vector<1x16xf32> to vector<16xf32>
    %c1_17 = arith.constant 1 : index
    %c3_18 = arith.constant 3 : index
    %c3_19 = arith.constant 3 : index
    %21 = vector.load %arg5[%c1_17, %c3_18, %c3_19] : memref<2x22x22xf32, #tpu.memory_space<vmem>>, vector<1x1x16xf32>
    %22 = vector.shape_cast %21 : vector<1x1x16xf32> to vector<16xf32>
    %23 = vector.shape_cast %20 : vector<16xf32> to vector<1x1x16xf32>
    tpu.vector_store %arg5[%c1_17, %c3_18, %c3_19], %23 {strides = array<i32>} : memref<2x22x22xf32, #tpu.memory_space<vmem>>, vector<1x1x16xf32>,
    %c0_20 = arith.constant 0 : index
    %c16 = arith.constant 16 : index
    %24 = vector.load %arg4[%c0_20, %c16] : memref<2x256xf32, #tpu.memory_space<vmem>>, vector<1x16xf32>
    %25 = vector.shape_cast %24 : vector<1x16xf32> to vector<16xf32>
    %c0_21 = arith.constant 0 : index
    %c4 = arith.constant 4 : index
    %c3_22 = arith.constant 3 : index
    %26 = vector.load %arg5[%c0_21, %c4, %c3_22] : memref<2x22x22xf32, #tpu.memory_space<vmem>>, vector<1x1x16xf32>
    %27 = vector.shape_cast %26 : vector<1x1x16xf32> to vector<16xf32>
    %28 = vector.shape_cast %25 : vector<16xf32> to vector<1x1x16xf32>
    tpu.vector_store %arg5[%c0_21, %c4, %c3_22], %28 {strides = array<i32>} : memref<2x22x22xf32, #tpu.memory_space<vmem>>, vector<1x1x16xf32>,
    %c1_23 = arith.constant 1 : index
    %c16_24 = arith.constant 16 : index
    %29 = vector.load %arg4[%c1_23, %c16_24] : memref<2x256xf32, #tpu.memory_space<vmem>>, vector<1x16xf32>
    %30 = vector.shape_cast %29 : vector<1x16xf32> to vector<16xf32>
    %c1_25 = arith.constant 1 : index
    %c4_26 = arith.constant 4 : index
    %c3_27 = arith.constant 3 : index
    %31 = vector.load %arg5[%c1_25, %c4_26, %c3_27] : memref<2x22x22xf32, #tpu.memory_space<vmem>>, vector<1x1x16xf32>
    %32 = vector.shape_cast %31 : vector<1x1x16xf32> to vector<16xf32>
    %33 = vector.shape_cast %30 : vector<16xf32> to vector<1x1x16xf32>
    tpu.vector_store %arg5[%c1_25, %c4_26, %c3_27], %33 {strides = array<i32>} : memref<2x22x22xf32, #tpu.memory_space<vmem>>, vector<1x1x16xf32>,
    %c0_28 = arith.constant 0 : index
    %c32 = arith.constant 32 : index
    %34 = vector.load %arg4[%c0_28, %c32] : memref<2x256xf32, #tpu.memory_space<vmem>>, vector<1x16xf32>
    %35 = vector.shape_cast %34 : vector<1x16xf32> to vector<16xf32>
    %c0_29 = arith.constant 0 : index
    %c5 = arith.constant 5 : index
    %c3_30 = arith.constant 3 : index
    %36 = vector.load %arg5[%c0_29, %c5, %c3_30] : memref<2x22x22xf32, #tpu.memory_space<vmem>>, vector<1x1x16xf32>
    %37 = vector.shape_cast %36 : vector<1x1x16xf32> to vector<16xf32>
    %38 = vector.shape_cast %35 : vector<16xf32> to vector<1x1x16xf32>
    tpu.vector_store %arg5[%c0_29, %c5, %c3_30], %38 {strides = array<i32>} : memref<2x22x22xf32, #tpu.memory_space<vmem>>, vector<1x1x16xf32>,
    %c1_31 = arith.constant 1 : index
    %c32_32 = arith.constant 32 : index
    %39 = vector.load %arg4[%c1_31, %c32_32] : memref<2x256xf32, #tpu.memory_space<vmem>>, vector<1x16xf32>
    %40 = vector.shape_cast %39 : vector<1x16xf32> to vector<16xf32>
    %c1_33 = arith.constant 1 : index
    %c5_34 = arith.constant 5 : index
    %c3_35 = arith.constant 3 : index
    %41 = vector.load %arg5[%c1_33, %c5_34, %c3_35] : memref<2x22x22xf32, #tpu.memory_space<vmem>>, vector<1x1x16xf32>
    %42 = vector.shape_cast %41 : vector<1x1x16xf32> to vector<16xf32>
    %43 = vector.shape_cast %40 : vector<16xf32> to vector<1x1x16xf32>
    tpu.vector_store %arg5[%c1_33, %c5_34, %c3_35], %43 {strides = array<i32>} : memref<2x22x22xf32, #tpu.memory_space<vmem>>, vector<1x1x16xf32>,
    %c0_36 = arith.constant 0 : index
    %c48 = arith.constant 48 : index
    %44 = vector.load %arg4[%c0_36, %c48] : memref<2x256xf32, #tpu.memory_space<vmem>>, vector<1x16xf32>
    %45 = vector.shape_cast %44 : vector<1x16xf32> to vector<16xf32>
    %c0_37 = arith.constant 0 : index
    %c6 = arith.constant 6 : index
    %c3_38 = arith.constant 3 : index
    %46 = vector.load %arg5[%c0_37, %c6, %c3_38] : memref<2x22x22xf32, #tpu.memory_space<vmem>>, vector<1x1x16xf32>
    %47 = vector.shape_cast %46 : vector<1x1x16xf32> to vector<16xf32>
    %48 = vector.shape_cast %45 : vector<16xf32> to vector<1x1x16xf32>
    tpu.vector_store %arg5[%c0_37, %c6, %c3_38], %48 {strides = array<i32>} : memref<2x22x22xf32, #tpu.memory_space<vmem>>, vector<1x1x16xf32>,
    %c1_39 = arith.constant 1 : index
    %c48_40 = arith.constant 48 : index
    %49 = vector.load %arg4[%c1_39, %c48_40] : memref<2x256xf32, #tpu.memory_space<vmem>>, vector<1x16xf32>
    %50 = vector.shape_cast %49 : vector<1x16xf32> to vector<16xf32>
    %c1_41 = arith.constant 1 : index
    %c6_42 = arith.constant 6 : index
    %c3_43 = arith.constant 3 : index
    %51 = vector.load %arg5[%c1_41, %c6_42, %c3_43] : memref<2x22x22xf32, #tpu.memory_space<vmem>>, vector<1x1x16xf32>
    %52 = vector.shape_cast %51 : vector<1x1x16xf32> to vector<16xf32>
    %53 = vector.shape_cast %50 : vector<16xf32> to vector<1x1x16xf32>
    tpu.vector_store %arg5[%c1_41, %c6_42, %c3_43], %53 {strides = array<i32>} : memref<2x22x22xf32, #tpu.memory_space<vmem>>, vector<1x1x16xf32>,
    %c0_44 = arith.constant 0 : index
    %c64 = arith.constant 64 : index
    %54 = vector.load %arg4[%c0_44, %c64] : memref<2x256xf32, #tpu.memory_space<vmem>>, vector<1x16xf32>
    %55 = vector.shape_cast %54 : vector<1x16xf32> to vector<16xf32>
    %c0_45 = arith.constant 0 : index
    %c7 = arith.constant 7 : index
    %c3_46 = arith.constant 3 : index
    %56 = vector.load %arg5[%c0_45, %c7, %c3_46] : memref<2x22x22xf32, #tpu.memory_space<vmem>>, vector<1x1x16xf32>
    %57 = vector.shape_cast %56 : vector<1x1x16xf32> to vector<16xf32>
    %58 = vector.shape_cast %55 : vector<16xf32> to vector<1x1x16xf32>
    tpu.vector_store %arg5[%c0_45, %c7, %c3_46], %58 {strides = array<i32>} : memref<2x22x22xf32, #tpu.memory_space<vmem>>, vector<1x1x16xf32>,
    %c1_47 = arith.constant 1 : index
    %c64_48 = arith.constant 64 : index
    %59 = vector.load %arg4[%c1_47, %c64_48] : memref<2x256xf32, #tpu.memory_space<vmem>>, vector<1x16xf32>
    %60 = vector.shape_cast %59 : vector<1x16xf32> to vector<16xf32>
    %c1_49 = arith.constant 1 : index
    %c7_50 = arith.constant 7 : index
    %c3_51 = arith.constant 3 : index
    %61 = vector.load %arg5[%c1_49, %c7_50, %c3_51] : memref<2x22x22xf32, #tpu.memory_space<vmem>>, vector<1x1x16xf32>
    %62 = vector.shape_cast %61 : vector<1x1x16xf32> to vector<16xf32>
    %63 = vector.shape_cast %60 : vector<16xf32> to vector<1x1x16xf32>
    tpu.vector_store %arg5[%c1_49, %c7_50, %c3_51], %63 {strides = array<i32>} : memref<2x22x22xf32, #tpu.memory_space<vmem>>, vector<1x1x16xf32>,
    %c0_52 = arith.constant 0 : index
    %c80 = arith.constant 80 : index
    %64 = vector.load %arg4[%c0_52, %c80] : memref<2x256xf32, #tpu.memory_space<vmem>>, vector<1x16xf32>
    %65 = vector.shape_cast %64 : vector<1x16xf32> to vector<16xf32>
    %c0_53 = arith.constant 0 : index
    %c8 = arith.constant 8 : index
    %c3_54 = arith.constant 3 : index
    %66 = vector.load %arg5[%c0_53, %c8, %c3_54] : memref<2x22x22xf32, #tpu.memory_space<vmem>>, vector<1x1x16xf32>
    %67 = vector.shape_cast %66 : vector<1x1x16xf32> to vector<16xf32>
    %68 = vector.shape_cast %65 : vector<16xf32> to vector<1x1x16xf32>
    tpu.vector_store %arg5[%c0_53, %c8, %c3_54], %68 {strides = array<i32>} : memref<2x22x22xf32, #tpu.memory_space<vmem>>, vector<1x1x16xf32>,
    %c1_55 = arith.constant 1 : index
    %c80_56 = arith.constant 80 : index
    %69 = vector.load %arg4[%c1_55, %c80_56] : memref<2x256xf32, #tpu.memory_space<vmem>>, vector<1x16xf32>
    %70 = vector.shape_cast %69 : vector<1x16xf32> to vector<16xf32>
    %c1_57 = arith.constant 1 : index
    %c8_58 = arith.constant 8 : index
    %c3_59 = arith.constant 3 : index
    %71 = vector.load %arg5[%c1_57, %c8_58, %c3_59] : memref<2x22x22xf32, #tpu.memory_space<vmem>>, vector<1x1x16xf32>
    %72 = vector.shape_cast %71 : vector<1x1x16xf32> to vector<16xf32>
    %73 = vector.shape_cast %70 : vector<16xf32> to vector<1x1x16xf32>
    tpu.vector_store %arg5[%c1_57, %c8_58, %c3_59], %73 {strides = array<i32>} : memref<2x22x22xf32, #tpu.memory_space<vmem>>, vector<1x1x16xf32>,
    %c0_60 = arith.constant 0 : index
    %c96 = arith.constant 96 : index
    %74 = vector.load %arg4[%c0_60, %c96] : memref<2x256xf32, #tpu.memory_space<vmem>>, vector<1x16xf32>
    %75 = vector.shape_cast %74 : vector<1x16xf32> to vector<16xf32>
    %c0_61 = arith.constant 0 : index
    %c9 = arith.constant 9 : index
    %c3_62 = arith.constant 3 : index
    %76 = vector.load %arg5[%c0_61, %c9, %c3_62] : memref<2x22x22xf32, #tpu.memory_space<vmem>>, vector<1x1x16xf32>
    %77 = vector.shape_cast %76 : vector<1x1x16xf32> to vector<16xf32>
    %78 = vector.shape_cast %75 : vector<16xf32> to vector<1x1x16xf32>
    tpu.vector_store %arg5[%c0_61, %c9, %c3_62], %78 {strides = array<i32>} : memref<2x22x22xf32, #tpu.memory_space<vmem>>, vector<1x1x16xf32>,
    %c1_63 = arith.constant 1 : index
    %c96_64 = arith.constant 96 : index
    %79 = vector.load %arg4[%c1_63, %c96_64] : memref<2x256xf32, #tpu.memory_space<vmem>>, vector<1x16xf32>
    %80 = vector.shape_cast %79 : vector<1x16xf32> to vector<16xf32>
    %c1_65 = arith.constant 1 : index
    %c9_66 = arith.constant 9 : index
    %c3_67 = arith.constant 3 : index
    %81 = vector.load %arg5[%c1_65, %c9_66, %c3_67] : memref<2x22x22xf32, #tpu.memory_space<vmem>>, vector<1x1x16xf32>
    %82 = vector.shape_cast %81 : vector<1x1x16xf32> to vector<16xf32>
    %83 = vector.shape_cast %80 : vector<16xf32> to vector<1x1x16xf32>
    tpu.vector_store %arg5[%c1_65, %c9_66, %c3_67], %83 {strides = array<i32>} : memref<2x22x22xf32, #tpu.memory_space<vmem>>, vector<1x1x16xf32>,
    %c0_68 = arith.constant 0 : index
    %c112 = arith.constant 112 : index
    %84 = vector.load %arg4[%c0_68, %c112] : memref<2x256xf32, #tpu.memory_space<vmem>>, vector<1x16xf32>
    %85 = vector.shape_cast %84 : vector<1x16xf32> to vector<16xf32>
    %c0_69 = arith.constant 0 : index
    %c10 = arith.constant 10 : index
    %c3_70 = arith.constant 3 : index
    %86 = vector.load %arg5[%c0_69, %c10, %c3_70] : memref<2x22x22xf32, #tpu.memory_space<vmem>>, vector<1x1x16xf32>
    %87 = vector.shape_cast %86 : vector<1x1x16xf32> to vector<16xf32>
    %88 = vector.shape_cast %85 : vector<16xf32> to vector<1x1x16xf32>
    tpu.vector_store %arg5[%c0_69, %c10, %c3_70], %88 {strides = array<i32>} : memref<2x22x22xf32, #tpu.memory_space<vmem>>, vector<1x1x16xf32>,
    %c1_71 = arith.constant 1 : index
    %c112_72 = arith.constant 112 : index
    %89 = vector.load %arg4[%c1_71, %c112_72] : memref<2x256xf32, #tpu.memory_space<vmem>>, vector<1x16xf32>
    %90 = vector.shape_cast %89 : vector<1x16xf32> to vector<16xf32>
    %c1_73 = arith.constant 1 : index
    %c10_74 = arith.constant 10 : index
    %c3_75 = arith.constant 3 : index
    %91 = vector.load %arg5[%c1_73, %c10_74, %c3_75] : memref<2x22x22xf32, #tpu.memory_space<vmem>>, vector<1x1x16xf32>
    %92 = vector.shape_cast %91 : vector<1x1x16xf32> to vector<16xf32>
    %93 = vector.shape_cast %90 : vector<16xf32> to vector<1x1x16xf32>
    tpu.vector_store %arg5[%c1_73, %c10_74, %c3_75], %93 {strides = array<i32>} : memref<2x22x22xf32, #tpu.memory_space<vmem>>, vector<1x1x16xf32>,
    %c0_76 = arith.constant 0 : index
    %c128 = arith.constant 128 : index
    %94 = vector.load %arg4[%c0_76, %c128] : memref<2x256xf32, #tpu.memory_space<vmem>>, vector<1x16xf32>
    %95 = vector.shape_cast %94 : vector<1x16xf32> to vector<16xf32>
    %c0_77 = arith.constant 0 : index
    %c11 = arith.constant 11 : index
    %c3_78 = arith.constant 3 : index
    %96 = vector.load %arg5[%c0_77, %c11, %c3_78] : memref<2x22x22xf32, #tpu.memory_space<vmem>>, vector<1x1x16xf32>
    %97 = vector.shape_cast %96 : vector<1x1x16xf32> to vector<16xf32>
    %98 = vector.shape_cast %95 : vector<16xf32> to vector<1x1x16xf32>
    tpu.vector_store %arg5[%c0_77, %c11, %c3_78], %98 {strides = array<i32>} : memref<2x22x22xf32, #tpu.memory_space<vmem>>, vector<1x1x16xf32>,
    %c1_79 = arith.constant 1 : index
    %c128_80 = arith.constant 128 : index
    %99 = vector.load %arg4[%c1_79, %c128_80] : memref<2x256xf32, #tpu.memory_space<vmem>>, vector<1x16xf32>
    %100 = vector.shape_cast %99 : vector<1x16xf32> to vector<16xf32>
    %c1_81 = arith.constant 1 : index
    %c11_82 = arith.constant 11 : index
    %c3_83 = arith.constant 3 : index
    %101 = vector.load %arg5[%c1_81, %c11_82, %c3_83] : memref<2x22x22xf32, #tpu.memory_space<vmem>>, vector<1x1x16xf32>
    %102 = vector.shape_cast %101 : vector<1x1x16xf32> to vector<16xf32>
    %103 = vector.shape_cast %100 : vector<16xf32> to vector<1x1x16xf32>
    tpu.vector_store %arg5[%c1_81, %c11_82, %c3_83], %103 {strides = array<i32>} : memref<2x22x22xf32, #tpu.memory_space<vmem>>, vector<1x1x16xf32>,
    %c0_84 = arith.constant 0 : index
    %c144 = arith.constant 144 : index
    %104 = vector.load %arg4[%c0_84, %c144] : memref<2x256xf32, #tpu.memory_space<vmem>>, vector<1x16xf32>
    %105 = vector.shape_cast %104 : vector<1x16xf32> to vector<16xf32>
    %c0_85 = arith.constant 0 : index
    %c12 = arith.constant 12 : index
    %c3_86 = arith.constant 3 : index
    %106 = vector.load %arg5[%c0_85, %c12, %c3_86] : memref<2x22x22xf32, #tpu.memory_space<vmem>>, vector<1x1x16xf32>
    %107 = vector.shape_cast %106 : vector<1x1x16xf32> to vector<16xf32>
    %108 = vector.shape_cast %105 : vector<16xf32> to vector<1x1x16xf32>
    tpu.vector_store %arg5[%c0_85, %c12, %c3_86], %108 {strides = array<i32>} : memref<2x22x22xf32, #tpu.memory_space<vmem>>, vector<1x1x16xf32>,
    %c1_87 = arith.constant 1 : index
    %c144_88 = arith.constant 144 : index
    %109 = vector.load %arg4[%c1_87, %c144_88] : memref<2x256xf32, #tpu.memory_space<vmem>>, vector<1x16xf32>
    %110 = vector.shape_cast %109 : vector<1x16xf32> to vector<16xf32>
    %c1_89 = arith.constant 1 : index
    %c12_90 = arith.constant 12 : index
    %c3_91 = arith.constant 3 : index
    %111 = vector.load %arg5[%c1_89, %c12_90, %c3_91] : memref<2x22x22xf32, #tpu.memory_space<vmem>>, vector<1x1x16xf32>
    %112 = vector.shape_cast %111 : vector<1x1x16xf32> to vector<16xf32>
    %113 = vector.shape_cast %110 : vector<16xf32> to vector<1x1x16xf32>
    tpu.vector_store %arg5[%c1_89, %c12_90, %c3_91], %113 {strides = array<i32>} : memref<2x22x22xf32, #tpu.memory_space<vmem>>, vector<1x1x16xf32>,
    %c0_92 = arith.constant 0 : index
    %c160 = arith.constant 160 : index
    %114 = vector.load %arg4[%c0_92, %c160] : memref<2x256xf32, #tpu.memory_space<vmem>>, vector<1x16xf32>
    %115 = vector.shape_cast %114 : vector<1x16xf32> to vector<16xf32>
    %c0_93 = arith.constant 0 : index
    %c13 = arith.constant 13 : index
    %c3_94 = arith.constant 3 : index
    %116 = vector.load %arg5[%c0_93, %c13, %c3_94] : memref<2x22x22xf32, #tpu.memory_space<vmem>>, vector<1x1x16xf32>
    %117 = vector.shape_cast %116 : vector<1x1x16xf32> to vector<16xf32>
    %118 = vector.shape_cast %115 : vector<16xf32> to vector<1x1x16xf32>
    tpu.vector_store %arg5[%c0_93, %c13, %c3_94], %118 {strides = array<i32>} : memref<2x22x22xf32, #tpu.memory_space<vmem>>, vector<1x1x16xf32>,
    %c1_95 = arith.constant 1 : index
    %c160_96 = arith.constant 160 : index
    %119 = vector.load %arg4[%c1_95, %c160_96] : memref<2x256xf32, #tpu.memory_space<vmem>>, vector<1x16xf32>
    %120 = vector.shape_cast %119 : vector<1x16xf32> to vector<16xf32>
    %c1_97 = arith.constant 1 : index
    %c13_98 = arith.constant 13 : index
    %c3_99 = arith.constant 3 : index
    %121 = vector.load %arg5[%c1_97, %c13_98, %c3_99] : memref<2x22x22xf32, #tpu.memory_space<vmem>>, vector<1x1x16xf32>
    %122 = vector.shape_cast %121 : vector<1x1x16xf32> to vector<16xf32>
    %123 = vector.shape_cast %120 : vector<16xf32> to vector<1x1x16xf32>
    tpu.vector_store %arg5[%c1_97, %c13_98, %c3_99], %123 {strides = array<i32>} : memref<2x22x22xf32, #tpu.memory_space<vmem>>, vector<1x1x16xf32>,
    %c0_100 = arith.constant 0 : index
    %c176 = arith.constant 176 : index
    %124 = vector.load %arg4[%c0_100, %c176] : memref<2x256xf32, #tpu.memory_space<vmem>>, vector<1x16xf32>
    %125 = vector.shape_cast %124 : vector<1x16xf32> to vector<16xf32>
    %c0_101 = arith.constant 0 : index
    %c14 = arith.constant 14 : index
    %c3_102 = arith.constant 3 : index
    %126 = vector.load %arg5[%c0_101, %c14, %c3_102] : memref<2x22x22xf32, #tpu.memory_space<vmem>>, vector<1x1x16xf32>
    %127 = vector.shape_cast %126 : vector<1x1x16xf32> to vector<16xf32>
    %128 = vector.shape_cast %125 : vector<16xf32> to vector<1x1x16xf32>
    tpu.vector_store %arg5[%c0_101, %c14, %c3_102], %128 {strides = array<i32>} : memref<2x22x22xf32, #tpu.memory_space<vmem>>, vector<1x1x16xf32>,
    %c1_103 = arith.constant 1 : index
    %c176_104 = arith.constant 176 : index
    %129 = vector.load %arg4[%c1_103, %c176_104] : memref<2x256xf32, #tpu.memory_space<vmem>>, vector<1x16xf32>
    %130 = vector.shape_cast %129 : vector<1x16xf32> to vector<16xf32>
    %c1_105 = arith.constant 1 : index
    %c14_106 = arith.constant 14 : index
    %c3_107 = arith.constant 3 : index
    %131 = vector.load %arg5[%c1_105, %c14_106, %c3_107] : memref<2x22x22xf32, #tpu.memory_space<vmem>>, vector<1x1x16xf32>
    %132 = vector.shape_cast %131 : vector<1x1x16xf32> to vector<16xf32>
    %133 = vector.shape_cast %130 : vector<16xf32> to vector<1x1x16xf32>
    tpu.vector_store %arg5[%c1_105, %c14_106, %c3_107], %133 {strides = array<i32>} : memref<2x22x22xf32, #tpu.memory_space<vmem>>, vector<1x1x16xf32>,
    %c0_108 = arith.constant 0 : index
    %c192 = arith.constant 192 : index
    %134 = vector.load %arg4[%c0_108, %c192] : memref<2x256xf32, #tpu.memory_space<vmem>>, vector<1x16xf32>
    %135 = vector.shape_cast %134 : vector<1x16xf32> to vector<16xf32>
    %c0_109 = arith.constant 0 : index
    %c15 = arith.constant 15 : index
    %c3_110 = arith.constant 3 : index
    %136 = vector.load %arg5[%c0_109, %c15, %c3_110] : memref<2x22x22xf32, #tpu.memory_space<vmem>>, vector<1x1x16xf32>
    %137 = vector.shape_cast %136 : vector<1x1x16xf32> to vector<16xf32>
    %138 = vector.shape_cast %135 : vector<16xf32> to vector<1x1x16xf32>
    tpu.vector_store %arg5[%c0_109, %c15, %c3_110], %138 {strides = array<i32>} : memref<2x22x22xf32, #tpu.memory_space<vmem>>, vector<1x1x16xf32>,
    %c1_111 = arith.constant 1 : index
    %c192_112 = arith.constant 192 : index
    %139 = vector.load %arg4[%c1_111, %c192_112] : memref<2x256xf32, #tpu.memory_space<vmem>>, vector<1x16xf32>
    %140 = vector.shape_cast %139 : vector<1x16xf32> to vector<16xf32>
    %c1_113 = arith.constant 1 : index
    %c15_114 = arith.constant 15 : index
    %c3_115 = arith.constant 3 : index
    %141 = vector.load %arg5[%c1_113, %c15_114, %c3_115] : memref<2x22x22xf32, #tpu.memory_space<vmem>>, vector<1x1x16xf32>
    %142 = vector.shape_cast %141 : vector<1x1x16xf32> to vector<16xf32>
    %143 = vector.shape_cast %140 : vector<16xf32> to vector<1x1x16xf32>
    tpu.vector_store %arg5[%c1_113, %c15_114, %c3_115], %143 {strides = array<i32>} : memref<2x22x22xf32, #tpu.memory_space<vmem>>, vector<1x1x16xf32>,
    %c0_116 = arith.constant 0 : index
    %c208 = arith.constant 208 : index
    %144 = vector.load %arg4[%c0_116, %c208] : memref<2x256xf32, #tpu.memory_space<vmem>>, vector<1x16xf32>
    %145 = vector.shape_cast %144 : vector<1x16xf32> to vector<16xf32>
    %c0_117 = arith.constant 0 : index
    %c16_118 = arith.constant 16 : index
    %c3_119 = arith.constant 3 : index
    %146 = vector.load %arg5[%c0_117, %c16_118, %c3_119] : memref<2x22x22xf32, #tpu.memory_space<vmem>>, vector<1x1x16xf32>
    %147 = vector.shape_cast %146 : vector<1x1x16xf32> to vector<16xf32>
    %148 = vector.shape_cast %145 : vector<16xf32> to vector<1x1x16xf32>
    tpu.vector_store %arg5[%c0_117, %c16_118, %c3_119], %148 {strides = array<i32>} : memref<2x22x22xf32, #tpu.memory_space<vmem>>, vector<1x1x16xf32>,
    %c1_120 = arith.constant 1 : index
    %c208_121 = arith.constant 208 : index
    %149 = vector.load %arg4[%c1_120, %c208_121] : memref<2x256xf32, #tpu.memory_space<vmem>>, vector<1x16xf32>
    %150 = vector.shape_cast %149 : vector<1x16xf32> to vector<16xf32>
    %c1_122 = arith.constant 1 : index
    %c16_123 = arith.constant 16 : index
    %c3_124 = arith.constant 3 : index
    %151 = vector.load %arg5[%c1_122, %c16_123, %c3_124] : memref<2x22x22xf32, #tpu.memory_space<vmem>>, vector<1x1x16xf32>
    %152 = vector.shape_cast %151 : vector<1x1x16xf32> to vector<16xf32>
    %153 = vector.shape_cast %150 : vector<16xf32> to vector<1x1x16xf32>
    tpu.vector_store %arg5[%c1_122, %c16_123, %c3_124], %153 {strides = array<i32>} : memref<2x22x22xf32, #tpu.memory_space<vmem>>, vector<1x1x16xf32>,
    %c0_125 = arith.constant 0 : index
    %c224 = arith.constant 224 : index
    %154 = vector.load %arg4[%c0_125, %c224] : memref<2x256xf32, #tpu.memory_space<vmem>>, vector<1x16xf32>
    %155 = vector.shape_cast %154 : vector<1x16xf32> to vector<16xf32>
    %c0_126 = arith.constant 0 : index
    %c17 = arith.constant 17 : index
    %c3_127 = arith.constant 3 : index
    %156 = vector.load %arg5[%c0_126, %c17, %c3_127] : memref<2x22x22xf32, #tpu.memory_space<vmem>>, vector<1x1x16xf32>
    %157 = vector.shape_cast %156 : vector<1x1x16xf32> to vector<16xf32>
    %158 = vector.shape_cast %155 : vector<16xf32> to vector<1x1x16xf32>
    tpu.vector_store %arg5[%c0_126, %c17, %c3_127], %158 {strides = array<i32>} : memref<2x22x22xf32, #tpu.memory_space<vmem>>, vector<1x1x16xf32>,
    %c1_128 = arith.constant 1 : index
    %c224_129 = arith.constant 224 : index
    %159 = vector.load %arg4[%c1_128, %c224_129] : memref<2x256xf32, #tpu.memory_space<vmem>>, vector<1x16xf32>
    %160 = vector.shape_cast %159 : vector<1x16xf32> to vector<16xf32>
    %c1_130 = arith.constant 1 : index
    %c17_131 = arith.constant 17 : index
    %c3_132 = arith.constant 3 : index
    %161 = vector.load %arg5[%c1_130, %c17_131, %c3_132] : memref<2x22x22xf32, #tpu.memory_space<vmem>>, vector<1x1x16xf32>
    %162 = vector.shape_cast %161 : vector<1x1x16xf32> to vector<16xf32>
    %163 = vector.shape_cast %160 : vector<16xf32> to vector<1x1x16xf32>
    tpu.vector_store %arg5[%c1_130, %c17_131, %c3_132], %163 {strides = array<i32>} : memref<2x22x22xf32, #tpu.memory_space<vmem>>, vector<1x1x16xf32>,
    %c0_133 = arith.constant 0 : index
    %c240 = arith.constant 240 : index
    %164 = vector.load %arg4[%c0_133, %c240] : memref<2x256xf32, #tpu.memory_space<vmem>>, vector<1x16xf32>
    %165 = vector.shape_cast %164 : vector<1x16xf32> to vector<16xf32>
    %c0_134 = arith.constant 0 : index
    %c18 = arith.constant 18 : index
    %c3_135 = arith.constant 3 : index
    %166 = vector.load %arg5[%c0_134, %c18, %c3_135] : memref<2x22x22xf32, #tpu.memory_space<vmem>>, vector<1x1x16xf32>
    %167 = vector.shape_cast %166 : vector<1x1x16xf32> to vector<16xf32>
    %168 = vector.shape_cast %165 : vector<16xf32> to vector<1x1x16xf32>
    tpu.vector_store %arg5[%c0_134, %c18, %c3_135], %168 {strides = array<i32>} : memref<2x22x22xf32, #tpu.memory_space<vmem>>, vector<1x1x16xf32>,
    %c1_136 = arith.constant 1 : index
    %c240_137 = arith.constant 240 : index
    %169 = vector.load %arg4[%c1_136, %c240_137] : memref<2x256xf32, #tpu.memory_space<vmem>>, vector<1x16xf32>
    %170 = vector.shape_cast %169 : vector<1x16xf32> to vector<16xf32>
    %c1_138 = arith.constant 1 : index
    %c18_139 = arith.constant 18 : index
    %c3_140 = arith.constant 3 : index
    %171 = vector.load %arg5[%c1_138, %c18_139, %c3_140] : memref<2x22x22xf32, #tpu.memory_space<vmem>>, vector<1x1x16xf32>
    %172 = vector.shape_cast %171 : vector<1x1x16xf32> to vector<16xf32>
    %173 = vector.shape_cast %170 : vector<16xf32> to vector<1x1x16xf32>
    tpu.vector_store %arg5[%c1_138, %c18_139, %c3_140], %173 {strides = array<i32>} : memref<2x22x22xf32, #tpu.memory_space<vmem>>, vector<1x1x16xf32>,
    %cst_141 = arith.constant 0.000000e+00 : f32
    %174 = vector.broadcast %cst_141 : f32 to vector<16x16xf32>
    %c0_142 = arith.constant 0 : index
    %c0_143 = arith.constant 0 : index
    %c0_144 = arith.constant 0 : index
    %175 = vector.load %arg5[%c0_142, %c0_143, %c0_144] : memref<2x22x22xf32, #tpu.memory_space<vmem>>, vector<1x16x16xf32>
    %176 = vector.shape_cast %175 : vector<1x16x16xf32> to vector<16x16xf32>
    %c0_145 = arith.constant 0 : index
    %177 = memref.load %arg2[%c0_145] : memref<98xf32, #tpu.memory_space<smem>>
    %178 = vector.broadcast %177 : f32 to vector<16x16xf32>
    %179 = arith.mulf %176, %178 : vector<16x16xf32>
    %180 = arith.addf %174, %179 : vector<16x16xf32>
    %c1_146 = arith.constant 1 : index
    %c0_147 = arith.constant 0 : index
    %c0_148 = arith.constant 0 : index
    %181 = vector.load %arg5[%c1_146, %c0_147, %c0_148] : memref<2x22x22xf32, #tpu.memory_space<vmem>>, vector<1x16x16xf32>
    %182 = vector.shape_cast %181 : vector<1x16x16xf32> to vector<16x16xf32>
    %c49 = arith.constant 49 : index
    %183 = memref.load %arg2[%c49] : memref<98xf32, #tpu.memory_space<smem>>
    %184 = vector.broadcast %183 : f32 to vector<16x16xf32>
    %185 = arith.mulf %182, %184 : vector<16x16xf32>
    %186 = arith.addf %180, %185 : vector<16x16xf32>
    %c0_149 = arith.constant 0 : index
    %c0_150 = arith.constant 0 : index
    %c1_151 = arith.constant 1 : index
    %187 = vector.load %arg5[%c0_149, %c0_150, %c1_151] : memref<2x22x22xf32, #tpu.memory_space<vmem>>, vector<1x16x16xf32>
    %188 = vector.shape_cast %187 : vector<1x16x16xf32> to vector<16x16xf32>
    %c1_152 = arith.constant 1 : index
    %189 = memref.load %arg2[%c1_152] : memref<98xf32, #tpu.memory_space<smem>>
    %190 = vector.broadcast %189 : f32 to vector<16x16xf32>
    %191 = arith.mulf %188, %190 : vector<16x16xf32>
    %192 = arith.addf %186, %191 : vector<16x16xf32>
    %c1_153 = arith.constant 1 : index
    %c0_154 = arith.constant 0 : index
    %c1_155 = arith.constant 1 : index
    %193 = vector.load %arg5[%c1_153, %c0_154, %c1_155] : memref<2x22x22xf32, #tpu.memory_space<vmem>>, vector<1x16x16xf32>
    %194 = vector.shape_cast %193 : vector<1x16x16xf32> to vector<16x16xf32>
    %c50 = arith.constant 50 : index
    %195 = memref.load %arg2[%c50] : memref<98xf32, #tpu.memory_space<smem>>
    %196 = vector.broadcast %195 : f32 to vector<16x16xf32>
    %197 = arith.mulf %194, %196 : vector<16x16xf32>
    %198 = arith.addf %192, %197 : vector<16x16xf32>
    %c0_156 = arith.constant 0 : index
    %c0_157 = arith.constant 0 : index
    %c2 = arith.constant 2 : index
    %199 = vector.load %arg5[%c0_156, %c0_157, %c2] : memref<2x22x22xf32, #tpu.memory_space<vmem>>, vector<1x16x16xf32>
    %200 = vector.shape_cast %199 : vector<1x16x16xf32> to vector<16x16xf32>
    %c2_158 = arith.constant 2 : index
    %201 = memref.load %arg2[%c2_158] : memref<98xf32, #tpu.memory_space<smem>>
    %202 = vector.broadcast %201 : f32 to vector<16x16xf32>
    %203 = arith.mulf %200, %202 : vector<16x16xf32>
    %204 = arith.addf %198, %203 : vector<16x16xf32>
    %c1_159 = arith.constant 1 : index
    %c0_160 = arith.constant 0 : index
    %c2_161 = arith.constant 2 : index
    %205 = vector.load %arg5[%c1_159, %c0_160, %c2_161] : memref<2x22x22xf32, #tpu.memory_space<vmem>>, vector<1x16x16xf32>
    %206 = vector.shape_cast %205 : vector<1x16x16xf32> to vector<16x16xf32>
    %c51 = arith.constant 51 : index
    %207 = memref.load %arg2[%c51] : memref<98xf32, #tpu.memory_space<smem>>
    %208 = vector.broadcast %207 : f32 to vector<16x16xf32>
    %209 = arith.mulf %206, %208 : vector<16x16xf32>
    %210 = arith.addf %204, %209 : vector<16x16xf32>
    %c0_162 = arith.constant 0 : index
    %c0_163 = arith.constant 0 : index
    %c3_164 = arith.constant 3 : index
    %211 = vector.load %arg5[%c0_162, %c0_163, %c3_164] : memref<2x22x22xf32, #tpu.memory_space<vmem>>, vector<1x16x16xf32>
    %212 = vector.shape_cast %211 : vector<1x16x16xf32> to vector<16x16xf32>
    %c3_165 = arith.constant 3 : index
    %213 = memref.load %arg2[%c3_165] : memref<98xf32, #tpu.memory_space<smem>>
    %214 = vector.broadcast %213 : f32 to vector<16x16xf32>
    %215 = arith.mulf %212, %214 : vector<16x16xf32>
    %216 = arith.addf %210, %215 : vector<16x16xf32>
    %c1_166 = arith.constant 1 : index
    %c0_167 = arith.constant 0 : index
    %c3_168 = arith.constant 3 : index
    %217 = vector.load %arg5[%c1_166, %c0_167, %c3_168] : memref<2x22x22xf32, #tpu.memory_space<vmem>>, vector<1x16x16xf32>
    %218 = vector.shape_cast %217 : vector<1x16x16xf32> to vector<16x16xf32>
    %c52 = arith.constant 52 : index
    %219 = memref.load %arg2[%c52] : memref<98xf32, #tpu.memory_space<smem>>
    %220 = vector.broadcast %219 : f32 to vector<16x16xf32>
    %221 = arith.mulf %218, %220 : vector<16x16xf32>
    %222 = arith.addf %216, %221 : vector<16x16xf32>
    %c0_169 = arith.constant 0 : index
    %c0_170 = arith.constant 0 : index
    %c4_171 = arith.constant 4 : index
    %223 = vector.load %arg5[%c0_169, %c0_170, %c4_171] : memref<2x22x22xf32, #tpu.memory_space<vmem>>, vector<1x16x16xf32>
    %224 = vector.shape_cast %223 : vector<1x16x16xf32> to vector<16x16xf32>
    %c4_172 = arith.constant 4 : index
    %225 = memref.load %arg2[%c4_172] : memref<98xf32, #tpu.memory_space<smem>>
    %226 = vector.broadcast %225 : f32 to vector<16x16xf32>
    %227 = arith.mulf %224, %226 : vector<16x16xf32>
    %228 = arith.addf %222, %227 : vector<16x16xf32>
    %c1_173 = arith.constant 1 : index
    %c0_174 = arith.constant 0 : index
    %c4_175 = arith.constant 4 : index
    %229 = vector.load %arg5[%c1_173, %c0_174, %c4_175] : memref<2x22x22xf32, #tpu.memory_space<vmem>>, vector<1x16x16xf32>
    %230 = vector.shape_cast %229 : vector<1x16x16xf32> to vector<16x16xf32>
    %c53 = arith.constant 53 : index
    %231 = memref.load %arg2[%c53] : memref<98xf32, #tpu.memory_space<smem>>
    %232 = vector.broadcast %231 : f32 to vector<16x16xf32>
    %233 = arith.mulf %230, %232 : vector<16x16xf32>
    %234 = arith.addf %228, %233 : vector<16x16xf32>
    %c0_176 = arith.constant 0 : index
    %c0_177 = arith.constant 0 : index
    %c5_178 = arith.constant 5 : index
    %235 = vector.load %arg5[%c0_176, %c0_177, %c5_178] : memref<2x22x22xf32, #tpu.memory_space<vmem>>, vector<1x16x16xf32>
    %236 = vector.shape_cast %235 : vector<1x16x16xf32> to vector<16x16xf32>
    %c5_179 = arith.constant 5 : index
    %237 = memref.load %arg2[%c5_179] : memref<98xf32, #tpu.memory_space<smem>>
    %238 = vector.broadcast %237 : f32 to vector<16x16xf32>
    %239 = arith.mulf %236, %238 : vector<16x16xf32>
    %240 = arith.addf %234, %239 : vector<16x16xf32>
    %c1_180 = arith.constant 1 : index
    %c0_181 = arith.constant 0 : index
    %c5_182 = arith.constant 5 : index
    %241 = vector.load %arg5[%c1_180, %c0_181, %c5_182] : memref<2x22x22xf32, #tpu.memory_space<vmem>>, vector<1x16x16xf32>
    %242 = vector.shape_cast %241 : vector<1x16x16xf32> to vector<16x16xf32>
    %c54 = arith.constant 54 : index
    %243 = memref.load %arg2[%c54] : memref<98xf32, #tpu.memory_space<smem>>
    %244 = vector.broadcast %243 : f32 to vector<16x16xf32>
    %245 = arith.mulf %242, %244 : vector<16x16xf32>
    %246 = arith.addf %240, %245 : vector<16x16xf32>
    %c0_183 = arith.constant 0 : index
    %c0_184 = arith.constant 0 : index
    %c6_185 = arith.constant 6 : index
    %247 = vector.load %arg5[%c0_183, %c0_184, %c6_185] : memref<2x22x22xf32, #tpu.memory_space<vmem>>, vector<1x16x16xf32>
    %248 = vector.shape_cast %247 : vector<1x16x16xf32> to vector<16x16xf32>
    %c6_186 = arith.constant 6 : index
    %249 = memref.load %arg2[%c6_186] : memref<98xf32, #tpu.memory_space<smem>>
    %250 = vector.broadcast %249 : f32 to vector<16x16xf32>
    %251 = arith.mulf %248, %250 : vector<16x16xf32>
    %252 = arith.addf %246, %251 : vector<16x16xf32>
    %c1_187 = arith.constant 1 : index
    %c0_188 = arith.constant 0 : index
    %c6_189 = arith.constant 6 : index
    %253 = vector.load %arg5[%c1_187, %c0_188, %c6_189] : memref<2x22x22xf32, #tpu.memory_space<vmem>>, vector<1x16x16xf32>
    %254 = vector.shape_cast %253 : vector<1x16x16xf32> to vector<16x16xf32>
    %c55 = arith.constant 55 : index
    %255 = memref.load %arg2[%c55] : memref<98xf32, #tpu.memory_space<smem>>
    %256 = vector.broadcast %255 : f32 to vector<16x16xf32>
    %257 = arith.mulf %254, %256 : vector<16x16xf32>
    %258 = arith.addf %252, %257 : vector<16x16xf32>
    %c0_190 = arith.constant 0 : index
    %c1_191 = arith.constant 1 : index
    %c0_192 = arith.constant 0 : index
    %259 = vector.load %arg5[%c0_190, %c1_191, %c0_192] : memref<2x22x22xf32, #tpu.memory_space<vmem>>, vector<1x16x16xf32>
    %260 = vector.shape_cast %259 : vector<1x16x16xf32> to vector<16x16xf32>
    %c7_193 = arith.constant 7 : index
    %261 = memref.load %arg2[%c7_193] : memref<98xf32, #tpu.memory_space<smem>>
    %262 = vector.broadcast %261 : f32 to vector<16x16xf32>
    %263 = arith.mulf %260, %262 : vector<16x16xf32>
    %264 = arith.addf %258, %263 : vector<16x16xf32>
    %c1_194 = arith.constant 1 : index
    %c1_195 = arith.constant 1 : index
    %c0_196 = arith.constant 0 : index
    %265 = vector.load %arg5[%c1_194, %c1_195, %c0_196] : memref<2x22x22xf32, #tpu.memory_space<vmem>>, vector<1x16x16xf32>
    %266 = vector.shape_cast %265 : vector<1x16x16xf32> to vector<16x16xf32>
    %c56 = arith.constant 56 : index
    %267 = memref.load %arg2[%c56] : memref<98xf32, #tpu.memory_space<smem>>
    %268 = vector.broadcast %267 : f32 to vector<16x16xf32>
    %269 = arith.mulf %266, %268 : vector<16x16xf32>
    %270 = arith.addf %264, %269 : vector<16x16xf32>
    %c0_197 = arith.constant 0 : index
    %c1_198 = arith.constant 1 : index
    %c1_199 = arith.constant 1 : index
    %271 = vector.load %arg5[%c0_197, %c1_198, %c1_199] : memref<2x22x22xf32, #tpu.memory_space<vmem>>, vector<1x16x16xf32>
    %272 = vector.shape_cast %271 : vector<1x16x16xf32> to vector<16x16xf32>
    %c8_200 = arith.constant 8 : index
    %273 = memref.load %arg2[%c8_200] : memref<98xf32, #tpu.memory_space<smem>>
    %274 = vector.broadcast %273 : f32 to vector<16x16xf32>
    %275 = arith.mulf %272, %274 : vector<16x16xf32>
    %276 = arith.addf %270, %275 : vector<16x16xf32>
    %c1_201 = arith.constant 1 : index
    %c1_202 = arith.constant 1 : index
    %c1_203 = arith.constant 1 : index
    %277 = vector.load %arg5[%c1_201, %c1_202, %c1_203] : memref<2x22x22xf32, #tpu.memory_space<vmem>>, vector<1x16x16xf32>
    %278 = vector.shape_cast %277 : vector<1x16x16xf32> to vector<16x16xf32>
    %c57 = arith.constant 57 : index
    %279 = memref.load %arg2[%c57] : memref<98xf32, #tpu.memory_space<smem>>
    %280 = vector.broadcast %279 : f32 to vector<16x16xf32>
    %281 = arith.mulf %278, %280 : vector<16x16xf32>
    %282 = arith.addf %276, %281 : vector<16x16xf32>
    %c0_204 = arith.constant 0 : index
    %c1_205 = arith.constant 1 : index
    %c2_206 = arith.constant 2 : index
    %283 = vector.load %arg5[%c0_204, %c1_205, %c2_206] : memref<2x22x22xf32, #tpu.memory_space<vmem>>, vector<1x16x16xf32>
    %284 = vector.shape_cast %283 : vector<1x16x16xf32> to vector<16x16xf32>
    %c9_207 = arith.constant 9 : index
    %285 = memref.load %arg2[%c9_207] : memref<98xf32, #tpu.memory_space<smem>>
    %286 = vector.broadcast %285 : f32 to vector<16x16xf32>
    %287 = arith.mulf %284, %286 : vector<16x16xf32>
    %288 = arith.addf %282, %287 : vector<16x16xf32>
    %c1_208 = arith.constant 1 : index
    %c1_209 = arith.constant 1 : index
    %c2_210 = arith.constant 2 : index
    %289 = vector.load %arg5[%c1_208, %c1_209, %c2_210] : memref<2x22x22xf32, #tpu.memory_space<vmem>>, vector<1x16x16xf32>
    %290 = vector.shape_cast %289 : vector<1x16x16xf32> to vector<16x16xf32>
    %c58 = arith.constant 58 : index
    %291 = memref.load %arg2[%c58] : memref<98xf32, #tpu.memory_space<smem>>
    %292 = vector.broadcast %291 : f32 to vector<16x16xf32>
    %293 = arith.mulf %290, %292 : vector<16x16xf32>
    %294 = arith.addf %288, %293 : vector<16x16xf32>
    %c0_211 = arith.constant 0 : index
    %c1_212 = arith.constant 1 : index
    %c3_213 = arith.constant 3 : index
    %295 = vector.load %arg5[%c0_211, %c1_212, %c3_213] : memref<2x22x22xf32, #tpu.memory_space<vmem>>, vector<1x16x16xf32>
    %296 = vector.shape_cast %295 : vector<1x16x16xf32> to vector<16x16xf32>
    %c10_214 = arith.constant 10 : index
    %297 = memref.load %arg2[%c10_214] : memref<98xf32, #tpu.memory_space<smem>>
    %298 = vector.broadcast %297 : f32 to vector<16x16xf32>
    %299 = arith.mulf %296, %298 : vector<16x16xf32>
    %300 = arith.addf %294, %299 : vector<16x16xf32>
    %c1_215 = arith.constant 1 : index
    %c1_216 = arith.constant 1 : index
    %c3_217 = arith.constant 3 : index
    %301 = vector.load %arg5[%c1_215, %c1_216, %c3_217] : memref<2x22x22xf32, #tpu.memory_space<vmem>>, vector<1x16x16xf32>
    %302 = vector.shape_cast %301 : vector<1x16x16xf32> to vector<16x16xf32>
    %c59 = arith.constant 59 : index
    %303 = memref.load %arg2[%c59] : memref<98xf32, #tpu.memory_space<smem>>
    %304 = vector.broadcast %303 : f32 to vector<16x16xf32>
    %305 = arith.mulf %302, %304 : vector<16x16xf32>
    %306 = arith.addf %300, %305 : vector<16x16xf32>
    %c0_218 = arith.constant 0 : index
    %c1_219 = arith.constant 1 : index
    %c4_220 = arith.constant 4 : index
    %307 = vector.load %arg5[%c0_218, %c1_219, %c4_220] : memref<2x22x22xf32, #tpu.memory_space<vmem>>, vector<1x16x16xf32>
    %308 = vector.shape_cast %307 : vector<1x16x16xf32> to vector<16x16xf32>
    %c11_221 = arith.constant 11 : index
    %309 = memref.load %arg2[%c11_221] : memref<98xf32, #tpu.memory_space<smem>>
    %310 = vector.broadcast %309 : f32 to vector<16x16xf32>
    %311 = arith.mulf %308, %310 : vector<16x16xf32>
    %312 = arith.addf %306, %311 : vector<16x16xf32>
    %c1_222 = arith.constant 1 : index
    %c1_223 = arith.constant 1 : index
    %c4_224 = arith.constant 4 : index
    %313 = vector.load %arg5[%c1_222, %c1_223, %c4_224] : memref<2x22x22xf32, #tpu.memory_space<vmem>>, vector<1x16x16xf32>
    %314 = vector.shape_cast %313 : vector<1x16x16xf32> to vector<16x16xf32>
    %c60 = arith.constant 60 : index
    %315 = memref.load %arg2[%c60] : memref<98xf32, #tpu.memory_space<smem>>
    %316 = vector.broadcast %315 : f32 to vector<16x16xf32>
    %317 = arith.mulf %314, %316 : vector<16x16xf32>
    %318 = arith.addf %312, %317 : vector<16x16xf32>
    %c0_225 = arith.constant 0 : index
    %c1_226 = arith.constant 1 : index
    %c5_227 = arith.constant 5 : index
    %319 = vector.load %arg5[%c0_225, %c1_226, %c5_227] : memref<2x22x22xf32, #tpu.memory_space<vmem>>, vector<1x16x16xf32>
    %320 = vector.shape_cast %319 : vector<1x16x16xf32> to vector<16x16xf32>
    %c12_228 = arith.constant 12 : index
    %321 = memref.load %arg2[%c12_228] : memref<98xf32, #tpu.memory_space<smem>>
    %322 = vector.broadcast %321 : f32 to vector<16x16xf32>
    %323 = arith.mulf %320, %322 : vector<16x16xf32>
    %324 = arith.addf %318, %323 : vector<16x16xf32>
    %c1_229 = arith.constant 1 : index
    %c1_230 = arith.constant 1 : index
    %c5_231 = arith.constant 5 : index
    %325 = vector.load %arg5[%c1_229, %c1_230, %c5_231] : memref<2x22x22xf32, #tpu.memory_space<vmem>>, vector<1x16x16xf32>
    %326 = vector.shape_cast %325 : vector<1x16x16xf32> to vector<16x16xf32>
    %c61 = arith.constant 61 : index
    %327 = memref.load %arg2[%c61] : memref<98xf32, #tpu.memory_space<smem>>
    %328 = vector.broadcast %327 : f32 to vector<16x16xf32>
    %329 = arith.mulf %326, %328 : vector<16x16xf32>
    %330 = arith.addf %324, %329 : vector<16x16xf32>
    %c0_232 = arith.constant 0 : index
    %c1_233 = arith.constant 1 : index
    %c6_234 = arith.constant 6 : index
    %331 = vector.load %arg5[%c0_232, %c1_233, %c6_234] : memref<2x22x22xf32, #tpu.memory_space<vmem>>, vector<1x16x16xf32>
    %332 = vector.shape_cast %331 : vector<1x16x16xf32> to vector<16x16xf32>
    %c13_235 = arith.constant 13 : index
    %333 = memref.load %arg2[%c13_235] : memref<98xf32, #tpu.memory_space<smem>>
    %334 = vector.broadcast %333 : f32 to vector<16x16xf32>
    %335 = arith.mulf %332, %334 : vector<16x16xf32>
    %336 = arith.addf %330, %335 : vector<16x16xf32>
    %c1_236 = arith.constant 1 : index
    %c1_237 = arith.constant 1 : index
    %c6_238 = arith.constant 6 : index
    %337 = vector.load %arg5[%c1_236, %c1_237, %c6_238] : memref<2x22x22xf32, #tpu.memory_space<vmem>>, vector<1x16x16xf32>
    %338 = vector.shape_cast %337 : vector<1x16x16xf32> to vector<16x16xf32>
    %c62 = arith.constant 62 : index
    %339 = memref.load %arg2[%c62] : memref<98xf32, #tpu.memory_space<smem>>
    %340 = vector.broadcast %339 : f32 to vector<16x16xf32>
    %341 = arith.mulf %338, %340 : vector<16x16xf32>
    %342 = arith.addf %336, %341 : vector<16x16xf32>
    %c0_239 = arith.constant 0 : index
    %c2_240 = arith.constant 2 : index
    %c0_241 = arith.constant 0 : index
    %343 = vector.load %arg5[%c0_239, %c2_240, %c0_241] : memref<2x22x22xf32, #tpu.memory_space<vmem>>, vector<1x16x16xf32>
    %344 = vector.shape_cast %343 : vector<1x16x16xf32> to vector<16x16xf32>
    %c14_242 = arith.constant 14 : index
    %345 = memref.load %arg2[%c14_242] : memref<98xf32, #tpu.memory_space<smem>>
    %346 = vector.broadcast %345 : f32 to vector<16x16xf32>
    %347 = arith.mulf %344, %346 : vector<16x16xf32>
    %348 = arith.addf %342, %347 : vector<16x16xf32>
    %c1_243 = arith.constant 1 : index
    %c2_244 = arith.constant 2 : index
    %c0_245 = arith.constant 0 : index
    %349 = vector.load %arg5[%c1_243, %c2_244, %c0_245] : memref<2x22x22xf32, #tpu.memory_space<vmem>>, vector<1x16x16xf32>
    %350 = vector.shape_cast %349 : vector<1x16x16xf32> to vector<16x16xf32>
    %c63 = arith.constant 63 : index
    %351 = memref.load %arg2[%c63] : memref<98xf32, #tpu.memory_space<smem>>
    %352 = vector.broadcast %351 : f32 to vector<16x16xf32>
    %353 = arith.mulf %350, %352 : vector<16x16xf32>
    %354 = arith.addf %348, %353 : vector<16x16xf32>
    %c0_246 = arith.constant 0 : index
    %c2_247 = arith.constant 2 : index
    %c1_248 = arith.constant 1 : index
    %355 = vector.load %arg5[%c0_246, %c2_247, %c1_248] : memref<2x22x22xf32, #tpu.memory_space<vmem>>, vector<1x16x16xf32>
    %356 = vector.shape_cast %355 : vector<1x16x16xf32> to vector<16x16xf32>
    %c15_249 = arith.constant 15 : index
    %357 = memref.load %arg2[%c15_249] : memref<98xf32, #tpu.memory_space<smem>>
    %358 = vector.broadcast %357 : f32 to vector<16x16xf32>
    %359 = arith.mulf %356, %358 : vector<16x16xf32>
    %360 = arith.addf %354, %359 : vector<16x16xf32>
    %c1_250 = arith.constant 1 : index
    %c2_251 = arith.constant 2 : index
    %c1_252 = arith.constant 1 : index
    %361 = vector.load %arg5[%c1_250, %c2_251, %c1_252] : memref<2x22x22xf32, #tpu.memory_space<vmem>>, vector<1x16x16xf32>
    %362 = vector.shape_cast %361 : vector<1x16x16xf32> to vector<16x16xf32>
    %c64_253 = arith.constant 64 : index
    %363 = memref.load %arg2[%c64_253] : memref<98xf32, #tpu.memory_space<smem>>
    %364 = vector.broadcast %363 : f32 to vector<16x16xf32>
    %365 = arith.mulf %362, %364 : vector<16x16xf32>
    %366 = arith.addf %360, %365 : vector<16x16xf32>
    %c0_254 = arith.constant 0 : index
    %c2_255 = arith.constant 2 : index
    %c2_256 = arith.constant 2 : index
    %367 = vector.load %arg5[%c0_254, %c2_255, %c2_256] : memref<2x22x22xf32, #tpu.memory_space<vmem>>, vector<1x16x16xf32>
    %368 = vector.shape_cast %367 : vector<1x16x16xf32> to vector<16x16xf32>
    %c16_257 = arith.constant 16 : index
    %369 = memref.load %arg2[%c16_257] : memref<98xf32, #tpu.memory_space<smem>>
    %370 = vector.broadcast %369 : f32 to vector<16x16xf32>
    %371 = arith.mulf %368, %370 : vector<16x16xf32>
    %372 = arith.addf %366, %371 : vector<16x16xf32>
    %c1_258 = arith.constant 1 : index
    %c2_259 = arith.constant 2 : index
    %c2_260 = arith.constant 2 : index
    %373 = vector.load %arg5[%c1_258, %c2_259, %c2_260] : memref<2x22x22xf32, #tpu.memory_space<vmem>>, vector<1x16x16xf32>
    %374 = vector.shape_cast %373 : vector<1x16x16xf32> to vector<16x16xf32>
    %c65 = arith.constant 65 : index
    %375 = memref.load %arg2[%c65] : memref<98xf32, #tpu.memory_space<smem>>
    %376 = vector.broadcast %375 : f32 to vector<16x16xf32>
    %377 = arith.mulf %374, %376 : vector<16x16xf32>
    %378 = arith.addf %372, %377 : vector<16x16xf32>
    %c0_261 = arith.constant 0 : index
    %c2_262 = arith.constant 2 : index
    %c3_263 = arith.constant 3 : index
    %379 = vector.load %arg5[%c0_261, %c2_262, %c3_263] : memref<2x22x22xf32, #tpu.memory_space<vmem>>, vector<1x16x16xf32>
    %380 = vector.shape_cast %379 : vector<1x16x16xf32> to vector<16x16xf32>
    %c17_264 = arith.constant 17 : index
    %381 = memref.load %arg2[%c17_264] : memref<98xf32, #tpu.memory_space<smem>>
    %382 = vector.broadcast %381 : f32 to vector<16x16xf32>
    %383 = arith.mulf %380, %382 : vector<16x16xf32>
    %384 = arith.addf %378, %383 : vector<16x16xf32>
    %c1_265 = arith.constant 1 : index
    %c2_266 = arith.constant 2 : index
    %c3_267 = arith.constant 3 : index
    %385 = vector.load %arg5[%c1_265, %c2_266, %c3_267] : memref<2x22x22xf32, #tpu.memory_space<vmem>>, vector<1x16x16xf32>
    %386 = vector.shape_cast %385 : vector<1x16x16xf32> to vector<16x16xf32>
    %c66 = arith.constant 66 : index
    %387 = memref.load %arg2[%c66] : memref<98xf32, #tpu.memory_space<smem>>
    %388 = vector.broadcast %387 : f32 to vector<16x16xf32>
    %389 = arith.mulf %386, %388 : vector<16x16xf32>
    %390 = arith.addf %384, %389 : vector<16x16xf32>
    %c0_268 = arith.constant 0 : index
    %c2_269 = arith.constant 2 : index
    %c4_270 = arith.constant 4 : index
    %391 = vector.load %arg5[%c0_268, %c2_269, %c4_270] : memref<2x22x22xf32, #tpu.memory_space<vmem>>, vector<1x16x16xf32>
    %392 = vector.shape_cast %391 : vector<1x16x16xf32> to vector<16x16xf32>
    %c18_271 = arith.constant 18 : index
    %393 = memref.load %arg2[%c18_271] : memref<98xf32, #tpu.memory_space<smem>>
    %394 = vector.broadcast %393 : f32 to vector<16x16xf32>
    %395 = arith.mulf %392, %394 : vector<16x16xf32>
    %396 = arith.addf %390, %395 : vector<16x16xf32>
    %c1_272 = arith.constant 1 : index
    %c2_273 = arith.constant 2 : index
    %c4_274 = arith.constant 4 : index
    %397 = vector.load %arg5[%c1_272, %c2_273, %c4_274] : memref<2x22x22xf32, #tpu.memory_space<vmem>>, vector<1x16x16xf32>
    %398 = vector.shape_cast %397 : vector<1x16x16xf32> to vector<16x16xf32>
    %c67 = arith.constant 67 : index
    %399 = memref.load %arg2[%c67] : memref<98xf32, #tpu.memory_space<smem>>
    %400 = vector.broadcast %399 : f32 to vector<16x16xf32>
    %401 = arith.mulf %398, %400 : vector<16x16xf32>
    %402 = arith.addf %396, %401 : vector<16x16xf32>
    %c0_275 = arith.constant 0 : index
    %c2_276 = arith.constant 2 : index
    %c5_277 = arith.constant 5 : index
    %403 = vector.load %arg5[%c0_275, %c2_276, %c5_277] : memref<2x22x22xf32, #tpu.memory_space<vmem>>, vector<1x16x16xf32>
    %404 = vector.shape_cast %403 : vector<1x16x16xf32> to vector<16x16xf32>
    %c19 = arith.constant 19 : index
    %405 = memref.load %arg2[%c19] : memref<98xf32, #tpu.memory_space<smem>>
    %406 = vector.broadcast %405 : f32 to vector<16x16xf32>
    %407 = arith.mulf %404, %406 : vector<16x16xf32>
    %408 = arith.addf %402, %407 : vector<16x16xf32>
    %c1_278 = arith.constant 1 : index
    %c2_279 = arith.constant 2 : index
    %c5_280 = arith.constant 5 : index
    %409 = vector.load %arg5[%c1_278, %c2_279, %c5_280] : memref<2x22x22xf32, #tpu.memory_space<vmem>>, vector<1x16x16xf32>
    %410 = vector.shape_cast %409 : vector<1x16x16xf32> to vector<16x16xf32>
    %c68 = arith.constant 68 : index
    %411 = memref.load %arg2[%c68] : memref<98xf32, #tpu.memory_space<smem>>
    %412 = vector.broadcast %411 : f32 to vector<16x16xf32>
    %413 = arith.mulf %410, %412 : vector<16x16xf32>
    %414 = arith.addf %408, %413 : vector<16x16xf32>
    %c0_281 = arith.constant 0 : index
    %c2_282 = arith.constant 2 : index
    %c6_283 = arith.constant 6 : index
    %415 = vector.load %arg5[%c0_281, %c2_282, %c6_283] : memref<2x22x22xf32, #tpu.memory_space<vmem>>, vector<1x16x16xf32>
    %416 = vector.shape_cast %415 : vector<1x16x16xf32> to vector<16x16xf32>
    %c20 = arith.constant 20 : index
    %417 = memref.load %arg2[%c20] : memref<98xf32, #tpu.memory_space<smem>>
    %418 = vector.broadcast %417 : f32 to vector<16x16xf32>
    %419 = arith.mulf %416, %418 : vector<16x16xf32>
    %420 = arith.addf %414, %419 : vector<16x16xf32>
    %c1_284 = arith.constant 1 : index
    %c2_285 = arith.constant 2 : index
    %c6_286 = arith.constant 6 : index
    %421 = vector.load %arg5[%c1_284, %c2_285, %c6_286] : memref<2x22x22xf32, #tpu.memory_space<vmem>>, vector<1x16x16xf32>
    %422 = vector.shape_cast %421 : vector<1x16x16xf32> to vector<16x16xf32>
    %c69 = arith.constant 69 : index
    %423 = memref.load %arg2[%c69] : memref<98xf32, #tpu.memory_space<smem>>
    %424 = vector.broadcast %423 : f32 to vector<16x16xf32>
    %425 = arith.mulf %422, %424 : vector<16x16xf32>
    %426 = arith.addf %420, %425 : vector<16x16xf32>
    %c0_287 = arith.constant 0 : index
    %c3_288 = arith.constant 3 : index
    %c0_289 = arith.constant 0 : index
    %427 = vector.load %arg5[%c0_287, %c3_288, %c0_289] : memref<2x22x22xf32, #tpu.memory_space<vmem>>, vector<1x16x16xf32>
    %428 = vector.shape_cast %427 : vector<1x16x16xf32> to vector<16x16xf32>
    %c21 = arith.constant 21 : index
    %429 = memref.load %arg2[%c21] : memref<98xf32, #tpu.memory_space<smem>>
    %430 = vector.broadcast %429 : f32 to vector<16x16xf32>
    %431 = arith.mulf %428, %430 : vector<16x16xf32>
    %432 = arith.addf %426, %431 : vector<16x16xf32>
    %c1_290 = arith.constant 1 : index
    %c3_291 = arith.constant 3 : index
    %c0_292 = arith.constant 0 : index
    %433 = vector.load %arg5[%c1_290, %c3_291, %c0_292] : memref<2x22x22xf32, #tpu.memory_space<vmem>>, vector<1x16x16xf32>
    %434 = vector.shape_cast %433 : vector<1x16x16xf32> to vector<16x16xf32>
    %c70 = arith.constant 70 : index
    %435 = memref.load %arg2[%c70] : memref<98xf32, #tpu.memory_space<smem>>
    %436 = vector.broadcast %435 : f32 to vector<16x16xf32>
    %437 = arith.mulf %434, %436 : vector<16x16xf32>
    %438 = arith.addf %432, %437 : vector<16x16xf32>
    %c0_293 = arith.constant 0 : index
    %c3_294 = arith.constant 3 : index
    %c1_295 = arith.constant 1 : index
    %439 = vector.load %arg5[%c0_293, %c3_294, %c1_295] : memref<2x22x22xf32, #tpu.memory_space<vmem>>, vector<1x16x16xf32>
    %440 = vector.shape_cast %439 : vector<1x16x16xf32> to vector<16x16xf32>
    %c22 = arith.constant 22 : index
    %441 = memref.load %arg2[%c22] : memref<98xf32, #tpu.memory_space<smem>>
    %442 = vector.broadcast %441 : f32 to vector<16x16xf32>
    %443 = arith.mulf %440, %442 : vector<16x16xf32>
    %444 = arith.addf %438, %443 : vector<16x16xf32>
    %c1_296 = arith.constant 1 : index
    %c3_297 = arith.constant 3 : index
    %c1_298 = arith.constant 1 : index
    %445 = vector.load %arg5[%c1_296, %c3_297, %c1_298] : memref<2x22x22xf32, #tpu.memory_space<vmem>>, vector<1x16x16xf32>
    %446 = vector.shape_cast %445 : vector<1x16x16xf32> to vector<16x16xf32>
    %c71 = arith.constant 71 : index
    %447 = memref.load %arg2[%c71] : memref<98xf32, #tpu.memory_space<smem>>
    %448 = vector.broadcast %447 : f32 to vector<16x16xf32>
    %449 = arith.mulf %446, %448 : vector<16x16xf32>
    %450 = arith.addf %444, %449 : vector<16x16xf32>
    %c0_299 = arith.constant 0 : index
    %c3_300 = arith.constant 3 : index
    %c2_301 = arith.constant 2 : index
    %451 = vector.load %arg5[%c0_299, %c3_300, %c2_301] : memref<2x22x22xf32, #tpu.memory_space<vmem>>, vector<1x16x16xf32>
    %452 = vector.shape_cast %451 : vector<1x16x16xf32> to vector<16x16xf32>
    %c23 = arith.constant 23 : index
    %453 = memref.load %arg2[%c23] : memref<98xf32, #tpu.memory_space<smem>>
    %454 = vector.broadcast %453 : f32 to vector<16x16xf32>
    %455 = arith.mulf %452, %454 : vector<16x16xf32>
    %456 = arith.addf %450, %455 : vector<16x16xf32>
    %c1_302 = arith.constant 1 : index
    %c3_303 = arith.constant 3 : index
    %c2_304 = arith.constant 2 : index
    %457 = vector.load %arg5[%c1_302, %c3_303, %c2_304] : memref<2x22x22xf32, #tpu.memory_space<vmem>>, vector<1x16x16xf32>
    %458 = vector.shape_cast %457 : vector<1x16x16xf32> to vector<16x16xf32>
    %c72 = arith.constant 72 : index
    %459 = memref.load %arg2[%c72] : memref<98xf32, #tpu.memory_space<smem>>
    %460 = vector.broadcast %459 : f32 to vector<16x16xf32>
    %461 = arith.mulf %458, %460 : vector<16x16xf32>
    %462 = arith.addf %456, %461 : vector<16x16xf32>
    %c0_305 = arith.constant 0 : index
    %c3_306 = arith.constant 3 : index
    %c3_307 = arith.constant 3 : index
    %463 = vector.load %arg5[%c0_305, %c3_306, %c3_307] : memref<2x22x22xf32, #tpu.memory_space<vmem>>, vector<1x16x16xf32>
    %464 = vector.shape_cast %463 : vector<1x16x16xf32> to vector<16x16xf32>
    %c24 = arith.constant 24 : index
    %465 = memref.load %arg2[%c24] : memref<98xf32, #tpu.memory_space<smem>>
    %466 = vector.broadcast %465 : f32 to vector<16x16xf32>
    %467 = arith.mulf %464, %466 : vector<16x16xf32>
    %468 = arith.addf %462, %467 : vector<16x16xf32>
    %c1_308 = arith.constant 1 : index
    %c3_309 = arith.constant 3 : index
    %c3_310 = arith.constant 3 : index
    %469 = vector.load %arg5[%c1_308, %c3_309, %c3_310] : memref<2x22x22xf32, #tpu.memory_space<vmem>>, vector<1x16x16xf32>
    %470 = vector.shape_cast %469 : vector<1x16x16xf32> to vector<16x16xf32>
    %c73 = arith.constant 73 : index
    %471 = memref.load %arg2[%c73] : memref<98xf32, #tpu.memory_space<smem>>
    %472 = vector.broadcast %471 : f32 to vector<16x16xf32>
    %473 = arith.mulf %470, %472 : vector<16x16xf32>
    %474 = arith.addf %468, %473 : vector<16x16xf32>
    %c0_311 = arith.constant 0 : index
    %c3_312 = arith.constant 3 : index
    %c4_313 = arith.constant 4 : index
    %475 = vector.load %arg5[%c0_311, %c3_312, %c4_313] : memref<2x22x22xf32, #tpu.memory_space<vmem>>, vector<1x16x16xf32>
    %476 = vector.shape_cast %475 : vector<1x16x16xf32> to vector<16x16xf32>
    %c25 = arith.constant 25 : index
    %477 = memref.load %arg2[%c25] : memref<98xf32, #tpu.memory_space<smem>>
    %478 = vector.broadcast %477 : f32 to vector<16x16xf32>
    %479 = arith.mulf %476, %478 : vector<16x16xf32>
    %480 = arith.addf %474, %479 : vector<16x16xf32>
    %c1_314 = arith.constant 1 : index
    %c3_315 = arith.constant 3 : index
    %c4_316 = arith.constant 4 : index
    %481 = vector.load %arg5[%c1_314, %c3_315, %c4_316] : memref<2x22x22xf32, #tpu.memory_space<vmem>>, vector<1x16x16xf32>
    %482 = vector.shape_cast %481 : vector<1x16x16xf32> to vector<16x16xf32>
    %c74 = arith.constant 74 : index
    %483 = memref.load %arg2[%c74] : memref<98xf32, #tpu.memory_space<smem>>
    %484 = vector.broadcast %483 : f32 to vector<16x16xf32>
    %485 = arith.mulf %482, %484 : vector<16x16xf32>
    %486 = arith.addf %480, %485 : vector<16x16xf32>
    %c0_317 = arith.constant 0 : index
    %c3_318 = arith.constant 3 : index
    %c5_319 = arith.constant 5 : index
    %487 = vector.load %arg5[%c0_317, %c3_318, %c5_319] : memref<2x22x22xf32, #tpu.memory_space<vmem>>, vector<1x16x16xf32>
    %488 = vector.shape_cast %487 : vector<1x16x16xf32> to vector<16x16xf32>
    %c26 = arith.constant 26 : index
    %489 = memref.load %arg2[%c26] : memref<98xf32, #tpu.memory_space<smem>>
    %490 = vector.broadcast %489 : f32 to vector<16x16xf32>
    %491 = arith.mulf %488, %490 : vector<16x16xf32>
    %492 = arith.addf %486, %491 : vector<16x16xf32>
    %c1_320 = arith.constant 1 : index
    %c3_321 = arith.constant 3 : index
    %c5_322 = arith.constant 5 : index
    %493 = vector.load %arg5[%c1_320, %c3_321, %c5_322] : memref<2x22x22xf32, #tpu.memory_space<vmem>>, vector<1x16x16xf32>
    %494 = vector.shape_cast %493 : vector<1x16x16xf32> to vector<16x16xf32>
    %c75 = arith.constant 75 : index
    %495 = memref.load %arg2[%c75] : memref<98xf32, #tpu.memory_space<smem>>
    %496 = vector.broadcast %495 : f32 to vector<16x16xf32>
    %497 = arith.mulf %494, %496 : vector<16x16xf32>
    %498 = arith.addf %492, %497 : vector<16x16xf32>
    %c0_323 = arith.constant 0 : index
    %c3_324 = arith.constant 3 : index
    %c6_325 = arith.constant 6 : index
    %499 = vector.load %arg5[%c0_323, %c3_324, %c6_325] : memref<2x22x22xf32, #tpu.memory_space<vmem>>, vector<1x16x16xf32>
    %500 = vector.shape_cast %499 : vector<1x16x16xf32> to vector<16x16xf32>
    %c27 = arith.constant 27 : index
    %501 = memref.load %arg2[%c27] : memref<98xf32, #tpu.memory_space<smem>>
    %502 = vector.broadcast %501 : f32 to vector<16x16xf32>
    %503 = arith.mulf %500, %502 : vector<16x16xf32>
    %504 = arith.addf %498, %503 : vector<16x16xf32>
    %c1_326 = arith.constant 1 : index
    %c3_327 = arith.constant 3 : index
    %c6_328 = arith.constant 6 : index
    %505 = vector.load %arg5[%c1_326, %c3_327, %c6_328] : memref<2x22x22xf32, #tpu.memory_space<vmem>>, vector<1x16x16xf32>
    %506 = vector.shape_cast %505 : vector<1x16x16xf32> to vector<16x16xf32>
    %c76 = arith.constant 76 : index
    %507 = memref.load %arg2[%c76] : memref<98xf32, #tpu.memory_space<smem>>
    %508 = vector.broadcast %507 : f32 to vector<16x16xf32>
    %509 = arith.mulf %506, %508 : vector<16x16xf32>
    %510 = arith.addf %504, %509 : vector<16x16xf32>
    %c0_329 = arith.constant 0 : index
    %c4_330 = arith.constant 4 : index
    %c0_331 = arith.constant 0 : index
    %511 = vector.load %arg5[%c0_329, %c4_330, %c0_331] : memref<2x22x22xf32, #tpu.memory_space<vmem>>, vector<1x16x16xf32>
    %512 = vector.shape_cast %511 : vector<1x16x16xf32> to vector<16x16xf32>
    %c28 = arith.constant 28 : index
    %513 = memref.load %arg2[%c28] : memref<98xf32, #tpu.memory_space<smem>>
    %514 = vector.broadcast %513 : f32 to vector<16x16xf32>
    %515 = arith.mulf %512, %514 : vector<16x16xf32>
    %516 = arith.addf %510, %515 : vector<16x16xf32>
    %c1_332 = arith.constant 1 : index
    %c4_333 = arith.constant 4 : index
    %c0_334 = arith.constant 0 : index
    %517 = vector.load %arg5[%c1_332, %c4_333, %c0_334] : memref<2x22x22xf32, #tpu.memory_space<vmem>>, vector<1x16x16xf32>
    %518 = vector.shape_cast %517 : vector<1x16x16xf32> to vector<16x16xf32>
    %c77 = arith.constant 77 : index
    %519 = memref.load %arg2[%c77] : memref<98xf32, #tpu.memory_space<smem>>
    %520 = vector.broadcast %519 : f32 to vector<16x16xf32>
    %521 = arith.mulf %518, %520 : vector<16x16xf32>
    %522 = arith.addf %516, %521 : vector<16x16xf32>
    %c0_335 = arith.constant 0 : index
    %c4_336 = arith.constant 4 : index
    %c1_337 = arith.constant 1 : index
    %523 = vector.load %arg5[%c0_335, %c4_336, %c1_337] : memref<2x22x22xf32, #tpu.memory_space<vmem>>, vector<1x16x16xf32>
    %524 = vector.shape_cast %523 : vector<1x16x16xf32> to vector<16x16xf32>
    %c29 = arith.constant 29 : index
    %525 = memref.load %arg2[%c29] : memref<98xf32, #tpu.memory_space<smem>>
    %526 = vector.broadcast %525 : f32 to vector<16x16xf32>
    %527 = arith.mulf %524, %526 : vector<16x16xf32>
    %528 = arith.addf %522, %527 : vector<16x16xf32>
    %c1_338 = arith.constant 1 : index
    %c4_339 = arith.constant 4 : index
    %c1_340 = arith.constant 1 : index
    %529 = vector.load %arg5[%c1_338, %c4_339, %c1_340] : memref<2x22x22xf32, #tpu.memory_space<vmem>>, vector<1x16x16xf32>
    %530 = vector.shape_cast %529 : vector<1x16x16xf32> to vector<16x16xf32>
    %c78 = arith.constant 78 : index
    %531 = memref.load %arg2[%c78] : memref<98xf32, #tpu.memory_space<smem>>
    %532 = vector.broadcast %531 : f32 to vector<16x16xf32>
    %533 = arith.mulf %530, %532 : vector<16x16xf32>
    %534 = arith.addf %528, %533 : vector<16x16xf32>
    %c0_341 = arith.constant 0 : index
    %c4_342 = arith.constant 4 : index
    %c2_343 = arith.constant 2 : index
    %535 = vector.load %arg5[%c0_341, %c4_342, %c2_343] : memref<2x22x22xf32, #tpu.memory_space<vmem>>, vector<1x16x16xf32>
    %536 = vector.shape_cast %535 : vector<1x16x16xf32> to vector<16x16xf32>
    %c30 = arith.constant 30 : index
    %537 = memref.load %arg2[%c30] : memref<98xf32, #tpu.memory_space<smem>>
    %538 = vector.broadcast %537 : f32 to vector<16x16xf32>
    %539 = arith.mulf %536, %538 : vector<16x16xf32>
    %540 = arith.addf %534, %539 : vector<16x16xf32>
    %c1_344 = arith.constant 1 : index
    %c4_345 = arith.constant 4 : index
    %c2_346 = arith.constant 2 : index
    %541 = vector.load %arg5[%c1_344, %c4_345, %c2_346] : memref<2x22x22xf32, #tpu.memory_space<vmem>>, vector<1x16x16xf32>
    %542 = vector.shape_cast %541 : vector<1x16x16xf32> to vector<16x16xf32>
    %c79 = arith.constant 79 : index
    %543 = memref.load %arg2[%c79] : memref<98xf32, #tpu.memory_space<smem>>
    %544 = vector.broadcast %543 : f32 to vector<16x16xf32>
    %545 = arith.mulf %542, %544 : vector<16x16xf32>
    %546 = arith.addf %540, %545 : vector<16x16xf32>
    %c0_347 = arith.constant 0 : index
    %c4_348 = arith.constant 4 : index
    %c3_349 = arith.constant 3 : index
    %547 = vector.load %arg5[%c0_347, %c4_348, %c3_349] : memref<2x22x22xf32, #tpu.memory_space<vmem>>, vector<1x16x16xf32>
    %548 = vector.shape_cast %547 : vector<1x16x16xf32> to vector<16x16xf32>
    %c31 = arith.constant 31 : index
    %549 = memref.load %arg2[%c31] : memref<98xf32, #tpu.memory_space<smem>>
    %550 = vector.broadcast %549 : f32 to vector<16x16xf32>
    %551 = arith.mulf %548, %550 : vector<16x16xf32>
    %552 = arith.addf %546, %551 : vector<16x16xf32>
    %c1_350 = arith.constant 1 : index
    %c4_351 = arith.constant 4 : index
    %c3_352 = arith.constant 3 : index
    %553 = vector.load %arg5[%c1_350, %c4_351, %c3_352] : memref<2x22x22xf32, #tpu.memory_space<vmem>>, vector<1x16x16xf32>
    %554 = vector.shape_cast %553 : vector<1x16x16xf32> to vector<16x16xf32>
    %c80_353 = arith.constant 80 : index
    %555 = memref.load %arg2[%c80_353] : memref<98xf32, #tpu.memory_space<smem>>
    %556 = vector.broadcast %555 : f32 to vector<16x16xf32>
    %557 = arith.mulf %554, %556 : vector<16x16xf32>
    %558 = arith.addf %552, %557 : vector<16x16xf32>
    %c0_354 = arith.constant 0 : index
    %c4_355 = arith.constant 4 : index
    %c4_356 = arith.constant 4 : index
    %559 = vector.load %arg5[%c0_354, %c4_355, %c4_356] : memref<2x22x22xf32, #tpu.memory_space<vmem>>, vector<1x16x16xf32>
    %560 = vector.shape_cast %559 : vector<1x16x16xf32> to vector<16x16xf32>
    %c32_357 = arith.constant 32 : index
    %561 = memref.load %arg2[%c32_357] : memref<98xf32, #tpu.memory_space<smem>>
    %562 = vector.broadcast %561 : f32 to vector<16x16xf32>
    %563 = arith.mulf %560, %562 : vector<16x16xf32>
    %564 = arith.addf %558, %563 : vector<16x16xf32>
    %c1_358 = arith.constant 1 : index
    %c4_359 = arith.constant 4 : index
    %c4_360 = arith.constant 4 : index
    %565 = vector.load %arg5[%c1_358, %c4_359, %c4_360] : memref<2x22x22xf32, #tpu.memory_space<vmem>>, vector<1x16x16xf32>
    %566 = vector.shape_cast %565 : vector<1x16x16xf32> to vector<16x16xf32>
    %c81 = arith.constant 81 : index
    %567 = memref.load %arg2[%c81] : memref<98xf32, #tpu.memory_space<smem>>
    %568 = vector.broadcast %567 : f32 to vector<16x16xf32>
    %569 = arith.mulf %566, %568 : vector<16x16xf32>
    %570 = arith.addf %564, %569 : vector<16x16xf32>
    %c0_361 = arith.constant 0 : index
    %c4_362 = arith.constant 4 : index
    %c5_363 = arith.constant 5 : index
    %571 = vector.load %arg5[%c0_361, %c4_362, %c5_363] : memref<2x22x22xf32, #tpu.memory_space<vmem>>, vector<1x16x16xf32>
    %572 = vector.shape_cast %571 : vector<1x16x16xf32> to vector<16x16xf32>
    %c33 = arith.constant 33 : index
    %573 = memref.load %arg2[%c33] : memref<98xf32, #tpu.memory_space<smem>>
    %574 = vector.broadcast %573 : f32 to vector<16x16xf32>
    %575 = arith.mulf %572, %574 : vector<16x16xf32>
    %576 = arith.addf %570, %575 : vector<16x16xf32>
    %c1_364 = arith.constant 1 : index
    %c4_365 = arith.constant 4 : index
    %c5_366 = arith.constant 5 : index
    %577 = vector.load %arg5[%c1_364, %c4_365, %c5_366] : memref<2x22x22xf32, #tpu.memory_space<vmem>>, vector<1x16x16xf32>
    %578 = vector.shape_cast %577 : vector<1x16x16xf32> to vector<16x16xf32>
    %c82 = arith.constant 82 : index
    %579 = memref.load %arg2[%c82] : memref<98xf32, #tpu.memory_space<smem>>
    %580 = vector.broadcast %579 : f32 to vector<16x16xf32>
    %581 = arith.mulf %578, %580 : vector<16x16xf32>
    %582 = arith.addf %576, %581 : vector<16x16xf32>
    %c0_367 = arith.constant 0 : index
    %c4_368 = arith.constant 4 : index
    %c6_369 = arith.constant 6 : index
    %583 = vector.load %arg5[%c0_367, %c4_368, %c6_369] : memref<2x22x22xf32, #tpu.memory_space<vmem>>, vector<1x16x16xf32>
    %584 = vector.shape_cast %583 : vector<1x16x16xf32> to vector<16x16xf32>
    %c34 = arith.constant 34 : index
    %585 = memref.load %arg2[%c34] : memref<98xf32, #tpu.memory_space<smem>>
    %586 = vector.broadcast %585 : f32 to vector<16x16xf32>
    %587 = arith.mulf %584, %586 : vector<16x16xf32>
    %588 = arith.addf %582, %587 : vector<16x16xf32>
    %c1_370 = arith.constant 1 : index
    %c4_371 = arith.constant 4 : index
    %c6_372 = arith.constant 6 : index
    %589 = vector.load %arg5[%c1_370, %c4_371, %c6_372] : memref<2x22x22xf32, #tpu.memory_space<vmem>>, vector<1x16x16xf32>
    %590 = vector.shape_cast %589 : vector<1x16x16xf32> to vector<16x16xf32>
    %c83 = arith.constant 83 : index
    %591 = memref.load %arg2[%c83] : memref<98xf32, #tpu.memory_space<smem>>
    %592 = vector.broadcast %591 : f32 to vector<16x16xf32>
    %593 = arith.mulf %590, %592 : vector<16x16xf32>
    %594 = arith.addf %588, %593 : vector<16x16xf32>
    %c0_373 = arith.constant 0 : index
    %c5_374 = arith.constant 5 : index
    %c0_375 = arith.constant 0 : index
    %595 = vector.load %arg5[%c0_373, %c5_374, %c0_375] : memref<2x22x22xf32, #tpu.memory_space<vmem>>, vector<1x16x16xf32>
    %596 = vector.shape_cast %595 : vector<1x16x16xf32> to vector<16x16xf32>
    %c35 = arith.constant 35 : index
    %597 = memref.load %arg2[%c35] : memref<98xf32, #tpu.memory_space<smem>>
    %598 = vector.broadcast %597 : f32 to vector<16x16xf32>
    %599 = arith.mulf %596, %598 : vector<16x16xf32>
    %600 = arith.addf %594, %599 : vector<16x16xf32>
    %c1_376 = arith.constant 1 : index
    %c5_377 = arith.constant 5 : index
    %c0_378 = arith.constant 0 : index
    %601 = vector.load %arg5[%c1_376, %c5_377, %c0_378] : memref<2x22x22xf32, #tpu.memory_space<vmem>>, vector<1x16x16xf32>
    %602 = vector.shape_cast %601 : vector<1x16x16xf32> to vector<16x16xf32>
    %c84 = arith.constant 84 : index
    %603 = memref.load %arg2[%c84] : memref<98xf32, #tpu.memory_space<smem>>
    %604 = vector.broadcast %603 : f32 to vector<16x16xf32>
    %605 = arith.mulf %602, %604 : vector<16x16xf32>
    %606 = arith.addf %600, %605 : vector<16x16xf32>
    %c0_379 = arith.constant 0 : index
    %c5_380 = arith.constant 5 : index
    %c1_381 = arith.constant 1 : index
    %607 = vector.load %arg5[%c0_379, %c5_380, %c1_381] : memref<2x22x22xf32, #tpu.memory_space<vmem>>, vector<1x16x16xf32>
    %608 = vector.shape_cast %607 : vector<1x16x16xf32> to vector<16x16xf32>
    %c36 = arith.constant 36 : index
    %609 = memref.load %arg2[%c36] : memref<98xf32, #tpu.memory_space<smem>>
    %610 = vector.broadcast %609 : f32 to vector<16x16xf32>
    %611 = arith.mulf %608, %610 : vector<16x16xf32>
    %612 = arith.addf %606, %611 : vector<16x16xf32>
    %c1_382 = arith.constant 1 : index
    %c5_383 = arith.constant 5 : index
    %c1_384 = arith.constant 1 : index
    %613 = vector.load %arg5[%c1_382, %c5_383, %c1_384] : memref<2x22x22xf32, #tpu.memory_space<vmem>>, vector<1x16x16xf32>
    %614 = vector.shape_cast %613 : vector<1x16x16xf32> to vector<16x16xf32>
    %c85 = arith.constant 85 : index
    %615 = memref.load %arg2[%c85] : memref<98xf32, #tpu.memory_space<smem>>
    %616 = vector.broadcast %615 : f32 to vector<16x16xf32>
    %617 = arith.mulf %614, %616 : vector<16x16xf32>
    %618 = arith.addf %612, %617 : vector<16x16xf32>
    %c0_385 = arith.constant 0 : index
    %c5_386 = arith.constant 5 : index
    %c2_387 = arith.constant 2 : index
    %619 = vector.load %arg5[%c0_385, %c5_386, %c2_387] : memref<2x22x22xf32, #tpu.memory_space<vmem>>, vector<1x16x16xf32>
    %620 = vector.shape_cast %619 : vector<1x16x16xf32> to vector<16x16xf32>
    %c37 = arith.constant 37 : index
    %621 = memref.load %arg2[%c37] : memref<98xf32, #tpu.memory_space<smem>>
    %622 = vector.broadcast %621 : f32 to vector<16x16xf32>
    %623 = arith.mulf %620, %622 : vector<16x16xf32>
    %624 = arith.addf %618, %623 : vector<16x16xf32>
    %c1_388 = arith.constant 1 : index
    %c5_389 = arith.constant 5 : index
    %c2_390 = arith.constant 2 : index
    %625 = vector.load %arg5[%c1_388, %c5_389, %c2_390] : memref<2x22x22xf32, #tpu.memory_space<vmem>>, vector<1x16x16xf32>
    %626 = vector.shape_cast %625 : vector<1x16x16xf32> to vector<16x16xf32>
    %c86 = arith.constant 86 : index
    %627 = memref.load %arg2[%c86] : memref<98xf32, #tpu.memory_space<smem>>
    %628 = vector.broadcast %627 : f32 to vector<16x16xf32>
    %629 = arith.mulf %626, %628 : vector<16x16xf32>
    %630 = arith.addf %624, %629 : vector<16x16xf32>
    %c0_391 = arith.constant 0 : index
    %c5_392 = arith.constant 5 : index
    %c3_393 = arith.constant 3 : index
    %631 = vector.load %arg5[%c0_391, %c5_392, %c3_393] : memref<2x22x22xf32, #tpu.memory_space<vmem>>, vector<1x16x16xf32>
    %632 = vector.shape_cast %631 : vector<1x16x16xf32> to vector<16x16xf32>
    %c38 = arith.constant 38 : index
    %633 = memref.load %arg2[%c38] : memref<98xf32, #tpu.memory_space<smem>>
    %634 = vector.broadcast %633 : f32 to vector<16x16xf32>
    %635 = arith.mulf %632, %634 : vector<16x16xf32>
    %636 = arith.addf %630, %635 : vector<16x16xf32>
    %c1_394 = arith.constant 1 : index
    %c5_395 = arith.constant 5 : index
    %c3_396 = arith.constant 3 : index
    %637 = vector.load %arg5[%c1_394, %c5_395, %c3_396] : memref<2x22x22xf32, #tpu.memory_space<vmem>>, vector<1x16x16xf32>
    %638 = vector.shape_cast %637 : vector<1x16x16xf32> to vector<16x16xf32>
    %c87 = arith.constant 87 : index
    %639 = memref.load %arg2[%c87] : memref<98xf32, #tpu.memory_space<smem>>
    %640 = vector.broadcast %639 : f32 to vector<16x16xf32>
    %641 = arith.mulf %638, %640 : vector<16x16xf32>
    %642 = arith.addf %636, %641 : vector<16x16xf32>
    %c0_397 = arith.constant 0 : index
    %c5_398 = arith.constant 5 : index
    %c4_399 = arith.constant 4 : index
    %643 = vector.load %arg5[%c0_397, %c5_398, %c4_399] : memref<2x22x22xf32, #tpu.memory_space<vmem>>, vector<1x16x16xf32>
    %644 = vector.shape_cast %643 : vector<1x16x16xf32> to vector<16x16xf32>
    %c39 = arith.constant 39 : index
    %645 = memref.load %arg2[%c39] : memref<98xf32, #tpu.memory_space<smem>>
    %646 = vector.broadcast %645 : f32 to vector<16x16xf32>
    %647 = arith.mulf %644, %646 : vector<16x16xf32>
    %648 = arith.addf %642, %647 : vector<16x16xf32>
    %c1_400 = arith.constant 1 : index
    %c5_401 = arith.constant 5 : index
    %c4_402 = arith.constant 4 : index
    %649 = vector.load %arg5[%c1_400, %c5_401, %c4_402] : memref<2x22x22xf32, #tpu.memory_space<vmem>>, vector<1x16x16xf32>
    %650 = vector.shape_cast %649 : vector<1x16x16xf32> to vector<16x16xf32>
    %c88 = arith.constant 88 : index
    %651 = memref.load %arg2[%c88] : memref<98xf32, #tpu.memory_space<smem>>
    %652 = vector.broadcast %651 : f32 to vector<16x16xf32>
    %653 = arith.mulf %650, %652 : vector<16x16xf32>
    %654 = arith.addf %648, %653 : vector<16x16xf32>
    %c0_403 = arith.constant 0 : index
    %c5_404 = arith.constant 5 : index
    %c5_405 = arith.constant 5 : index
    %655 = vector.load %arg5[%c0_403, %c5_404, %c5_405] : memref<2x22x22xf32, #tpu.memory_space<vmem>>, vector<1x16x16xf32>
    %656 = vector.shape_cast %655 : vector<1x16x16xf32> to vector<16x16xf32>
    %c40 = arith.constant 40 : index
    %657 = memref.load %arg2[%c40] : memref<98xf32, #tpu.memory_space<smem>>
    %658 = vector.broadcast %657 : f32 to vector<16x16xf32>
    %659 = arith.mulf %656, %658 : vector<16x16xf32>
    %660 = arith.addf %654, %659 : vector<16x16xf32>
    %c1_406 = arith.constant 1 : index
    %c5_407 = arith.constant 5 : index
    %c5_408 = arith.constant 5 : index
    %661 = vector.load %arg5[%c1_406, %c5_407, %c5_408] : memref<2x22x22xf32, #tpu.memory_space<vmem>>, vector<1x16x16xf32>
    %662 = vector.shape_cast %661 : vector<1x16x16xf32> to vector<16x16xf32>
    %c89 = arith.constant 89 : index
    %663 = memref.load %arg2[%c89] : memref<98xf32, #tpu.memory_space<smem>>
    %664 = vector.broadcast %663 : f32 to vector<16x16xf32>
    %665 = arith.mulf %662, %664 : vector<16x16xf32>
    %666 = arith.addf %660, %665 : vector<16x16xf32>
    %c0_409 = arith.constant 0 : index
    %c5_410 = arith.constant 5 : index
    %c6_411 = arith.constant 6 : index
    %667 = vector.load %arg5[%c0_409, %c5_410, %c6_411] : memref<2x22x22xf32, #tpu.memory_space<vmem>>, vector<1x16x16xf32>
    %668 = vector.shape_cast %667 : vector<1x16x16xf32> to vector<16x16xf32>
    %c41 = arith.constant 41 : index
    %669 = memref.load %arg2[%c41] : memref<98xf32, #tpu.memory_space<smem>>
    %670 = vector.broadcast %669 : f32 to vector<16x16xf32>
    %671 = arith.mulf %668, %670 : vector<16x16xf32>
    %672 = arith.addf %666, %671 : vector<16x16xf32>
    %c1_412 = arith.constant 1 : index
    %c5_413 = arith.constant 5 : index
    %c6_414 = arith.constant 6 : index
    %673 = vector.load %arg5[%c1_412, %c5_413, %c6_414] : memref<2x22x22xf32, #tpu.memory_space<vmem>>, vector<1x16x16xf32>
    %674 = vector.shape_cast %673 : vector<1x16x16xf32> to vector<16x16xf32>
    %c90 = arith.constant 90 : index
    %675 = memref.load %arg2[%c90] : memref<98xf32, #tpu.memory_space<smem>>
    %676 = vector.broadcast %675 : f32 to vector<16x16xf32>
    %677 = arith.mulf %674, %676 : vector<16x16xf32>
    %678 = arith.addf %672, %677 : vector<16x16xf32>
    %c0_415 = arith.constant 0 : index
    %c6_416 = arith.constant 6 : index
    %c0_417 = arith.constant 0 : index
    %679 = vector.load %arg5[%c0_415, %c6_416, %c0_417] : memref<2x22x22xf32, #tpu.memory_space<vmem>>, vector<1x16x16xf32>
    %680 = vector.shape_cast %679 : vector<1x16x16xf32> to vector<16x16xf32>
    %c42 = arith.constant 42 : index
    %681 = memref.load %arg2[%c42] : memref<98xf32, #tpu.memory_space<smem>>
    %682 = vector.broadcast %681 : f32 to vector<16x16xf32>
    %683 = arith.mulf %680, %682 : vector<16x16xf32>
    %684 = arith.addf %678, %683 : vector<16x16xf32>
    %c1_418 = arith.constant 1 : index
    %c6_419 = arith.constant 6 : index
    %c0_420 = arith.constant 0 : index
    %685 = vector.load %arg5[%c1_418, %c6_419, %c0_420] : memref<2x22x22xf32, #tpu.memory_space<vmem>>, vector<1x16x16xf32>
    %686 = vector.shape_cast %685 : vector<1x16x16xf32> to vector<16x16xf32>
    %c91 = arith.constant 91 : index
    %687 = memref.load %arg2[%c91] : memref<98xf32, #tpu.memory_space<smem>>
    %688 = vector.broadcast %687 : f32 to vector<16x16xf32>
    %689 = arith.mulf %686, %688 : vector<16x16xf32>
    %690 = arith.addf %684, %689 : vector<16x16xf32>
    %c0_421 = arith.constant 0 : index
    %c6_422 = arith.constant 6 : index
    %c1_423 = arith.constant 1 : index
    %691 = vector.load %arg5[%c0_421, %c6_422, %c1_423] : memref<2x22x22xf32, #tpu.memory_space<vmem>>, vector<1x16x16xf32>
    %692 = vector.shape_cast %691 : vector<1x16x16xf32> to vector<16x16xf32>
    %c43 = arith.constant 43 : index
    %693 = memref.load %arg2[%c43] : memref<98xf32, #tpu.memory_space<smem>>
    %694 = vector.broadcast %693 : f32 to vector<16x16xf32>
    %695 = arith.mulf %692, %694 : vector<16x16xf32>
    %696 = arith.addf %690, %695 : vector<16x16xf32>
    %c1_424 = arith.constant 1 : index
    %c6_425 = arith.constant 6 : index
    %c1_426 = arith.constant 1 : index
    %697 = vector.load %arg5[%c1_424, %c6_425, %c1_426] : memref<2x22x22xf32, #tpu.memory_space<vmem>>, vector<1x16x16xf32>
    %698 = vector.shape_cast %697 : vector<1x16x16xf32> to vector<16x16xf32>
    %c92 = arith.constant 92 : index
    %699 = memref.load %arg2[%c92] : memref<98xf32, #tpu.memory_space<smem>>
    %700 = vector.broadcast %699 : f32 to vector<16x16xf32>
    %701 = arith.mulf %698, %700 : vector<16x16xf32>
    %702 = arith.addf %696, %701 : vector<16x16xf32>
    %c0_427 = arith.constant 0 : index
    %c6_428 = arith.constant 6 : index
    %c2_429 = arith.constant 2 : index
    %703 = vector.load %arg5[%c0_427, %c6_428, %c2_429] : memref<2x22x22xf32, #tpu.memory_space<vmem>>, vector<1x16x16xf32>
    %704 = vector.shape_cast %703 : vector<1x16x16xf32> to vector<16x16xf32>
    %c44 = arith.constant 44 : index
    %705 = memref.load %arg2[%c44] : memref<98xf32, #tpu.memory_space<smem>>
    %706 = vector.broadcast %705 : f32 to vector<16x16xf32>
    %707 = arith.mulf %704, %706 : vector<16x16xf32>
    %708 = arith.addf %702, %707 : vector<16x16xf32>
    %c1_430 = arith.constant 1 : index
    %c6_431 = arith.constant 6 : index
    %c2_432 = arith.constant 2 : index
    %709 = vector.load %arg5[%c1_430, %c6_431, %c2_432] : memref<2x22x22xf32, #tpu.memory_space<vmem>>, vector<1x16x16xf32>
    %710 = vector.shape_cast %709 : vector<1x16x16xf32> to vector<16x16xf32>
    %c93 = arith.constant 93 : index
    %711 = memref.load %arg2[%c93] : memref<98xf32, #tpu.memory_space<smem>>
    %712 = vector.broadcast %711 : f32 to vector<16x16xf32>
    %713 = arith.mulf %710, %712 : vector<16x16xf32>
    %714 = arith.addf %708, %713 : vector<16x16xf32>
    %c0_433 = arith.constant 0 : index
    %c6_434 = arith.constant 6 : index
    %c3_435 = arith.constant 3 : index
    %715 = vector.load %arg5[%c0_433, %c6_434, %c3_435] : memref<2x22x22xf32, #tpu.memory_space<vmem>>, vector<1x16x16xf32>
    %716 = vector.shape_cast %715 : vector<1x16x16xf32> to vector<16x16xf32>
    %c45 = arith.constant 45 : index
    %717 = memref.load %arg2[%c45] : memref<98xf32, #tpu.memory_space<smem>>
    %718 = vector.broadcast %717 : f32 to vector<16x16xf32>
    %719 = arith.mulf %716, %718 : vector<16x16xf32>
    %720 = arith.addf %714, %719 : vector<16x16xf32>
    %c1_436 = arith.constant 1 : index
    %c6_437 = arith.constant 6 : index
    %c3_438 = arith.constant 3 : index
    %721 = vector.load %arg5[%c1_436, %c6_437, %c3_438] : memref<2x22x22xf32, #tpu.memory_space<vmem>>, vector<1x16x16xf32>
    %722 = vector.shape_cast %721 : vector<1x16x16xf32> to vector<16x16xf32>
    %c94 = arith.constant 94 : index
    %723 = memref.load %arg2[%c94] : memref<98xf32, #tpu.memory_space<smem>>
    %724 = vector.broadcast %723 : f32 to vector<16x16xf32>
    %725 = arith.mulf %722, %724 : vector<16x16xf32>
    %726 = arith.addf %720, %725 : vector<16x16xf32>
    %c0_439 = arith.constant 0 : index
    %c6_440 = arith.constant 6 : index
    %c4_441 = arith.constant 4 : index
    %727 = vector.load %arg5[%c0_439, %c6_440, %c4_441] : memref<2x22x22xf32, #tpu.memory_space<vmem>>, vector<1x16x16xf32>
    %728 = vector.shape_cast %727 : vector<1x16x16xf32> to vector<16x16xf32>
    %c46 = arith.constant 46 : index
    %729 = memref.load %arg2[%c46] : memref<98xf32, #tpu.memory_space<smem>>
    %730 = vector.broadcast %729 : f32 to vector<16x16xf32>
    %731 = arith.mulf %728, %730 : vector<16x16xf32>
    %732 = arith.addf %726, %731 : vector<16x16xf32>
    %c1_442 = arith.constant 1 : index
    %c6_443 = arith.constant 6 : index
    %c4_444 = arith.constant 4 : index
    %733 = vector.load %arg5[%c1_442, %c6_443, %c4_444] : memref<2x22x22xf32, #tpu.memory_space<vmem>>, vector<1x16x16xf32>
    %734 = vector.shape_cast %733 : vector<1x16x16xf32> to vector<16x16xf32>
    %c95 = arith.constant 95 : index
    %735 = memref.load %arg2[%c95] : memref<98xf32, #tpu.memory_space<smem>>
    %736 = vector.broadcast %735 : f32 to vector<16x16xf32>
    %737 = arith.mulf %734, %736 : vector<16x16xf32>
    %738 = arith.addf %732, %737 : vector<16x16xf32>
    %c0_445 = arith.constant 0 : index
    %c6_446 = arith.constant 6 : index
    %c5_447 = arith.constant 5 : index
    %739 = vector.load %arg5[%c0_445, %c6_446, %c5_447] : memref<2x22x22xf32, #tpu.memory_space<vmem>>, vector<1x16x16xf32>
    %740 = vector.shape_cast %739 : vector<1x16x16xf32> to vector<16x16xf32>
    %c47 = arith.constant 47 : index
    %741 = memref.load %arg2[%c47] : memref<98xf32, #tpu.memory_space<smem>>
    %742 = vector.broadcast %741 : f32 to vector<16x16xf32>
    %743 = arith.mulf %740, %742 : vector<16x16xf32>
    %744 = arith.addf %738, %743 : vector<16x16xf32>
    %c1_448 = arith.constant 1 : index
    %c6_449 = arith.constant 6 : index
    %c5_450 = arith.constant 5 : index
    %745 = vector.load %arg5[%c1_448, %c6_449, %c5_450] : memref<2x22x22xf32, #tpu.memory_space<vmem>>, vector<1x16x16xf32>
    %746 = vector.shape_cast %745 : vector<1x16x16xf32> to vector<16x16xf32>
    %c96_451 = arith.constant 96 : index
    %747 = memref.load %arg2[%c96_451] : memref<98xf32, #tpu.memory_space<smem>>
    %748 = vector.broadcast %747 : f32 to vector<16x16xf32>
    %749 = arith.mulf %746, %748 : vector<16x16xf32>
    %750 = arith.addf %744, %749 : vector<16x16xf32>
    %c0_452 = arith.constant 0 : index
    %c6_453 = arith.constant 6 : index
    %c6_454 = arith.constant 6 : index
    %751 = vector.load %arg5[%c0_452, %c6_453, %c6_454] : memref<2x22x22xf32, #tpu.memory_space<vmem>>, vector<1x16x16xf32>
    %752 = vector.shape_cast %751 : vector<1x16x16xf32> to vector<16x16xf32>
    %c48_455 = arith.constant 48 : index
    %753 = memref.load %arg2[%c48_455] : memref<98xf32, #tpu.memory_space<smem>>
    %754 = vector.broadcast %753 : f32 to vector<16x16xf32>
    %755 = arith.mulf %752, %754 : vector<16x16xf32>
    %756 = arith.addf %750, %755 : vector<16x16xf32>
    %c1_456 = arith.constant 1 : index
    %c6_457 = arith.constant 6 : index
    %c6_458 = arith.constant 6 : index
    %757 = vector.load %arg5[%c1_456, %c6_457, %c6_458] : memref<2x22x22xf32, #tpu.memory_space<vmem>>, vector<1x16x16xf32>
    %758 = vector.shape_cast %757 : vector<1x16x16xf32> to vector<16x16xf32>
    %c97 = arith.constant 97 : index
    %759 = memref.load %arg2[%c97] : memref<98xf32, #tpu.memory_space<smem>>
    %760 = vector.broadcast %759 : f32 to vector<16x16xf32>
    %761 = arith.mulf %758, %760 : vector<16x16xf32>
    %762 = arith.addf %756, %761 : vector<16x16xf32>
    %763 = arith.negf %762 : vector<16x16xf32>
    %764 = math.exp %763 : vector<16x16xf32>
    %cst_459 = arith.constant 1.000000e+00 : f32
    %765 = vector.broadcast %cst_459 : f32 to vector<16x16xf32>
    %766 = arith.addf %765, %764 : vector<16x16xf32>
    %767 = arith.divf %765, %766 : vector<16x16xf32>
    %c0_460 = arith.constant 0 : index
    %c0_461 = arith.constant 0 : index
    %c0_462 = arith.constant 0 : index
    %c0_463 = arith.constant 0 : index
    %768 = vector.load %arg3[%c0_460, %c0_461, %c0_462, %c0_463] : memref<1x1x16x16xf32, #tpu.memory_space<vmem>>, vector<1x1x16x16xf32>
    %769 = vector.shape_cast %768 : vector<1x1x16x16xf32> to vector<16x16xf32>
    %770 = vector.shape_cast %767 : vector<16x16xf32> to vector<1x1x16x16xf32>
    tpu.vector_store %arg3[%c0_460, %c0_461, %c0_462, %c0_463], %770 {strides = array<i32>} : memref<1x1x16x16xf32, #tpu.memory_space<vmem>>, vector<1x1x16x16xf32>,
    return
  }
  func.func @transform_0(%arg0: i32) -> (i32, i32, i32) {
    %c0_i32 = arith.constant 0 : i32
    %c0_i32_0 = arith.constant 0 : i32
    %c0_i32_1 = arith.constant 0 : i32
    return %arg0, %c0_i32, %c0_i32_0 : i32, i32, i32
  }
  func.func @transform_1(%arg0: i32) -> i32 {
    %c0_i32 = arith.constant 0 : i32
    %c0_i32_0 = arith.constant 0 : i32
    return %c0_i32 : i32
  }
  func.func @transform_2(%arg0: i32) -> (i32, i32, i32, i32) {
    %c0_i32 = arith.constant 0 : i32
    %c0_i32_0 = arith.constant 0 : i32
    %c0_i32_1 = arith.constant 0 : i32
    %c0_i32_2 = arith.constant 0 : i32
    return %arg0, %c0_i32, %c0_i32_0, %c0_i32_1 : i32, i32, i32, i32
  }
}

</mosaic_0001>

<bundles_post_ra>
// kernel: tpu_custom_call.1
= control target key start
LH: loop header
LB: loop body
LE: loop exit
PB: predicated region body
PF: predicated region fallthrough
CT: control target
= control target key end

     0   :  { %s3698_s0 = inlined_call_operand.hbm [shape: f32[2,4,256], index: 0, kind: input, shape index: {}]   ;;  %s3699_s1 = inlined_call_operand.vmem [shape: f32[98], index: 1, kind: input, shape index: {}]   ;;  %s3700_s2 = inlined_call_operand.hbm [shape: f32[2,1,16,16], index: 2, kind: output, shape index: {}]  }
   0x1   :  { %3719 = sst [smem:[#allocation16_spill]] %s3698_s0 }
   0x2   :  { %3720 = sst [smem:[#allocation17_spill]] %s3699_s1 }
   0x3   :  { %7 = vsyncpa [#allocation5], 0 }
   0x4   :  { %9 = vsyncpa [#allocation5 + $0x1], 0 }
   0x5   :  { %10 = vsyncpa [#allocation7], 0 }
   0x6   :  { %11 = vsyncpa [#allocation6], 0 }
   0x7   :  { %13 = vsyncpa [#allocation6 + $0x1], 0  ;;  %s2367_s9 = smov 0   ;;  %s2369_s10 = smov 0  }
   0x8   :  { %s2371_s11 = smov 0   ;;  %s2373_s12 = smov 0  }
   0x9 LB: > { %3721 = sst [smem:[#allocation13_spill]] %s2321_s10  ;;  %s2388_s13 = sadd.s32 4294967295, %s2329_s12   ;;  %s2329_s12 = sphi %s2373_s12, %s3750_s12   ;;  %s2325_s11 = sphi %s2371_s11, %s3749_s11   ;;  %s2321_s10 = sphi %s2369_s10, %s3748_s10   ;;  %s2317_s9 = sphi %s2367_s9, %s3747_s9  }
   0xa   : > { %3722 = sst [smem:[#allocation14_spill]] %s2325_s11  ;;  %s1985_s14 = sadd.s32 4294967294, %s2329_s12  }
   0xb   : > { %p39_p0 = scmp.ne.s32.totalorder %s2321_s10, %s2317_s9  ;;  %p3701_p1 = scmp.eq.s32.totalorder %s2388_s13, 0 }
   0xc   : > { %p90_p3 = scmp.eq.s32.totalorder %s1985_s14, 1  ;;  %p1986_p5 = scmp.ge.s32.totalorder %s2329_s12, 1 }
   0xd   : > { %p2397_p4 = por %p3701_p1, %p39_p0  ;;  %p97_p7 = scmp.lt.s32.totalorder %s2329_s12, 3 }
   0xe   : > { %p2402_p6 = por %p90_p3, %p39_p0  ;;  %s3725_s1 = sld [smem:[#allocation17_spill]] }
   0xf   : > { %s3723_s15 = scalar_select %p2397_p4, 1, 0 }
  0x10   : > { %s3724_s16 = scalar_select %p2402_p6, 1, 0 }
  0x11   : > { %p2410_p8 = pnand %p1986_p5, %p97_p7  ;;  %s2418_s21 = sadd.s32 1, %s2329_s12  }
  0x12   : > { %s23_s23 = ssub.s32 %s2329_s12, %s2418_s21  ;;  %s26_s25 = sadd.s32 1, %s2325_s11 }
  0x13   : > { %s3726_s20 = scalar_select %p2410_p8, 1, 0 }
  0x14   : > { %s110_s19 = sshll.u32 %s3725_s1, 4  ;;  %p2142_p10 = pneg %p2410_p8  ;;  %s111_s19 = int_to_ptr.vmem [resolvable:$true] %s110_s19 }
  0x15   : > { %p2428_p12 = scmp.eq.s32.totalorder %s23_s23, 0  ;;  %p33_p13 = scmp.ne.s32.totalorder %s2325_s11, %s2321_s10 }
  0x16   : > { %p2422_p11 = pnand %p2142_p10, %p3701_p1  ;;  %s2218_s26 = scalar_lea.vmem %s111_s19, 16 }
  0x17   : > { %p2219_p0 = scmp.ne.s32.totalorder %s111_s19, %s2218_s26  ;;  %p2226_p9 = scmp.lt.s32.totalorder %s111_s19, %s111_s19 }
  0x18   : > { %p2220_p3 = pneg %p2422_p11  ;;  %p2227_p2 = scmp.lt.s32.totalorder %s2218_s26, %s2218_s26 }
  0x1a   : > { %p2221_p5 = pnand %p2220_p3, %p2219_p0  ;;  %p2228_p10 = por %p2227_p2, %p2226_p9 }
  0x1c   : > { %p2222_p7 = pneg %p2221_p5 }
  0x1e   : > { %p2229_p1 = pnand %p2228_p10, %p2222_p7 }
  0x20   : > { %2232 = shalt.err (!%p2229_p1)
}
  0x21   : > { %s2331_s27 = smov [#allocation8]   ;;  %p34_p2 = scmp.eq.s32.totalorder %s2329_s12, 0 }
  0x22   : > { %2145 = dma.vmem_to_smem (!%p2422_p11), %s111_s19, 16, %s2331_s27, [#allocation7]  }
  0x23   : > { %s2442_s28 = scalar_select %p2428_p12, %s2325_s11, %s26_s25  }
  0x24   : > { %p3730_p1 = scmp.eq.s32.totalorder %s2388_s13, 1  ;;  %p2155_p0 = scmp.lt.s32.totalorder %s2329_s12, 2 }
  0x25   : > { %3729 = sst [smem:[#allocation15_spill]] %s2442_s28  ;;  %s121_s30 = sand.u32 1, %s2325_s11  }
  0x26   : > { %p2450_p9 = por %p3730_p1, %p33_p13  ;;  %p35_p3 = por %p34_p2, %p33_p13 }
  0x27   : > { %s1989_s3 = sshll.u32 %s121_s30, 3  ;;  %s2132_s4 = sshll.u32 %s2329_s12, 7 }
  0x28   : > { %s3731_s29 = scalar_select %p2450_p9, 1, 0 }
  0x29   : > { %s3732_s0 = sld [smem:[#allocation16_spill]]  ;;  %s125_s8 = scalar_lea.vmem [#allocation4], %s1989_s3 }
  0x2a   : > { %s133_s14 = sshll.u32 %s125_s8, 4  ;;  %p2465_p11 = pnand %p2155_p0, %p35_p3  ;;  %s134_s14 = int_to_ptr.vmem [resolvable:$true] %s133_s14 }
  0x2b   : > { %s122_s18 = scalar_lea.sflag [#allocation5], %s121_s30 }
  0x2c   : > { %p2235_p13 = pneg %p2465_p11 }
  0x2f   : > { %s2463_s7 = scalar_lea.hbm %s3732_s0, %s2132_s4  ;;  %s2238_s24 = scalar_lea.hbm %s3732_s0, 256 }
  0x30   : > { %s2233_s19 = scalar_lea.hbm %s2463_s7, 128  ;;  %p2239_p10 = scmp.lt.s32.totalorder %s2463_s7, %s3732_s0 }
  0x31   : > { %p2234_p12 = scmp.ne.s32.totalorder %s2463_s7, %s2233_s19  ;;  %p2240_p2 = scmp.lt.s32.totalorder %s2238_s24, %s2233_s19 }
  0x33   : > { %p2236_p5 = pnand %p2235_p13, %p2234_p12  ;;  %p2241_p1 = por %p2240_p2, %p2239_p10 }
  0x35   : > { %p2237_p7 = pneg %p2236_p5 }
  0x37   : > { %p2242_p0 = pnand %p2241_p1, %p2237_p7 }
  0x39   : > { %2245 = shalt.err (!%p2242_p0)
}
  0x3a   : > { %s2246_s27 = scalar_lea.vmem %s134_s14, 128  ;;  %s2332_s30 = smov [#allocation4]  }
  0x3b   : > { %p2247_p3 = scmp.ne.s32.totalorder %s134_s14, %s2246_s27  ;;  %s2251_s3 = sshll.u32 %s2332_s30, 4  ;;  %s2252_s3 = int_to_ptr.vmem [resolvable:$false] %s2251_s3 }
  0x3c   : > { %s2253_s4 = scalar_lea.vmem %s2252_s3, 256  ;;  %p2254_p12 = scmp.lt.s32.totalorder %s134_s14, %s2252_s3 }
  0x3d   : > { %p2249_p6 = pnand %p2247_p3, %p2235_p13  ;;  %p2255_p5 = scmp.lt.s32.totalorder %s2253_s4, %s2246_s27 }
  0x3f   : > { %p2250_p9 = pneg %p2249_p6  ;;  %p2256_p4 = por %p2255_p5, %p2254_p12 }
  0x41   : > { %p2257_p8 = pnand %p2256_p4, %p2250_p9 }
  0x43   : > { %2260 = shalt.err (!%p2257_p8)
}
  0x44   : > { %2149 = dma.hbm_to_vmem [thread:$0]  (!%p2465_p11), %s2463_s7, 128, %s134_s14, %s122_s18  }
  0x45   : > { %p3734_p7 = scmp.ne.s32.totalorder %s3726_s20, 0 }
  0x46   : > { %s2486_s5 = sand.u32 (!%p3734_p7), 1, %s2321_s10   ;;  %p3735_p6 = scmp.ne.s32.totalorder (!%p3734_p7), %s3723_s15, 0 }
  0x47   : > { %142 = sbr.rel (%p3734_p7) target bundleno = 781 (0x30d), region = 28  ;;  %s1993_s6 = sshll.u32 (!%p3734_p7), %s2486_s5, 3 }
  0x48   : > { %s145_s8 = scalar_lea.sflag (!%p3734_p7), [#allocation5], %s2486_s5  ;;  %s148_s19 = scalar_lea.vmem (!%p3734_p7), [#allocation4], %s1993_s6 }
  0x4c   : > { %2304 = dma.done.wait (%p3735_p6), %s145_s8, 128  }
  0x4d   : > { %2306 = vsyncadd (%p3735_p6), %s145_s8, 4294967168  ;;  %p3736_p4 = scmp.eq.s32.totalorder %s2388_s13, 0 }
  0x4f   : > { %2308 = dma.done.wait (%p3736_p4), [#allocation7], 16   ;;  %p3737_p8 = pmov %p3736_p4 }
  0x51   : > { %2310 = vsyncadd (%p3737_p8), [#allocation7], 4294967280 }
  0x52   : > { %157 = sfence }
  0x53   : > { %v174_v0 = vld [vmem:[%s148_s19] sm:$0xff]  ;;  %vm178_vm0 = vcmask 1043456   ;;  %vm253_vm1 = vcmask 179200   ;;  %v2333_v12 = vmov 1966171168   ;;  %v202_v14 = vlaneseq  ;;  %s2335_s15 = smov 115  }
  0x54   : > { %v176_v1 = vcombine.high %v174_v0, %v174_v0  ;;  %v219_v2 = vsel %vm178_vm0, %v174_v0, -inf  ;;  %v179_v3 = vsel %vm178_vm0, %v174_v0, 0.0  ;;  %v200_v13 = vunpack.c.l.s4 %v2333_v12  ;;  %s2336_s20 = smov 3   ;;  %s2337_s7 = smov 99  }
  0x55   : > { %v220_v4 = vrot.slane %v219_v2, 4  ;;  %v180_v5 = vrot.slane %v179_v3, 4  ;;  %v2334_v19 = vmov 0.0   ;;  %v203_v25 = vshrl.u32 %v202_v14, 7  ;;  %s2338_s14 = smov 83   ;;  %s2339_s17 = smov 67  }
  0x56   : > { %v226_v6 = vsel %vm178_vm0, %v176_v1, -inf  ;;  %v186_v7 = vsel %vm178_vm0, %v176_v1, 0.0  ;;  %258 = vst.msk [vmem:[#allocation3 + $0x18] sm:$0xff] %vm253_vm1, %v2334_v19  ;;  %254 = vst.msk [vmem:[#allocation3] sm:$0xff] %vm253_vm1, %v2334_v19  ;;  %v201_v24 = vunpack.c.0.s8 %v200_v13  ;;  %vm216_vm2 = vcmp.lt.s32.totalorder %v202_v14, 256  ;;  %s2340_s18 = smov 51  }
  0x57   : > { %v221_v8 = vmax.f32 %v219_v2, %v220_v4  ;;  %v227_v9 = vrot.slane %v226_v6, 4  ;;  %v181_v10 = vadd.f32 %v180_v5, %v179_v3  ;;  %v187_v11 = vrot.slane %v186_v7, 4  ;;  %255 = vst.msk [vmem:[#allocation3 + $0x8] sm:$0xff] %vm253_vm1, %v2334_v19  ;;  %259 = vst.msk [vmem:[#allocation3 + $0x20] sm:$0xff] %vm253_vm1, %v2334_v19  ;;  %s2341_s22 = smov 35   ;;  %s2342_s23 = smov 19  }
  0x58   : > { %v204_v34 = vsub.s32 %v201_v24, %v203_v25  ;;  %vm256_vm3 = vcmask 177152   ;;  %vm270_vm4 = vcmask 147480   ;;  %s2514_s24 = sld [smem:[#allocation8 + $0x32]]  ;;  %s3709_s30 = smov 127   ;;  %vm1883_vm5 = vcmask 130048  }
  0x59   : > { %v222_v15 = vrot.slane %v221_v8, 2  ;;  %v228_v16 = vmax.f32 %v226_v6, %v227_v9  ;;  %v182_v17 = vrot.slane %v181_v10, 2  ;;  %v188_v18 = vadd.f32 %v187_v11, %v186_v7  ;;  %260 = vst.msk [vmem:[#allocation3 + $0x28] sm:$0x3f] %vm256_vm3, %v2334_v19  ;;  %257 = vst.msk [vmem:[#allocation3 + $0x10] sm:$0x3f] %vm256_vm3, %v2334_v19 }
  0x5a   : > { %s2518_s25 = sld [smem:[#allocation8 + $0x33]]  ;;  %s3707_s4 = smov 126  }
  0x5b   : > { %v223_v20 = vmax.f32 %v221_v8, %v222_v15  ;;  %v229_v21 = vrot.slane %v228_v16, 2  ;;  %v183_v22 = vadd.f32 %v182_v17, %v181_v10  ;;  %v189_v23 = vrot.slane %v188_v18, 2  ;;  %s2523_s26 = sld [smem:[#allocation8 + $0x34]]  ;;  %s3742_s0 = smov 123  }
  0x5c   : > { %s2530_s27 = sld [smem:[#allocation8 + $0x35]]  ;;  %s3743_s28 = smov 125  }
  0x5d   : > { %v224_v26 = vrot.slane %v223_v20, 1  ;;  %v230_v27 = vmax.f32 %v228_v16, %v229_v21  ;;  %v184_v28 = vrot.slane %v183_v22, 1  ;;  %v190_v29 = vadd.f32 %v189_v23, %v188_v18  ;;  %s2538_s3 = sld [smem:[#allocation8 + $0x36]]  ;;  %p3744_p11 = scmp.ne.s32.totalorder %s3731_s29, 0 }
  0x5e   : > { %v614_v59 = vstv %s2514_s24  ;;  %s2541_s6 = sld [smem:[#allocation8 + $0x31]] }
  0x5f   : > { %v225_v30 = vmax.f32 %v223_v20, %v224_v26  ;;  %v231_v31 = vrot.slane %v230_v27, 1  ;;  %v185_v32 = vadd.f32 %v184_v28, %v183_v22  ;;  %v191_v33 = vrot.slane %v190_v29, 1  ;;  %s2547_s8 = sld [smem:[#allocation8 + $0x37]] }
  0x60   : > { %v642_v0 = vstv %s2518_s25  ;;  %s2549_s19 = sld [smem:[#allocation8]] }
  0x61   : > { %v232_v35 = vmax.f32 %v230_v27, %v231_v31  ;;  %v192_v36 = vadd.f32 %v191_v33, %v190_v29  ;;  %v194_v37 = vmul.f32 0.25, %v185_v32  ;;  %v670_v4 = vstv %s2523_s26  ;;  %s2638_s24 = sld [smem:[#allocation8 + $0x2]] }
  0x62   : > { %v698_v8 = vstv %s2530_s27  ;;  %s2646_s25 = sld [smem:[#allocation8 + $0x3]]  ;;  %s3739_s27 = smov 126  }
  0x63   : > { %v235_v38 = vcombine.low %v225_v30, %v232_v35  ;;  %v195_v39 = vmul.f32 0.25, %v192_v36  ;;  %v726_v12 = vstv %s2538_s3  ;;  %s2662_s26 = sld [smem:[#allocation8 + $0x5]] }
  0x64   : > { %v594_v16 = vstv %s2541_s6  ;;  %s2601_s6 = sld [smem:[#allocation8 + $0x3d]] }
  0x65   : > { %v242_v40 = vrot.slane %v235_v38, %v204_v34  ;;  %v198_v41 = vcombine.low %v194_v37, %v195_v39  ;;  %v754_v18 = vstv %s2547_s8  ;;  %s2672_s3 = sld [smem:[#allocation8 + $0x6]] }
  0x66   : > { %v586_v17 = vstv %s2549_s19  ;;  %s2610_s19 = sld [smem:[#allocation8 + $0x3e]] }
  0x67   : > { %v249_v42 = vrot.slane %v242_v40, %v204_v34  ;;  %v205_v43 = vrot.slane %v198_v41, %v204_v34  ;;  %s2681_s8 = sld [smem:[#allocation8 + $0x8]] }
  0x68   : > { %s3038_s1 = sld [smem:[#allocation8 + $0x38]] }
  0x69   : > { %252 = vst.msk [vmem:[#allocation2 + $0x1] ss:$2 sm:$0x3] %vm216_vm2, %v249_v42  ;;  %v212_v44 = vrot.slane %v205_v43, %v204_v34  ;;  %s3149_s11 = sld [smem:[#allocation8 + $0x20]] }
  0x6a   : > { %s3151_s10 = sld [smem:[#allocation8 + $0x3f]] }
  0x6b   : > { %218 = vst.msk [vmem:[#allocation2] ss:$2 sm:$0x3] %vm216_vm2, %v212_v44 }
  0x70   : > { %v1999_v45 = vld [vmem:[#allocation2 + $0x1] ss:$0 sm:$0xff]  ;;  %v2013_v47 = vld [vmem:[#allocation2 + $0x3] ss:$0 sm:$0xff] }
  0x71   : > { %299 = vrot.lane.b32.xlu1 %v1999_v45, %s2335_s15  ;;  %278 = vrot.lane.b32.xlu0 %v1999_v45, %s2336_s20 }
  0x72   : > { %v1996_v46 = vld [vmem:[#allocation2] ss:$0 sm:$0xff]  ;;  %v2012_v48 = vld [vmem:[#allocation2 + $0x2] ss:$0 sm:$0xff] }
  0x75   : > { %319 = vrot.lane.b32.xlu1 %v1999_v45, %s2337_s7  ;;  %267 = vrot.lane.b32.xlu0 %v1996_v46, %s2336_s20 }
  0x79   : > { %339 = vrot.lane.b32.xlu1 %v1999_v45, %s2338_s14  ;;  %309 = vrot.lane.b32.xlu0 %v1996_v46, %s2337_s7 }
  0x7d   : > { %359 = vrot.lane.b32.xlu1 %v1999_v45, %s2339_s17  ;;  %329 = vrot.lane.b32.xlu0 %v1996_v46, %s2338_s14 }
  0x81   : > { %379 = vrot.lane.b32.xlu1 %v1999_v45, %s2340_s18  ;;  %349 = vrot.lane.b32.xlu0 %v1996_v46, %s2339_s17 }
  0x85   : > { %399 = vrot.lane.b32.xlu1 %v1999_v45, %s2341_s22  ;;  %369 = vrot.lane.b32.xlu0 %v1996_v46, %s2340_s18 }
  0x89   : > { %419 = vrot.lane.b32.xlu1 %v1999_v45, %s2342_s23  ;;  %389 = vrot.lane.b32.xlu0 %v1996_v46, %s2341_s22 }
  0x8d   : > { %439 = vrot.lane.b32.xlu1 %v2013_v47, %s2336_s20  ;;  %409 = vrot.lane.b32.xlu0 %v1996_v46, %s2342_s23 }
  0x91   : > { %289 = vrot.lane.b32.xlu1 %v1996_v46, %s2335_s15  ;;  %429 = vrot.lane.b32.xlu0 %v2012_v48, %s2336_s20  ;;  %s2558_s20 = sld [smem:[#allocation8 + $0x39]] }
  0x95   : > { %459 = vrot.lane.b32.xlu1 %v2013_v47, %s2335_s15  ;;  %449 = vrot.lane.b32.xlu0 %v2012_v48, %s2335_s15  ;;  %s3715_s15 = smov 125  }
  0x97   : > { %v798_v26 = vstv %s2558_s20  ;;  %s2701_s20 = sld [smem:[#allocation8 + $0xa]] }
  0x99   : > { %479 = vrot.lane.b32.xlu1 %v2013_v47, %s2337_s7  ;;  %469 = vrot.lane.b32.xlu0 %v2012_v48, %s2337_s7  ;;  %s3711_s7 = smov 124  }
  0x9d   : > { %499 = vrot.lane.b32.xlu1 %v2013_v47, %s2338_s14  ;;  %489 = vrot.lane.b32.xlu0 %v2012_v48, %s2338_s14  ;;  %s2568_s14 = sld [smem:[#allocation8 + $0x3a]] }
  0xa1   : > { %519 = vrot.lane.b32.xlu1 %v2013_v47, %s2339_s17  ;;  %509 = vrot.lane.b32.xlu0 %v2012_v48, %s2339_s17  ;;  %s3713_s17 = smov 123  }
  0xa3   : > { %v826_v31 = vstv %s2568_s14  ;;  %s2710_s14 = sld [smem:[#allocation8 + $0xb]] }
  0xa5   : > { %539 = vrot.lane.b32.xlu1 %v2013_v47, %s2340_s18  ;;  %529 = vrot.lane.b32.xlu0 %v2012_v48, %s2340_s18  ;;  %s2581_s18 = sld [smem:[#allocation8 + $0x3b]] }
  0xa9   : > { %559 = vrot.lane.b32.xlu1 %v2013_v47, %s2341_s22  ;;  %549 = vrot.lane.b32.xlu0 %v2012_v48, %s2341_s22  ;;  %s3705_s22 = smov 122  }
  0xab   : > { %v854_v35 = vstv %s2581_s18  ;;  %s2719_s18 = sld [smem:[#allocation8 + $0xc]] }
  0xad   : > { %579 = vrot.lane.b32.xlu1 %v2013_v47, %s2342_s23  ;;  %569 = vrot.lane.b32.xlu0 %v2012_v48, %s2342_s23  ;;  %s2592_s23 = sld [smem:[#allocation8 + $0x3c]]  ;;  %v910_v48 = vstv %s2601_s6 }
  0xae   : > { %s2746_s6 = sld [smem:[#allocation8 + $0x40]] }
  0xb3   : > { %v882_v39 = vstv %s2592_s23  ;;  %s2737_s23 = sld [smem:[#allocation8 + $0xf]] }
  0xe3   : > { %v300_v49 = vpop.permute.xlu1 %299  ;;  %v279_v50 = vpop.permute.xlu0 %278 }
  0xe4   : > { %302 = vst.msk [vmem:[#allocation3 + $0x1c] sm:$0x1] %vm270_vm4, %v300_v49  ;;  %282 = vst.msk [vmem:[#allocation3 + $0x1b] sm:$0x1] %vm270_vm4, %v279_v50 }
  0xe7   : > { %v320_v51 = vpop.permute.xlu1 %319  ;;  %v268_v52 = vpop.permute.xlu0 %267 }
  0xe8   : > { %322 = vst.msk [vmem:[#allocation3 + $0x1d] sm:$0x1] %vm270_vm4, %v320_v51  ;;  %271 = vst.msk [vmem:[#allocation3 + $0x3] sm:$0x1] %vm270_vm4, %v268_v52 }
  0xeb   : > { %v340_v53 = vpop.permute.xlu1 %339  ;;  %v310_v54 = vpop.permute.xlu0 %309 }
  0xec   : > { %342 = vst.msk [vmem:[#allocation3 + $0x1e] sm:$0x1] %vm270_vm4, %v340_v53  ;;  %312 = vst.msk [vmem:[#allocation3 + $0x5] sm:$0x1] %vm270_vm4, %v310_v54  ;;  %v938_v54 = vstv %s2610_s19  ;;  %s3738_s19 = smov 122  }
  0xef   : > { %v360_v55 = vpop.permute.xlu1 %359  ;;  %v330_v56 = vpop.permute.xlu0 %329 }
  0xf0   : > { %362 = vst.msk [vmem:[#allocation3 + $0x1f] sm:$0x1] %vm270_vm4, %v360_v55  ;;  %332 = vst.msk [vmem:[#allocation3 + $0x6] sm:$0x1] %vm270_vm4, %v330_v56 }
  0xf3   : > { %v380_v57 = vpop.permute.xlu1 %379  ;;  %v350_v58 = vpop.permute.xlu0 %349 }
  0xf4   : > { %382 = vst.msk [vmem:[#allocation3 + $0x20] sm:$0x1] %vm270_vm4, %v380_v57  ;;  %352 = vst.msk [vmem:[#allocation3 + $0x7] sm:$0x1] %vm270_vm4, %v350_v58 }
  0xf7   : > { %v591_v60 = vld [vmem:[#allocation3 + $0x18] sm:$0xff]  ;;  %v400_v61 = vpop.permute.xlu1 %399  ;;  %v370_v62 = vpop.permute.xlu0 %369 }
  0xf8   : > { %402 = vst.msk [vmem:[#allocation3 + $0x21] sm:$0x1] %vm270_vm4, %v400_v61  ;;  %372 = vst.msk [vmem:[#allocation3 + $0x8] sm:$0x1] %vm270_vm4, %v370_v62  ;;  %v615_v63 = vmul.f32 %v614_v59, %v591_v60  ;;  %v643_v3 = vmul.f32 %v642_v0, %v591_v60  ;;  %v671_v7 = vmul.f32 %v670_v4, %v591_v60 }
  0xf9   : > { %v699_v11 = vmul.f32 %v698_v8, %v591_v60  ;;  %v727_v15 = vmul.f32 %v726_v12, %v591_v60  ;;  %v595_v22 = vmul.f32 %v594_v16, %v591_v60  ;;  %v755_v24 = vmul.f32 %v754_v18, %v591_v60 }
  0xfa   : > { %619 = vrot.lane.b32.xlu0 %v615_v63, %s3709_s30  ;;  %v628_v60 = vstv %s2638_s24  ;;  %v656_v63 = vstv %s2646_s25  ;;  %s2757_s24 = sld [smem:[#allocation8 + $0x10]] }
  0xfb   : > { %v420_v1 = vpop.permute.xlu1 %419  ;;  %v390_v2 = vpop.permute.xlu0 %389  ;;  %v2578_v25 = vld [vmem:[#allocation3 + $0x19] sm:$0xff]  ;;  %s2768_s25 = sld [smem:[#allocation8 + $0x41]] }
  0xfc   : > { %422 = vst.msk [vmem:[#allocation3 + $0x22] sm:$0x1] %vm270_vm4, %v420_v1  ;;  %392 = vst.msk [vmem:[#allocation3 + $0x9] sm:$0x1] %vm270_vm4, %v390_v2  ;;  %v799_v30 = vmul.f32 %v798_v26, %v2578_v25  ;;  %v827_v34 = vmul.f32 %v826_v31, %v2578_v25  ;;  %v855_v38 = vmul.f32 %v854_v35, %v2578_v25 }
  0xfd   : > { %v883_v47 = vmul.f32 %v882_v39, %v2578_v25  ;;  %v911_v53 = vmul.f32 %v910_v48, %v2578_v25  ;;  %v939_v56 = vmul.f32 %v938_v54, %v2578_v25 }
  0xfe   : > { %647 = vrot.lane.b32.xlu0 %v643_v3, %s3707_s4 }
  0xff   : > { %v440_v5 = vpop.permute.xlu1 %439  ;;  %v410_v6 = vpop.permute.xlu0 %409 }
 0x100   : > { %442 = vst.msk [vmem:[#allocation3 + $0x23] sm:$0x1] %vm270_vm4, %v440_v5  ;;  %412 = vst.msk [vmem:[#allocation3 + $0xa] sm:$0x1] %vm270_vm4, %v410_v6  ;;  %v712_v6 = vstv %s2662_s26  ;;  %s2777_s26 = sld [smem:[#allocation8 + $0x11]] }
 0x102   : > { %675 = vrot.lane.b32.xlu0 %v671_v7, %s3715_s15 }
 0x103   : > { %v290_v9 = vpop.permute.xlu1 %289  ;;  %v430_v10 = vpop.permute.xlu0 %429 }
 0x104   : > { %292 = vst.msk [vmem:[#allocation3 + $0x4] sm:$0x1] %vm270_vm4, %v290_v9  ;;  %432 = vst.msk [vmem:[#allocation3 + $0xb] sm:$0x1] %vm270_vm4, %v430_v10  ;;  %v740_v9 = vstv %s2672_s3  ;;  %s2788_s3 = sld [smem:[#allocation8 + $0x42]] }
 0x106   : > { %703 = vrot.lane.b32.xlu0 %v699_v11, %s3711_s7 }
 0x107   : > { %v460_v13 = vpop.permute.xlu1 %459  ;;  %v450_v14 = vpop.permute.xlu0 %449 }
 0x108   : > { %462 = vst.msk [vmem:[#allocation3 + $0x24] sm:$0x1] %vm270_vm4, %v460_v13  ;;  %452 = vst.msk [vmem:[#allocation3 + $0xc] sm:$0x1] %vm270_vm4, %v450_v14  ;;  %v784_v13 = vstv %s2681_s8  ;;  %s2797_s8 = sld [smem:[#allocation8 + $0x12]] }
 0x10a   : > { %731 = vrot.lane.b32.xlu0 %v727_v15, %s3713_s17 }
 0x10b   : > { %v2571_v19 = vld [vmem:[#allocation3] sm:$0xff]  ;;  %v480_v20 = vpop.permute.xlu1 %479  ;;  %v470_v21 = vpop.permute.xlu0 %469 }
 0x10c   : > { %v587_v23 = vmul.f32 %v586_v17, %v2571_v19  ;;  %482 = vst.msk [vmem:[#allocation3 + $0x25] sm:$0x1] %vm270_vm4, %v480_v20  ;;  %472 = vst.msk [vmem:[#allocation3 + $0xd] sm:$0x1] %vm270_vm4, %v470_v21  ;;  %v629_v62 = vmul.f32 %v628_v60, %v2571_v19  ;;  %v657_v1 = vmul.f32 %v656_v63, %v2571_v19 }
 0x10d   : > { %v741_v11 = vmul.f32 %v740_v9, %v2571_v19 }
 0x10e   : > { %v2583_v27 = vadd.f32 %v595_v22, %v587_v23  ;;  %759 = vrot.lane.b32.xlu0 %v755_v24, %s3705_s22  ;;  %s2624_s22 = sld [smem:[#allocation8 + $0x1]]  ;;  %v868_v22 = vstv %s2710_s14 }
 0x10f   : > { %v500_v28 = vpop.permute.xlu1 %499  ;;  %v490_v29 = vpop.permute.xlu0 %489  ;;  %s2845_s14 = sld [smem:[#allocation8 + $0x14]] }
 0x110   : > { %502 = vst.msk [vmem:[#allocation3 + $0x26] sm:$0x1] %vm270_vm4, %v500_v28  ;;  %492 = vst.msk [vmem:[#allocation3 + $0xe] sm:$0x1] %vm270_vm4, %v490_v29 }
 0x112   : > { %803 = vrot.lane.b32.xlu0 %v799_v30, %s3709_s30 }
 0x113   : > { %v520_v32 = vpop.permute.xlu1 %519  ;;  %v510_v33 = vpop.permute.xlu0 %509 }
 0x114   : > { %522 = vst.msk [vmem:[#allocation3 + $0x27] sm:$0x1] %vm270_vm4, %v520_v32  ;;  %512 = vst.msk [vmem:[#allocation3 + $0xf] sm:$0x1] %vm270_vm4, %v510_v33  ;;  %v600_v57 = vstv %s2624_s22  ;;  %s2728_s22 = sld [smem:[#allocation8 + $0xd]]  ;;  %v2754_v33 = vld [vmem:[#allocation3 + $0x2] sm:$0xff] }
 0x116   : > { %831 = vrot.lane.b32.xlu0 %v827_v34, %s3707_s4  ;;  %v968_v34 = vstv %s2737_s23  ;;  %s2888_s23 = sld [smem:[#allocation8 + $0x47]] }
 0x117   : > { %v540_v36 = vpop.permute.xlu1 %539  ;;  %v530_v37 = vpop.permute.xlu0 %529 }
 0x118   : > { %542 = vst.msk [vmem:[#allocation3 + $0x28] sm:$0x1] %vm270_vm4, %v540_v36  ;;  %532 = vst.msk [vmem:[#allocation3 + $0x10] sm:$0x1] %vm270_vm4, %v530_v37  ;;  %v2765_v37 = vld [vmem:[#allocation3 + $0x1a] sm:$0xff] }
 0x11a   : > { %859 = vrot.lane.b32.xlu0 %v855_v38, %s3715_s15  ;;  %v924_v30 = vstv %s2728_s22  ;;  %v982_v38 = vstv %s2746_s6  ;;  %s2875_s22 = sld [smem:[#allocation8 + $0x16]] }
 0x11b   : > { %v592_v40 = vld [vmem:[#allocation3 + $0x20] sm:$0xff]  ;;  %v2613_v41 = vld [vmem:[#allocation3 + $0x8] sm:$0xff]  ;;  %v560_v42 = vpop.permute.xlu1 %559  ;;  %v550_v43 = vpop.permute.xlu0 %549  ;;  %s2903_s6 = sld [smem:[#allocation8 + $0x17]] }
 0x11c   : > { %v596_v44 = vmul.f32 %v594_v16, %v592_v40  ;;  %v588_v45 = vmul.f32 %v586_v17, %v2613_v41  ;;  %562 = vst.msk [vmem:[#allocation3 + $0x29] sm:$0x1] %vm270_vm4, %v560_v42  ;;  %v616_v46 = vmul.f32 %v614_v59, %v592_v40  ;;  %552 = vst.msk [vmem:[#allocation3 + $0x11] sm:$0x1] %vm270_vm4, %v550_v43  ;;  %v996_v42 = vstv %s2757_s24  ;;  %s2918_s24 = sld [smem:[#allocation8 + $0x48]] }
 0x11d   : > { %v644_v52 = vmul.f32 %v642_v0, %v592_v40  ;;  %v672_v55 = vmul.f32 %v670_v4, %v592_v40  ;;  %v700_v58 = vmul.f32 %v698_v8, %v592_v40  ;;  %v601_v59 = vmul.f32 %v600_v57, %v2571_v19 }
 0x11e   : > { %v2626_v49 = vadd.f32 %v596_v44, %v588_v45  ;;  %621 = vrot.lane.b32.xlu1 %v616_v46, %s3709_s30  ;;  %887 = vrot.lane.b32.xlu0 %v883_v47, %s3711_s7  ;;  %v728_v61 = vmul.f32 %v726_v12, %v592_v40  ;;  %v756_v0 = vmul.f32 %v754_v18, %v592_v40  ;;  %v2698_v12 = vld [vmem:[#allocation3 + $0x1] sm:$0xff]  ;;  %v1010_v46 = vstv %s2768_s25  ;;  %s2931_s25 = sld [smem:[#allocation8 + $0x18]] }
 0x11f   : > { %v580_v50 = vpop.permute.xlu1 %579  ;;  %v570_v51 = vpop.permute.xlu0 %569  ;;  %v2669_v2 = vld [vmem:[#allocation3 + $0x21] sm:$0xff]  ;;  %v713_v8 = vmul.f32 %v712_v6, %v2571_v19  ;;  %v785_v15 = vmul.f32 %v784_v13, %v2698_v12  ;;  %v869_v23 = vmul.f32 %v868_v22, %v2698_v12  ;;  %v602_v24 = vmul.f32 %v600_v57, %v2613_v41  ;;  %v2785_v45 = vld [vmem:[#allocation3 + $0x9] sm:$0xff] }
 0x120   : > { %582 = vst.msk [vmem:[#allocation3 + $0x2a] sm:$0x1] %vm270_vm4, %v580_v50  ;;  %572 = vst.msk [vmem:[#allocation3 + $0x12] sm:$0x1] %vm270_vm4, %v570_v51  ;;  %v800_v4 = vmul.f32 %v798_v26, %v2669_v2  ;;  %v828_v7 = vmul.f32 %v826_v31, %v2669_v2  ;;  %v856_v10 = vmul.f32 %v854_v35, %v2669_v2  ;;  %v896_v26 = vstv %s2719_s18  ;;  %s2860_s18 = sld [smem:[#allocation8 + $0x45]] }
 0x121   : > { %v884_v14 = vmul.f32 %v882_v39, %v2669_v2  ;;  %v912_v17 = vmul.f32 %v910_v48, %v2669_v2  ;;  %v940_v20 = vmul.f32 %v938_v54, %v2669_v2  ;;  %v897_v28 = vmul.f32 %v896_v26, %v2698_v12 }
 0x122   : > { %649 = vrot.lane.b32.xlu1 %v644_v52, %s3707_s4  ;;  %915 = vrot.lane.b32.xlu0 %v911_v53, %s3713_s17  ;;  %s2654_s4 = sld [smem:[#allocation8 + $0x4]]  ;;  %v630_v29 = vmul.f32 %v628_v60, %v2613_v41  ;;  %v925_v31 = vmul.f32 %v924_v30, %v2698_v12  ;;  %v658_v32 = vmul.f32 %v656_v63, %v2613_v41  ;;  %v1024_v50 = vstv %s2777_s26 }
 0x123   : > { %v969_v35 = vmul.f32 %v968_v34, %v2754_v33  ;;  %v983_v39 = vmul.f32 %v982_v38, %v2765_v37  ;;  %v714_v40 = vmul.f32 %v712_v6, %v2613_v41  ;;  %v997_v43 = vmul.f32 %v996_v42, %v2754_v33  ;;  %s2946_s26 = sld [smem:[#allocation8 + $0x49]] }
 0x124   : > { %v742_v44 = vmul.f32 %v740_v9, %v2613_v41  ;;  %v1011_v47 = vmul.f32 %v1010_v46, %v2765_v37  ;;  %v786_v48 = vmul.f32 %v784_v13, %v2785_v45  ;;  %v1038_v52 = vstv %s2788_s3  ;;  %s2961_s3 = sld [smem:[#allocation8 + $0x19]] }
 0x125   : > { %v1039_v54 = vmul.f32 %v1038_v52, %v2765_v37  ;;  %v898_v63 = vmul.f32 %v896_v26, %v2785_v45  ;;  %v2915_v26 = vld [vmem:[#allocation3 + $0x1b] sm:$0xff] }
 0x126   : > { %677 = vrot.lane.b32.xlu1 %v672_v55, %s3715_s15  ;;  %943 = vrot.lane.b32.xlu0 %v939_v56, %s3738_s19  ;;  %v1052_v56 = vstv %s2797_s8  ;;  %s2976_s8 = sld [smem:[#allocation8 + $0x4a]] }
 0x128   : > { %v684_v3 = vstv %s2654_s4  ;;  %s2690_s4 = sld [smem:[#allocation8 + $0x9]] }
 0x129   : > { %v685_v5 = vmul.f32 %v684_v3, %v2571_v19  ;;  %v840_v19 = vstv %s2701_s20  ;;  %v686_v36 = vmul.f32 %v684_v3, %v2613_v41  ;;  %v1025_v41 = vmul.f32 %v1024_v50, %v2754_v33  ;;  %s2832_s20 = sld [smem:[#allocation8 + $0x44]] }
 0x12a   : > { %705 = vrot.lane.b32.xlu1 %v700_v58, %s3711_s7  ;;  %605 = vrot.lane.b32.xlu0 %v601_v59, %s3709_s30  ;;  %v841_v21 = vmul.f32 %v840_v19, %v2698_v12  ;;  %v842_v55 = vmul.f32 %v840_v19, %v2785_v45  ;;  %v1053_v58 = vmul.f32 %v1052_v56, %v2754_v33 }
 0x12b   : > { %v870_v59 = vmul.f32 %v868_v22, %v2785_v45 }
 0x12e   : > { %733 = vrot.lane.b32.xlu1 %v728_v61, %s3713_s17  ;;  %633 = vrot.lane.b32.xlu0 %v629_v62, %s3739_s27  ;;  %v812_v16 = vstv %s2690_s4  ;;  %s2806_s4 = sld [smem:[#allocation8 + $0x43]] }
 0x12f   : > { %v813_v18 = vmul.f32 %v812_v16, %v2698_v12  ;;  %v814_v51 = vmul.f32 %v812_v16, %v2785_v45  ;;  %v1094_v6 = vstv %s2832_s20  ;;  %v1122_v16 = vstv %s2860_s18  ;;  %s3018_s20 = sld [smem:[#allocation8 + $0x1b]] }
 0x130   : > { %s3054_s18 = sld [smem:[#allocation8 + $0x1d]] }
 0x132   : > { %761 = vrot.lane.b32.xlu1 %v756_v0, %s3738_s19  ;;  %661 = vrot.lane.b32.xlu0 %v657_v1, %s3715_s15 }
 0x134   : > { %v1066_v60 = vstv %s2806_s4  ;;  %s2990_s4 = sld [smem:[#allocation8 + $0x1a]] }
 0x135   : > { %v1067_v62 = vmul.f32 %v1066_v60, %v2765_v37 }
 0x136   : > { %805 = vrot.lane.b32.xlu1 %v800_v4, %s3709_s30  ;;  %689 = vrot.lane.b32.xlu0 %v685_v5, %s3711_s7  ;;  %v926_v4 = vmul.f32 %v924_v30, %v2785_v45  ;;  %v2857_v5 = vld [vmem:[#allocation3 + $0xa] sm:$0xff] }
 0x137   : > { %v970_v9 = vmul.f32 %v968_v34, %v2857_v5  ;;  %v998_v19 = vmul.f32 %v996_v42, %v2857_v5 }
 0x13a   : > { %833 = vrot.lane.b32.xlu1 %v828_v7, %s3739_s27  ;;  %717 = vrot.lane.b32.xlu0 %v713_v8, %s3713_s17  ;;  %v1095_v8 = vmul.f32 %v1094_v6, %v2765_v37 }
 0x13e   : > { %861 = vrot.lane.b32.xlu1 %v856_v10, %s3715_s15  ;;  %745 = vrot.lane.b32.xlu0 %v741_v11, %s3738_s19  ;;  %v2872_v10 = vld [vmem:[#allocation3 + $0x22] sm:$0xff]  ;;  %v1108_v11 = vstv %s2845_s14  ;;  %s3036_s14 = sld [smem:[#allocation8 + $0x4c]] }
 0x142   : > { %889 = vrot.lane.b32.xlu1 %v884_v14, %s3711_s7  ;;  %789 = vrot.lane.b32.xlu0 %v785_v15, %s3709_s30  ;;  %v1109_v14 = vmul.f32 %v1108_v11, %v2754_v33  ;;  %v984_v15 = vmul.f32 %v982_v38, %v2872_v10  ;;  %v1040_v38 = vmul.f32 %v1038_v52, %v2872_v10 }
 0x146   : > { %917 = vrot.lane.b32.xlu1 %v912_v17, %s3713_s17  ;;  %817 = vrot.lane.b32.xlu0 %v813_v18, %s3739_s27  ;;  %v1123_v18 = vmul.f32 %v1122_v16, %v2765_v37 }
 0x14a   : > { %945 = vrot.lane.b32.xlu1 %v940_v20, %s3738_s19  ;;  %845 = vrot.lane.b32.xlu0 %v841_v21, %s3715_s15  ;;  %v2900_v20 = vld [vmem:[#allocation3 + $0x3] sm:$0xff]  ;;  %v1152_v21 = vstv %s2875_s22  ;;  %s3069_s22 = sld [smem:[#allocation8 + $0x4e]] }
 0x14e   : > { %873 = vrot.lane.b32.xlu0 %v869_v23, %s3711_s7  ;;  %607 = vrot.lane.b32.xlu1 %v602_v24, %s3709_s30  ;;  %v1153_v23 = vmul.f32 %v1152_v21, %v2900_v20  ;;  %v1012_v24 = vmul.f32 %v1010_v46, %v2872_v10  ;;  %v1208_v46 = vstv %s2931_s25  ;;  %s3134_s25 = sld [smem:[#allocation8 + $0x50]] }
 0x152   : > { %901 = vrot.lane.b32.xlu0 %v897_v28, %s3713_s17  ;;  %635 = vrot.lane.b32.xlu1 %v630_v29, %s3739_s27  ;;  %v1166_v28 = vstv %s2888_s23  ;;  %s3092_s23 = sld [smem:[#allocation8 + $0x1e]] }
 0x153   : > { %v1167_v30 = vmul.f32 %v1166_v28, %v2915_v26 }
 0x156   : > { %929 = vrot.lane.b32.xlu0 %v925_v31, %s3738_s19  ;;  %663 = vrot.lane.b32.xlu1 %v658_v32, %s3715_s15  ;;  %v1026_v31 = vmul.f32 %v1024_v50, %v2857_v5  ;;  %v1180_v32 = vstv %s2903_s6  ;;  %v1209_v50 = vmul.f32 %v1208_v46, %v2900_v20  ;;  %s3107_s6 = sld [smem:[#allocation8 + $0x4f]] }
 0x15a   : > { %973 = vrot.lane.b32.xlu0 %v969_v35, %s3709_s30  ;;  %691 = vrot.lane.b32.xlu1 %v686_v36, %s3711_s7  ;;  %v1181_v36 = vmul.f32 %v1180_v32, %v2900_v20 }
 0x15e   : > { %987 = vrot.lane.b32.xlu0 %v983_v39, %s3709_s30  ;;  %719 = vrot.lane.b32.xlu1 %v714_v40, %s3713_s17  ;;  %v1194_v39 = vstv %s2918_s24  ;;  %s3121_s24 = sld [smem:[#allocation8 + $0x1f]] }
 0x162   : > { %1001 = vrot.lane.b32.xlu0 %v997_v43, %s3739_s27  ;;  %747 = vrot.lane.b32.xlu1 %v742_v44, %s3738_s19  ;;  %v1195_v43 = vmul.f32 %v1194_v39, %v2915_v26  ;;  %v1054_v44 = vmul.f32 %v1052_v56, %v2857_v5 }
 0x166   : > { %1015 = vrot.lane.b32.xlu0 %v1011_v47, %s3739_s27  ;;  %791 = vrot.lane.b32.xlu1 %v786_v48, %s3709_s30  ;;  %s2819_s30 = sld [smem:[#allocation8 + $0x13]] }
 0x16a   : > { %1029 = vrot.lane.b32.xlu0 %v1025_v41, %s3715_s15  ;;  %819 = vrot.lane.b32.xlu1 %v814_v51, %s3739_s27  ;;  %v1068_v41 = vmul.f32 %v1066_v60, %v2872_v10  ;;  %v1222_v51 = vstv %s2946_s26  ;;  %s3140_s26 = sld [smem:[#allocation8 + $0xe]] }
 0x16c   : > { %v2810_v53 = vpop.permute.xlu0 %619  ;;  %v1080_v0 = vstv %s2819_s30  ;;  %s3004_s30 = sld [smem:[#allocation8 + $0x4b]] }
 0x16d   : > { %v1081_v3 = vmul.f32 %v1080_v0, %v2754_v33  ;;  %v1082_v56 = vmul.f32 %v1080_v0, %v2857_v5 }
 0x16e   : > { %1043 = vrot.lane.b32.xlu0 %v1039_v54, %s3715_s15  ;;  %847 = vrot.lane.b32.xlu1 %v842_v55, %s3715_s15  ;;  %v1223_v55 = vmul.f32 %v1222_v51, %v2915_v26 }
 0x170   : > { %v2823_v57 = vpop.permute.xlu0 %647 }
 0x172   : > { %1057 = vrot.lane.b32.xlu0 %v1053_v58, %s3711_s7  ;;  %875 = vrot.lane.b32.xlu1 %v870_v59, %s3711_s7  ;;  %v1236_v59 = vstv %s2961_s3  ;;  %s3164_s3 = sld [smem:[#allocation8 + $0x51]] }
 0x173   : > { %v1237_v0 = vmul.f32 %v1236_v59, %v2900_v20 }
 0x174   : > { %v2836_v61 = vpop.permute.xlu0 %675 }
 0x176   : > { %1071 = vrot.lane.b32.xlu0 %v1067_v62, %s3711_s7  ;;  %903 = vrot.lane.b32.xlu1 %v898_v63, %s3713_s17  ;;  %s3740_s7 = smov 127  }
 0x178   : > { %v2849_v1 = vpop.permute.xlu0 %703 }
 0x17a   : > { %1085 = vrot.lane.b32.xlu0 %v1081_v3, %s3713_s17  ;;  %931 = vrot.lane.b32.xlu1 %v926_v4, %s3738_s19  ;;  %v1250_v4 = vstv %s2976_s8  ;;  %s3178_s8 = sld [smem:[#allocation8 + $0x21]] }
 0x17c   : > { %v2864_v7 = vpop.permute.xlu0 %731 }
 0x17e   : > { %1099 = vrot.lane.b32.xlu0 %v1095_v8, %s3713_s17  ;;  %975 = vrot.lane.b32.xlu1 %v970_v9, %s3740_s7  ;;  %s3741_s17 = smov 124  }
 0x180   : > { %v2879_v13 = vpop.permute.xlu0 %759 }
 0x182   : > { %1113 = vrot.lane.b32.xlu0 %v1109_v14, %s3738_s19  ;;  %989 = vrot.lane.b32.xlu1 %v984_v15, %s3740_s7  ;;  %v1251_v14 = vmul.f32 %v1250_v4, %v2915_v26 }
 0x184   : > { %v2892_v17 = vpop.permute.xlu0 %803 }
 0x186   : > { %1127 = vrot.lane.b32.xlu0 %v1123_v18, %s3738_s19  ;;  %1003 = vrot.lane.b32.xlu1 %v998_v19, %s3739_s27  ;;  %v1264_v18 = vstv %s2990_s4  ;;  %s3198_s4 = sld [smem:[#allocation8 + $0x52]] }
 0x188   : > { %v2907_v22 = vpop.permute.xlu0 %831 }
 0x18a   : > { %1157 = vrot.lane.b32.xlu0 %v1153_v23, %s3740_s7  ;;  %1017 = vrot.lane.b32.xlu1 %v1012_v24, %s3739_s27  ;;  %v1124_v24 = vmul.f32 %v1122_v16, %v2872_v10 }
 0x18c   : > { %v2922_v29 = vpop.permute.xlu0 %859 }
 0x18e   : > { %1171 = vrot.lane.b32.xlu0 %v1167_v30, %s3740_s7  ;;  %1031 = vrot.lane.b32.xlu1 %v1026_v31, %s3715_s15  ;;  %v3033_v30 = vld [vmem:[#allocation3 + $0xb] sm:$0xff] }
 0x190   : > { %v2935_v34 = vpop.permute.xlu1 %621  ;;  %v2937_v35 = vpop.permute.xlu0 %887 }
 0x192   : > { %1185 = vrot.lane.b32.xlu0 %v1181_v36, %s3739_s27  ;;  %1045 = vrot.lane.b32.xlu1 %v1040_v38, %s3715_s15  ;;  %v1278_v36 = vstv %s3004_s30  ;;  %s3210_s30 = sld [smem:[#allocation8 + $0x22]] }
 0x194   : > { %v2950_v40 = vpop.permute.xlu1 %649  ;;  %v2952_v42 = vpop.permute.xlu0 %915 }
 0x196   : > { %1199 = vrot.lane.b32.xlu0 %v1195_v43, %s3739_s27  ;;  %1059 = vrot.lane.b32.xlu1 %v1054_v44, %s3741_s17  ;;  %v1279_v43 = vmul.f32 %v1278_v36, %v2915_v26  ;;  %v1154_v44 = vmul.f32 %v1152_v21, %v3033_v30 }
 0x198   : > { %v2965_v47 = vpop.permute.xlu1 %677  ;;  %v2967_v48 = vpop.permute.xlu0 %943 }
 0x19a   : > { %1213 = vrot.lane.b32.xlu0 %v1209_v50, %s3715_s15  ;;  %1073 = vrot.lane.b32.xlu1 %v1068_v41, %s3741_s17  ;;  %v3051_v50 = vld [vmem:[#allocation3 + $0x23] sm:$0xff] }
 0x19c   : > { %v2980_v52 = vpop.permute.xlu1 %705  ;;  %v606_v54 = vpop.permute.xlu0 %605 }
 0x19d   : > { %v611_v58 = vadd.f32 %v606_v54, %v2583_v27  ;;  %v1096_v27 = vmul.f32 %v1094_v6, %v2872_v10  ;;  %v1110_v6 = vmul.f32 %v1108_v11, %v2857_v5  ;;  %v1265_v11 = vmul.f32 %v1264_v18, %v2900_v20 }
 0x19e   : > { %1227 = vrot.lane.b32.xlu0 %v1223_v55, %s3715_s15  ;;  %1087 = vrot.lane.b32.xlu1 %v1082_v56, %s3742_s0  ;;  %s3023_s15 = sld [smem:[#allocation8 + $0x7]]  ;;  %v1292_v54 = vstv %s3018_s20 }
 0x19f   : > { %v625_v60 = vadd.f32 %v2810_v53, %v611_v58  ;;  %v1293_v58 = vmul.f32 %v1292_v54, %v2900_v20  ;;  %s3255_s20 = sld [smem:[#allocation8 + $0x55]] }
 0x1a0   : > { %v2995_v62 = vpop.permute.xlu1 %733  ;;  %v634_v63 = vpop.permute.xlu0 %633 }
 0x1a1   : > { %v639_v3 = vadd.f32 %v634_v63, %v625_v60  ;;  %v1168_v60 = vmul.f32 %v1166_v28, %v3051_v50 }
 0x1a2   : > { %1241 = vrot.lane.b32.xlu0 %v1237_v0, %s3741_s17  ;;  %1101 = vrot.lane.b32.xlu1 %v1096_v27, %s3742_s0  ;;  %v1306_v0 = vstv %s3036_s14  ;;  %v778_v27 = vstv %s3038_s1  ;;  %s3243_s1 = sld [smem:[#allocation8 + $0x24]] }
 0x1a3   : > { %v653_v53 = vadd.f32 %v2823_v57, %v639_v3  ;;  %s3269_s14 = sld [smem:[#allocation8 + $0x25]] }
 0x1a4   : > { %v3009_v8 = vpop.permute.xlu1 %761  ;;  %v662_v9 = vpop.permute.xlu0 %661  ;;  %v770_v55 = vstv %s3023_s15  ;;  %s3230_s15 = sld [smem:[#allocation8 + $0x53]] }
 0x1a5   : > { %v667_v15 = vadd.f32 %v662_v9, %v653_v53  ;;  %v1307_v9 = vmul.f32 %v1306_v0, %v2915_v26 }
 0x1a6   : > { %1255 = vrot.lane.b32.xlu0 %v1251_v14, %s3741_s17  ;;  %1115 = vrot.lane.b32.xlu1 %v1110_v6, %s3738_s19  ;;  %v1182_v14 = vmul.f32 %v1180_v32, %v3033_v30  ;;  %v779_v6 = vmul.f32 %v778_v27, %v2578_v25  ;;  %v1196_v25 = vmul.f32 %v1194_v39, %v3051_v50 }
 0x1a7   : > { %v681_v57 = vadd.f32 %v2836_v61, %v667_v15 }
 0x1a8   : > { %v3025_v19 = vpop.permute.xlu1 %805  ;;  %v690_v23 = vpop.permute.xlu0 %689 }
 0x1a9   : > { %v695_v31 = vadd.f32 %v690_v23, %v681_v57  ;;  %v3089_v57 = vld [vmem:[#allocation3 + $0x4] sm:$0xff] }
 0x1aa   : > { %1269 = vrot.lane.b32.xlu0 %v1265_v11, %s3742_s0  ;;  %1129 = vrot.lane.b32.xlu1 %v1124_v24, %s3738_s19 }
 0x1ab   : > { %v709_v61 = vadd.f32 %v2849_v1, %v695_v31  ;;  %v3104_v31 = vld [vmem:[#allocation3 + $0x1c] sm:$0xff] }
 0x1ac   : > { %v3043_v38 = vpop.permute.xlu1 %833  ;;  %v718_v16 = vpop.permute.xlu0 %717 }
 0x1ad   : > { %v723_v41 = vadd.f32 %v718_v16, %v709_v61  ;;  %v1350_v61 = vstv %s3069_s22  ;;  %s3295_s22 = sld [smem:[#allocation8 + $0x26]] }
 0x1ae   : > { %1283 = vrot.lane.b32.xlu0 %v1279_v43, %s3742_s0  ;;  %1159 = vrot.lane.b32.xlu1 %v1154_v44, %s3740_s7  ;;  %v1210_v44 = vmul.f32 %v1208_v46, %v3033_v30  ;;  %v1224_v46 = vmul.f32 %v1222_v51, %v3051_v50 }
 0x1af   : > { %v737_v1 = vadd.f32 %v2864_v7, %v723_v41  ;;  %v771_v7 = vmul.f32 %v770_v55, %v2698_v12  ;;  %v1336_v12 = vstv %s3054_s18  ;;  %v1351_v41 = vmul.f32 %v1350_v61, %v3104_v31  ;;  %s3283_s18 = sld [smem:[#allocation8 + $0x56]] }
 0x1b0   : > { %v3060_v56 = vpop.permute.xlu1 %861  ;;  %v746_v21 = vpop.permute.xlu0 %745  ;;  %v1337_v11 = vmul.f32 %v1336_v12, %v3089_v57 }
 0x1b1   : > { %v751_v63 = vadd.f32 %v746_v21, %v737_v1  ;;  %v1364_v21 = vstv %s3092_s23  ;;  %s3297_s23 = sld [smem:[#allocation8 + $0x15]] }
 0x1b2   : > { %1297 = vrot.lane.b32.xlu0 %v1293_v58, %s3738_s19  ;;  %1173 = vrot.lane.b32.xlu1 %v1168_v60, %s3740_s7 }
 0x1b3   : > { %v765_v3 = vadd.f32 %v2879_v13, %v751_v63  ;;  %v1365_v63 = vmul.f32 %v1364_v21, %v3089_v57 }
 0x1b4   : > { %v3078_v53 = vpop.permute.xlu1 %889  ;;  %v790_v28 = vpop.permute.xlu0 %789 }
 0x1b5   : > { %v773_v15 = vadd.f32 %v771_v7, %v765_v3 }
 0x1b6   : > { %1311 = vrot.lane.b32.xlu0 %v1307_v9, %s3738_s19  ;;  %1187 = vrot.lane.b32.xlu1 %v1182_v14, %s3739_s27 }
 0x1b7   : > { %v781_v13 = vadd.f32 %v779_v6, %v773_v15 }
 0x1b8   : > { %v3096_v23 = vpop.permute.xlu1 %917  ;;  %v818_v32 = vpop.permute.xlu0 %817 }
 0x1b9   : > { %v795_v24 = vadd.f32 %v790_v28, %v781_v13  ;;  %v1378_v28 = vstv %s3107_s6  ;;  %s3302_s6 = sld [smem:[#allocation8 + $0x46]] }
 0x1ba   : > { %1201 = vrot.lane.b32.xlu1 %v1196_v25, %s3739_s27  ;;  %1341 = vrot.lane.b32.xlu0 %v1337_v11, %s3740_s7  ;;  %v1379_v6 = vmul.f32 %v1378_v28, %v3104_v31  ;;  %v1252_v11 = vmul.f32 %v1250_v4, %v3051_v50  ;;  %v954_v4 = vstv %s3140_s26  ;;  %s3370_s26 = sld [smem:[#allocation8 + $0x59]] }
 0x1bb   : > { %v809_v16 = vadd.f32 %v2892_v17, %v795_v24 }
 0x1bc   : > { %v3112_v43 = vpop.permute.xlu1 %945  ;;  %v846_v39 = vpop.permute.xlu0 %845 }
 0x1bd   : > { %v823_v1 = vadd.f32 %v818_v32, %v809_v16  ;;  %v1392_v32 = vstv %s3121_s24  ;;  %s3311_s24 = sld [smem:[#allocation8 + $0x57]] }
 0x1be   : > { %1215 = vrot.lane.b32.xlu1 %v1210_v44, %s3743_s28  ;;  %1355 = vrot.lane.b32.xlu0 %v1351_v41, %s3740_s7  ;;  %v1393_v24 = vmul.f32 %v1392_v32, %v3089_v57  ;;  %v1406_v44 = vstv %s3134_s25  ;;  %s3329_s25 = sld [smem:[#allocation8 + $0x27]] }
 0x1bf   : > { %v837_v17 = vadd.f32 %v2907_v22, %v823_v1 }
 0x1c0   : > { %v608_v58 = vpop.permute.xlu1 %607  ;;  %v874_v60 = vpop.permute.xlu0 %873 }
 0x1c1   : > { %v851_v7 = vadd.f32 %v846_v39, %v837_v17  ;;  %v612_v3 = vadd.f32 %v608_v58, %v2626_v49  ;;  %v1238_v49 = vmul.f32 %v1236_v59, %v3033_v30  ;;  %v1266_v17 = vmul.f32 %v1264_v18, %v3033_v30 }
 0x1c2   : > { %1229 = vrot.lane.b32.xlu1 %v1224_v46, %s3743_s28  ;;  %1369 = vrot.lane.b32.xlu0 %v1365_v63, %s3739_s27  ;;  %v1407_v58 = vmul.f32 %v1406_v44, %v3104_v31  ;;  %v1420_v63 = vstv %s3149_s11  ;;  %s3359_s11 = sld [smem:[#allocation8 + $0x28]] }
 0x1c3   : > { %v865_v22 = vadd.f32 %v2922_v29, %v851_v7  ;;  %v626_v9 = vadd.f32 %v2935_v34, %v612_v3 }
 0x1c4   : > { %v636_v51 = vpop.permute.xlu1 %635  ;;  %v902_v14 = vpop.permute.xlu0 %901 }
 0x1c5   : > { %v879_v15 = vadd.f32 %v874_v60, %v865_v22  ;;  %v640_v13 = vadd.f32 %v636_v51, %v626_v9  ;;  %v1280_v9 = vmul.f32 %v1278_v36, %v3051_v50  ;;  %v1421_v51 = vmul.f32 %v1420_v63, %v3089_v57 }
 0x1c6   : > { %1243 = vrot.lane.b32.xlu1 %v1238_v49, %s3741_s17  ;;  %1383 = vrot.lane.b32.xlu0 %v1379_v6, %s3739_s27 }
 0x1c7   : > { %v893_v29 = vadd.f32 %v2937_v35, %v879_v15  ;;  %v654_v34 = vadd.f32 %v2950_v40, %v640_v13 }
 0x1c8   : > { %v664_v59 = vpop.permute.xlu1 %663  ;;  %v930_v25 = vpop.permute.xlu0 %929 }
 0x1c9   : > { %v907_v16 = vadd.f32 %v902_v14, %v893_v29  ;;  %v668_v39 = vadd.f32 %v664_v59, %v654_v34  ;;  %v1448_v34 = vstv %s3178_s8  ;;  %s3394_s8 = sld [smem:[#allocation8 + $0x5a]] }
 0x1ca   : > { %1257 = vrot.lane.b32.xlu1 %v1252_v11, %s3741_s17  ;;  %1397 = vrot.lane.b32.xlu0 %v1393_v24, %s3743_s28  ;;  %v1308_v11 = vmul.f32 %v1306_v0, %v3051_v50  ;;  %v1449_v24 = vmul.f32 %v1448_v34, %v3089_v57 }
 0x1cb   : > { %v921_v35 = vadd.f32 %v2952_v42, %v907_v16  ;;  %v682_v40 = vadd.f32 %v2965_v47, %v668_v39  ;;  %v962_v42 = vstv %s3151_s10  ;;  %v955_v47 = vmul.f32 %v954_v4, %v2754_v33  ;;  %s3345_s10 = sld [smem:[#allocation8 + $0x58]] }
 0x1cc   : > { %v692_v41 = vpop.permute.xlu1 %691  ;;  %v974_v1 = vpop.permute.xlu0 %973  ;;  %v963_v14 = vmul.f32 %v962_v42, %v2765_v37  ;;  %v1294_v37 = vmul.f32 %v1292_v54, %v3033_v30  ;;  %v780_v16 = vmul.f32 %v778_v27, %v2669_v2 }
 0x1cd   : > { %v935_v60 = vadd.f32 %v930_v25, %v921_v35  ;;  %v696_v46 = vadd.f32 %v692_v41, %v682_v40  ;;  %v3227_v35 = vld [vmem:[#allocation3 + $0xc] sm:$0xff] }
 0x1ce   : > { %1271 = vrot.lane.b32.xlu1 %v1266_v17, %s3742_s0  ;;  %1411 = vrot.lane.b32.xlu0 %v1407_v58, %s3743_s28  ;;  %v1338_v2 = vmul.f32 %v1336_v12, %v3227_v35  ;;  %v3240_v17 = vld [vmem:[#allocation3 + $0x24] sm:$0xff]  ;;  %v1476_v58 = vstv %s3210_s30  ;;  %s3418_s30 = sld [smem:[#allocation8 + $0x5c]] }
 0x1cf   : > { %v949_v18 = vadd.f32 %v2967_v48, %v935_v60  ;;  %v710_v7 = vadd.f32 %v2980_v52, %v696_v46  ;;  %v1434_v48 = vstv %s3164_s3  ;;  %s3381_s3 = sld [smem:[#allocation8 + $0x29]] }
 0x1d0   : > { %v720_v3 = vpop.permute.xlu1 %719  ;;  %v988_v22 = vpop.permute.xlu0 %987  ;;  %v1435_v13 = vmul.f32 %v1434_v48, %v3104_v31 }
 0x1d1   : > { %v957_v49 = vadd.f32 %v955_v47, %v949_v18  ;;  %v724_v33 = vadd.f32 %v720_v3, %v710_v7  ;;  %v1352_v47 = vmul.f32 %v1350_v61, %v3240_v17  ;;  %v1477_v18 = vmul.f32 %v1476_v58, %v3089_v57 }
 0x1d2   : > { %1285 = vrot.lane.b32.xlu1 %v1280_v9, %s3742_s0  ;;  %1425 = vrot.lane.b32.xlu0 %v1421_v51, %s3741_s17  ;;  %v1490_v3 = vstv %s3230_s15  ;;  %v1366_v61 = vmul.f32 %v1364_v21, %v3227_v35  ;;  %s3431_s15 = sld [smem:[#allocation8 + $0x2c]] }
 0x1d3   : > { %v965_v52 = vadd.f32 %v963_v14, %v957_v49  ;;  %v738_v36 = vadd.f32 %v2995_v62, %v724_v33  ;;  %v772_v62 = vmul.f32 %v770_v55, %v2785_v45  ;;  %v1462_v45 = vstv %s3198_s4  ;;  %v3266_v33 = vld [vmem:[#allocation3 + $0x5] sm:$0xff]  ;;  %s3407_s4 = sld [smem:[#allocation8 + $0x2b]] }
 0x1d4   : > { %v748_v6 = vpop.permute.xlu1 %747  ;;  %v1002_v15 = vpop.permute.xlu0 %1001  ;;  %v1463_v27 = vmul.f32 %v1462_v45, %v3104_v31  ;;  %v1491_v14 = vmul.f32 %v1490_v3, %v3104_v31 }
 0x1d5   : > { %v752_v29 = vadd.f32 %v748_v6, %v738_v36 }
 0x1d6   : > { %1299 = vrot.lane.b32.xlu1 %v1294_v37, %s3738_s19  ;;  %1439 = vrot.lane.b32.xlu0 %v1435_v13, %s3741_s17 }
 0x1d7   : > { %v766_v59 = vadd.f32 %v3009_v8, %v752_v29  ;;  %v979_v8 = vadd.f32 %v974_v1, %v965_v52  ;;  %v1520_v52 = vstv %s3243_s1  ;;  %v3280_v29 = vld [vmem:[#allocation3 + $0x1d] sm:$0xff]  ;;  %s3444_s1 = sld [smem:[#allocation8 + $0x5d]] }
 0x1d8   : > { %v792_v25 = vpop.permute.xlu1 %791  ;;  %v1016_v54 = vpop.permute.xlu0 %1015  ;;  %v1521_v37 = vmul.f32 %v1520_v52, %v3266_v33 }
 0x1d9   : > { %v774_v39 = vadd.f32 %v772_v62, %v766_v59  ;;  %v993_v1 = vadd.f32 %v988_v22, %v979_v8  ;;  %v1534_v62 = vstv %s3255_s20  ;;  %s3458_s20 = sld [smem:[#allocation8 + $0x2d]] }
 0x1da   : > { %1313 = vrot.lane.b32.xlu1 %v1308_v11, %s3738_s19  ;;  %1453 = vrot.lane.b32.xlu0 %v1449_v24, %s3742_s0  ;;  %v1535_v11 = vmul.f32 %v1534_v62, %v3280_v29 }
 0x1db   : > { %v782_v55 = vadd.f32 %v780_v16, %v774_v39  ;;  %v1007_v22 = vadd.f32 %v1002_v15, %v993_v1  ;;  %v1380_v15 = vmul.f32 %v1378_v28, %v3240_v17  ;;  %v1548_v39 = vstv %s3269_s14  ;;  %s3462_s14 = sld [smem:[#allocation8 + $0x1c]] }
 0x1dc   : > { %v820_v0 = vpop.permute.xlu1 %819  ;;  %v1030_v40 = vpop.permute.xlu0 %1029 }
 0x1dd   : > { %v796_v41 = vadd.f32 %v792_v25, %v782_v55 }
 0x1de   : > { %1343 = vrot.lane.b32.xlu1 %v1338_v2, %s3740_s7  ;;  %1467 = vrot.lane.b32.xlu0 %v1463_v27, %s3742_s0 }
 0x1df   : > { %v810_v60 = vadd.f32 %v3025_v19, %v796_v41  ;;  %v1562_v41 = vstv %s3283_s18  ;;  %s3473_s18 = sld [smem:[#allocation8 + $0x4d]] }
 0x1e0   : > { %v848_v46 = vpop.permute.xlu1 %847  ;;  %v1044_v12 = vpop.permute.xlu0 %1043 }
 0x1e1   : > { %v824_v7 = vadd.f32 %v820_v0, %v810_v60  ;;  %v1408_v0 = vmul.f32 %v1406_v44, %v3240_v17 }
 0x1e2   : > { %1357 = vrot.lane.b32.xlu1 %v1352_v47, %s3740_s7  ;;  %1481 = vrot.lane.b32.xlu0 %v1477_v18, %s3738_s19  ;;  %v1563_v47 = vmul.f32 %v1562_v41, %v3280_v29  ;;  %v964_v18 = vmul.f32 %v962_v42, %v2872_v10  ;;  %v1436_v10 = vmul.f32 %v1434_v48, %v3240_v17 }
 0x1e3   : > { %v838_v19 = vadd.f32 %v3043_v38, %v824_v7  ;;  %v1021_v38 = vadd.f32 %v1016_v54, %v1007_v22  ;;  %v1394_v54 = vmul.f32 %v1392_v32, %v3227_v35 }
 0x1e4   : > { %v876_v9 = vpop.permute.xlu1 %875  ;;  %v1058_v51 = vpop.permute.xlu0 %1057 }
 0x1e5   : > { %v852_v49 = vadd.f32 %v848_v46, %v838_v19  ;;  %v1146_v19 = vstv %s3302_s6  ;;  %s3503_s6 = sld [smem:[#allocation8 + $0x5f]] }
 0x1e6   : > { %1371 = vrot.lane.b32.xlu1 %v1366_v61, %s3739_s27  ;;  %1495 = vrot.lane.b32.xlu0 %v1491_v14, %s3738_s19 }
 0x1e7   : > { %v866_v36 = vadd.f32 %v3060_v56, %v852_v49  ;;  %v1035_v56 = vadd.f32 %v1030_v40, %v1021_v38  ;;  %v1549_v40 = vmul.f32 %v1548_v39, %v3266_v33  ;;  %v1590_v49 = vstv %s3311_s24  ;;  %s3517_s24 = sld [smem:[#allocation8 + $0x2f]] }
 0x1e8   : > { %v904_v21 = vpop.permute.xlu1 %903  ;;  %v1072_v6 = vpop.permute.xlu0 %1071  ;;  %v1147_v38 = vmul.f32 %v1146_v19, %v2915_v26 }
 0x1e9   : > { %v880_v13 = vadd.f32 %v876_v9, %v866_v36  ;;  %v1049_v24 = vadd.f32 %v1044_v12, %v1035_v56  ;;  %v1422_v12 = vmul.f32 %v1420_v63, %v3227_v35 }
 0x1ea   : > { %1385 = vrot.lane.b32.xlu1 %v1380_v15, %s3739_s27  ;;  %1525 = vrot.lane.b32.xlu0 %v1521_v37, %s3740_s7  ;;  %v1604_v37 = vstv %s3329_s25  ;;  %s3528_s25 = sld [smem:[#allocation8 + $0x60]] }
 0x1eb   : > { %v894_v59 = vadd.f32 %v3078_v53, %v880_v13  ;;  %v1063_v53 = vadd.f32 %v1058_v51, %v1049_v24 }
 0x1ec   : > { %v932_v25 = vpop.permute.xlu1 %931  ;;  %v1086_v28 = vpop.permute.xlu0 %1085 }
 0x1ed   : > { %v908_v16 = vadd.f32 %v904_v21, %v894_v59  ;;  %v1077_v2 = vadd.f32 %v1072_v6, %v1063_v53  ;;  %v1591_v6 = vmul.f32 %v1590_v49, %v3280_v29 }
 0x1ee   : > { %1399 = vrot.lane.b32.xlu1 %v1394_v54, %s3743_s28  ;;  %1539 = vrot.lane.b32.xlu0 %v1535_v11, %s3740_s7  ;;  %v1618_v54 = vstv %s3345_s10  ;;  %s3539_s10 = sld [smem:[#allocation8 + $0x30]] }
 0x1ef   : > { %v922_v8 = vadd.f32 %v3096_v23, %v908_v16  ;;  %v956_v23 = vmul.f32 %v954_v4, %v2857_v5  ;;  %v1091_v44 = vadd.f32 %v1086_v28, %v1077_v2  ;;  %v1138_v4 = vstv %s3297_s23  ;;  %s3487_s23 = sld [smem:[#allocation8 + $0x2e]] }
 0x1f0   : > { %v976_v32 = vpop.permute.xlu1 %975  ;;  %v1100_v55 = vpop.permute.xlu0 %1099  ;;  %v1139_v61 = vmul.f32 %v1138_v4, %v2900_v20  ;;  %v1450_v20 = vmul.f32 %v1448_v34, %v3227_v35  ;;  %v1464_v34 = vmul.f32 %v1462_v45, %v3240_v17  ;;  %v1478_v45 = vmul.f32 %v1476_v58, %v3227_v35 }
 0x1f1   : > { %v936_v27 = vadd.f32 %v932_v25, %v922_v8  ;;  %v1105_v5 = vadd.f32 %v1100_v55, %v1091_v44  ;;  %v1605_v25 = vmul.f32 %v1604_v37, %v3266_v33  ;;  %v1619_v53 = vmul.f32 %v1618_v54, %v3280_v29 }
 0x1f2   : > { %1413 = vrot.lane.b32.xlu1 %v1408_v0, %s3743_s28  ;;  %1553 = vrot.lane.b32.xlu0 %v1549_v40, %s3739_s27  ;;  %v1492_v58 = vmul.f32 %v1490_v3, %v3240_v17 }
 0x1f3   : > { %v950_v1 = vadd.f32 %v3112_v43, %v936_v27  ;;  %v1576_v43 = vstv %s3295_s22  ;;  %s3476_s22 = sld [smem:[#allocation8 + $0x5e]] }
 0x1f4   : > { %v990_v60 = vpop.permute.xlu1 %989  ;;  %v1114_v46 = vpop.permute.xlu0 %1113  ;;  %v1577_v42 = vmul.f32 %v1576_v43, %v3266_v33 }
 0x1f5   : > { %v958_v7 = vadd.f32 %v956_v23, %v950_v1  ;;  %v1119_v22 = vadd.f32 %v1114_v46, %v1105_v5  ;;  %v3391_v23 = vld [vmem:[#allocation3 + $0xd] sm:$0xff]  ;;  %v1646_v1 = vstv %s3370_s26  ;;  %s2133_s26 = sshll.u32 %s2388_s13, 8  ;;  %s2349_s13 = smov [#allocation9]  }
 0x1f6   : > { %1427 = vrot.lane.b32.xlu1 %v1422_v12, %s3741_s17  ;;  %1567 = vrot.lane.b32.xlu0 %v1563_v47, %s3739_s27  ;;  %v1522_v3 = vmul.f32 %v1520_v52, %v3391_v23  ;;  %v1647_v12 = vmul.f32 %v1646_v1, %v3280_v29 }
 0x1f7   : > { %v966_v63 = vadd.f32 %v964_v18, %v958_v7  ;;  %v3404_v18 = vld [vmem:[#allocation3 + $0x25] sm:$0xff]  ;;  %v1660_v7 = vstv %s3381_s3 }
 0x1f8   : > { %v1004_v9 = vpop.permute.xlu1 %1003  ;;  %v1128_v51 = vpop.permute.xlu0 %1127  ;;  %v1536_v52 = vmul.f32 %v1534_v62, %v3404_v18  ;;  %v1550_v62 = vmul.f32 %v1548_v39, %v3391_v23 }
 0x1f9   : > { %v1133_v14 = vadd.f32 %v1128_v51, %v1119_v22  ;;  %v980_v26 = vadd.f32 %v976_v32, %v966_v63  ;;  %v1632_v32 = vstv %s3359_s11  ;;  %s3552_s11 = sld [smem:[#allocation8 + $0x61]] }
 0x1fa   : > { %1441 = vrot.lane.b32.xlu1 %v1436_v10, %s3741_s17  ;;  %1581 = vrot.lane.b32.xlu0 %v1577_v42, %s3743_s28  ;;  %v1633_v2 = vmul.f32 %v1632_v32, %v3266_v33  ;;  %v1674_v42 = vstv %s3394_s8 }
 0x1fb   : > { %v1141_v48 = vadd.f32 %v1139_v61, %v1133_v14  ;;  %v994_v11 = vadd.f32 %v990_v60, %v980_v26 }
 0x1fc   : > { %v1018_v36 = vpop.permute.xlu1 %1017  ;;  %v1158_v21 = vpop.permute.xlu0 %1157 }
 0x1fd   : > { %v1149_v15 = vadd.f32 %v1147_v38, %v1141_v48  ;;  %v1008_v55 = vadd.f32 %v1004_v9, %v994_v11  ;;  %v1661_v9 = vmul.f32 %v1660_v7, %v3266_v33  ;;  %v1675_v48 = vmul.f32 %v1674_v42, %v3280_v29 }
 0x1fe   : > { %1455 = vrot.lane.b32.xlu1 %v1450_v20, %s3742_s0  ;;  %1595 = vrot.lane.b32.xlu0 %v1591_v6, %s3743_s28  ;;  %v3428_v20 = vld [vmem:[#allocation3 + $0x6] sm:$0xff]  ;;  %v1704_v6 = vstv %s3407_s4 }
 0x1ff   : > { %v1163_v13 = vadd.f32 %v1158_v21, %v1149_v15  ;;  %v1022_v44 = vadd.f32 %v1018_v36, %v1008_v55 }
 0x200   : > { %v1032_v56 = vpop.permute.xlu1 %1031  ;;  %v1172_v59 = vpop.permute.xlu0 %1171 }
 0x201   : > { %v1177_v28 = vadd.f32 %v1172_v59, %v1163_v13  ;;  %v1036_v5 = vadd.f32 %v1032_v56, %v1022_v44  ;;  %v1564_v13 = vmul.f32 %v1562_v41, %v3404_v18  ;;  %v1705_v56 = vmul.f32 %v1704_v6, %v3428_v20 }
 0x202   : > { %1469 = vrot.lane.b32.xlu1 %v1464_v34, %s3742_s0  ;;  %1609 = vrot.lane.b32.xlu0 %v1605_v25, %s3741_s17  ;;  %v3441_v25 = vld [vmem:[#allocation3 + $0x1e] sm:$0xff] }
 0x204   : > { %v1046_v24 = vpop.permute.xlu1 %1045  ;;  %v1186_v16 = vpop.permute.xlu0 %1185 }
 0x205   : > { %v1191_v8 = vadd.f32 %v1186_v16, %v1177_v28  ;;  %v1050_v51 = vadd.f32 %v1046_v24, %v1036_v5  ;;  %v1718_v28 = vstv %s3418_s30  ;;  %v1578_v16 = vmul.f32 %v1576_v43, %v3391_v23  ;;  %s3652_s30 = scalar_lea.hbm %s3700_s2, %s2133_s26 }
 0x206   : > { %1483 = vrot.lane.b32.xlu1 %v1478_v45, %s3738_s19  ;;  %1623 = vrot.lane.b32.xlu0 %v1619_v53, %s3741_s17  ;;  %v1719_v45 = vmul.f32 %v1718_v28, %v3441_v25  ;;  %v1140_v53 = vmul.f32 %v1138_v4, %v3033_v30  ;;  %v1148_v43 = vmul.f32 %v1146_v19, %v3051_v50  ;;  %v1322_v5 = vstv %s3462_s14 }
 0x207   : > { %v1592_v4 = vmul.f32 %v1590_v49, %v3404_v18 }
 0x208   : > { %v1060_v0 = vpop.permute.xlu1 %1059  ;;  %v1200_v40 = vpop.permute.xlu0 %1199 }
 0x209   : > { %v1205_v27 = vadd.f32 %v1200_v40, %v1191_v8  ;;  %v1064_v61 = vadd.f32 %v1060_v0, %v1050_v51  ;;  %v1732_v0 = vstv %s3431_s15  ;;  %s1887_s15 = scalar_lea.sflag [#allocation6], %s2486_s5 }
 0x20a   : > { %1497 = vrot.lane.b32.xlu1 %v1492_v58, %s3738_s19  ;;  %1637 = vrot.lane.b32.xlu0 %v1633_v2, %s3742_s0  ;;  %v1733_v2 = vmul.f32 %v1732_v0, %v3428_v20 }
 0x20c   : > { %v1074_v60 = vpop.permute.xlu1 %1073  ;;  %v1214_v46 = vpop.permute.xlu0 %1213 }
 0x20d   : > { %v1219_v47 = vadd.f32 %v1214_v46, %v1205_v27  ;;  %v1078_v36 = vadd.f32 %v1074_v60, %v1064_v61  ;;  %v1746_v60 = vstv %s3444_s1  ;;  %v1606_v46 = vmul.f32 %v1604_v37, %v3391_v23 }
 0x20e   : > { %1527 = vrot.lane.b32.xlu1 %v1522_v3, %s3740_s7  ;;  %1651 = vrot.lane.b32.xlu0 %v1647_v12, %s3742_s0  ;;  %v1747_v3 = vmul.f32 %v1746_v60, %v3441_v25  ;;  %v1323_v61 = vmul.f32 %v1322_v5, %v3089_v57  ;;  %v1634_v57 = vmul.f32 %v1632_v32, %v3391_v23 }
 0x20f   : > { %v1648_v32 = vmul.f32 %v1646_v1, %v3404_v18 }
 0x210   : > { %v1088_v63 = vpop.permute.xlu1 %1087  ;;  %v1228_v22 = vpop.permute.xlu0 %1227 }
 0x211   : > { %v1233_v10 = vadd.f32 %v1228_v22, %v1219_v47  ;;  %v1092_v15 = vadd.f32 %v1088_v63, %v1078_v36  ;;  %v1760_v47 = vstv %s3458_s20  ;;  %s2265_s20 = sshll.u32 %s2349_s13, 4  ;;  %s2266_s20 = int_to_ptr.vmem [resolvable:$false] %s2265_s20 }
 0x212   : > { %1541 = vrot.lane.b32.xlu1 %v1536_v52, %s3740_s7  ;;  %1665 = vrot.lane.b32.xlu0 %v1661_v9, %s3738_s19  ;;  %v1330_v52 = vstv %s3473_s18  ;;  %v1620_v9 = vmul.f32 %v1618_v54, %v3404_v18  ;;  %v1761_v51 = vmul.f32 %v1760_v47, %v3428_v20  ;;  %s2267_s14 = scalar_lea.vmem %s2266_s20, 512 }
 0x213   : > { %v1331_v54 = vmul.f32 %v1330_v52, %v3104_v31 }
 0x214   : > { %v1102_v14 = vpop.permute.xlu1 %1101  ;;  %v1242_v38 = vpop.permute.xlu0 %1241 }
 0x215   : > { %v1247_v21 = vadd.f32 %v1242_v38, %v1233_v10  ;;  %v1106_v59 = vadd.f32 %v1102_v14, %v1092_v15  ;;  %v1774_v38 = vstv %s3476_s22 }
 0x216   : > { %1555 = vrot.lane.b32.xlu1 %v1550_v62, %s3739_s27  ;;  %1679 = vrot.lane.b32.xlu0 %v1675_v48, %s3738_s19 }
 0x218   : > { %v1116_v26 = vpop.permute.xlu1 %1115  ;;  %v1256_v39 = vpop.permute.xlu0 %1255 }
 0x219   : > { %v1261_v34 = vadd.f32 %v1256_v39, %v1247_v21  ;;  %v1120_v11 = vadd.f32 %v1116_v26, %v1106_v59  ;;  %v1775_v21 = vmul.f32 %v1774_v38, %v3441_v25  ;;  %v1788_v39 = vstv %s3487_s23 }
 0x21a   : > { %1569 = vrot.lane.b32.xlu1 %v1564_v13, %s3739_s27  ;;  %1709 = vrot.lane.b32.xlu0 %v1705_v56, %s3740_s7  ;;  %v1789_v56 = vmul.f32 %v1788_v39, %v3428_v20 }
 0x21c   : > { %v1130_v24 = vpop.permute.xlu1 %1129  ;;  %v1270_v41 = vpop.permute.xlu0 %1269 }
 0x21d   : > { %v1134_v8 = vadd.f32 %v1130_v24, %v1120_v11  ;;  %v1275_v55 = vadd.f32 %v1270_v41, %v1261_v34  ;;  %v1802_v34 = vstv %s3503_s6  ;;  %v1662_v41 = vmul.f32 %v1660_v7, %v3391_v23 }
 0x21e   : > { %1583 = vrot.lane.b32.xlu1 %v1578_v16, %s3743_s28  ;;  %1723 = vrot.lane.b32.xlu0 %v1719_v45, %s3740_s7  ;;  %v1803_v1 = vmul.f32 %v1802_v34, %v3441_v25  ;;  %v1816_v45 = vstv %s3517_s24 }
 0x21f   : > { %v1142_v40 = vadd.f32 %v1140_v53, %v1134_v8  ;;  %v1817_v7 = vmul.f32 %v1816_v45, %v3428_v20 }
 0x220   : > { %v1160_v58 = vpop.permute.xlu1 %1159  ;;  %v1284_v30 = vpop.permute.xlu0 %1283 }
 0x221   : > { %v1150_v27 = vadd.f32 %v1148_v43, %v1142_v40  ;;  %v1289_v44 = vadd.f32 %v1284_v30, %v1275_v55  ;;  %v1676_v55 = vmul.f32 %v1674_v42, %v3404_v18  ;;  %v3549_v40 = vld [vmem:[#allocation3 + $0xe] sm:$0xff] }
 0x222   : > { %1597 = vrot.lane.b32.xlu1 %v1592_v4, %s3743_s28  ;;  %1737 = vrot.lane.b32.xlu0 %v1733_v2, %s3739_s27  ;;  %v1706_v42 = vmul.f32 %v1704_v6, %v3549_v40 }
 0x223   : > { %v1164_v50 = vadd.f32 %v1160_v58, %v1150_v27  ;;  %v1830_v58 = vstv %s3528_s25 }
 0x224   : > { %v1174_v19 = vpop.permute.xlu1 %1173  ;;  %v1298_v49 = vpop.permute.xlu0 %1297  ;;  %v1831_v2 = vmul.f32 %v1830_v58, %v3441_v25 }
 0x225   : > { %v1178_v12 = vadd.f32 %v1174_v19, %v1164_v50  ;;  %v1303_v63 = vadd.f32 %v1298_v49, %v1289_v44  ;;  %v3562_v44 = vld [vmem:[#allocation3 + $0x26] sm:$0xff]  ;;  %v1844_v50 = vstv %s3539_s10 }
 0x226   : > { %1611 = vrot.lane.b32.xlu1 %v1606_v46, %s3741_s17  ;;  %1751 = vrot.lane.b32.xlu0 %v1747_v3, %s3739_s27  ;;  %v1720_v46 = vmul.f32 %v1718_v28, %v3562_v44  ;;  %v1845_v6 = vmul.f32 %v1844_v50, %v3428_v20 }
 0x228   : > { %v1188_v22 = vpop.permute.xlu1 %1187  ;;  %v1312_v37 = vpop.permute.xlu0 %1311 }
 0x229   : > { %v1192_v10 = vadd.f32 %v1188_v22, %v1178_v12  ;;  %v1317_v14 = vadd.f32 %v1312_v37, %v1303_v63  ;;  %v1858_v63 = vstv %s3552_s11 }
 0x22a   : > { %1625 = vrot.lane.b32.xlu1 %v1620_v9, %s3741_s17  ;;  %1765 = vrot.lane.b32.xlu0 %v1761_v51, %s3743_s28  ;;  %v1734_v9 = vmul.f32 %v1732_v0, %v3549_v40  ;;  %v1859_v28 = vmul.f32 %v1858_v63, %v3441_v25 }
 0x22b   : > { %v1325_v62 = vadd.f32 %v1323_v61, %v1317_v14 }
 0x22c   : > { %v1202_v48 = vpop.permute.xlu1 %1201  ;;  %v1342_v36 = vpop.permute.xlu0 %1341 }
 0x22d   : > { %v1333_v15 = vadd.f32 %v1331_v54, %v1325_v62  ;;  %v1206_v26 = vadd.f32 %v1202_v48, %v1192_v10  ;;  %v1748_v62 = vmul.f32 %v1746_v60, %v3562_v44 }
 0x22e   : > { %1639 = vrot.lane.b32.xlu1 %v1634_v57, %s3742_s0  ;;  %1779 = vrot.lane.b32.xlu0 %v1775_v21, %s3743_s28 }
 0x22f   : > { %v1347_v3 = vadd.f32 %v1342_v36, %v1333_v15  ;;  %v1762_v15 = vmul.f32 %v1760_v47, %v3549_v40  ;;  %v1776_v47 = vmul.f32 %v1774_v38, %v3562_v44 }
 0x230   : > { %v1216_v31 = vpop.permute.xlu1 %1215  ;;  %v1356_v13 = vpop.permute.xlu0 %1355 }
 0x231   : > { %v1220_v59 = vadd.f32 %v1216_v31, %v1206_v26  ;;  %v1361_v51 = vadd.f32 %v1356_v13, %v1347_v3  ;;  %v1324_v31 = vmul.f32 %v1322_v5, %v3227_v35 }
 0x232   : > { %1653 = vrot.lane.b32.xlu1 %v1648_v32, %s3742_s0  ;;  %1793 = vrot.lane.b32.xlu0 %v1789_v56, %s3741_s17  ;;  %v1332_v32 = vmul.f32 %v1330_v52, %v3240_v17  ;;  %v1790_v17 = vmul.f32 %v1788_v39, %v3549_v40 }
 0x234   : > { %v1230_v11 = vpop.permute.xlu1 %1229  ;;  %v1370_v24 = vpop.permute.xlu0 %1369 }
 0x235   : > { %v1234_v16 = vadd.f32 %v1230_v11, %v1220_v59  ;;  %v1375_v61 = vadd.f32 %v1370_v24, %v1361_v51 }
 0x236   : > { %1667 = vrot.lane.b32.xlu1 %v1662_v41, %s3738_s19  ;;  %1807 = vrot.lane.b32.xlu0 %v1803_v1, %s3741_s17 }
 0x238   : > { %v1244_v53 = vpop.permute.xlu1 %1243  ;;  %v1384_v8 = vpop.permute.xlu0 %1383 }
 0x239   : > { %v1248_v43 = vadd.f32 %v1244_v53, %v1234_v16  ;;  %v1389_v48 = vadd.f32 %v1384_v8, %v1375_v61 }
 0x23a   : > { %1681 = vrot.lane.b32.xlu1 %v1676_v55, %s3738_s19  ;;  %1821 = vrot.lane.b32.xlu0 %v1817_v7, %s3742_s0  ;;  %v1804_v55 = vmul.f32 %v1802_v34, %v3562_v44 }
 0x23c   : > { %v1258_v30 = vpop.permute.xlu1 %1257  ;;  %v1398_v4 = vpop.permute.xlu0 %1397 }
 0x23d   : > { %v1262_v27 = vadd.f32 %v1258_v30, %v1248_v43  ;;  %v1403_v0 = vadd.f32 %v1398_v4, %v1389_v48 }
 0x23e   : > { %1711 = vrot.lane.b32.xlu1 %v1706_v42, %s3740_s7  ;;  %1835 = vrot.lane.b32.xlu0 %v1831_v2, %s3742_s0 }
 0x240   : > { %v1272_v19 = vpop.permute.xlu1 %1271  ;;  %v1412_v49 = vpop.permute.xlu0 %1411 }
 0x241   : > { %v1276_v12 = vadd.f32 %v1272_v19, %v1262_v27  ;;  %v1417_v26 = vadd.f32 %v1412_v49, %v1403_v0  ;;  %v1818_v27 = vmul.f32 %v1816_v45, %v3549_v40 }
 0x242   : > { %1725 = vrot.lane.b32.xlu1 %v1720_v46, %s3740_s7  ;;  %1849 = vrot.lane.b32.xlu0 %v1845_v6, %s3738_s19  ;;  %s3595_s7 = sld [smem:[#allocation8 + $0x23]] }
 0x244   : > { %v1286_v22 = vpop.permute.xlu1 %1285  ;;  %v1426_v37 = vpop.permute.xlu0 %1425 }
 0x245   : > { %v1290_v10 = vadd.f32 %v1286_v22, %v1276_v12  ;;  %v1431_v60 = vadd.f32 %v1426_v37, %v1417_v26  ;;  %v1860_v22 = vmul.f32 %v1858_v63, %v3562_v44 }
 0x246   : > { %1739 = vrot.lane.b32.xlu1 %v1734_v9, %s3739_s27  ;;  %1863 = vrot.lane.b32.xlu0 %v1859_v28, %s3738_s19 }
 0x248   : > { %v1300_v14 = vpop.permute.xlu1 %1299  ;;  %v1440_v54 = vpop.permute.xlu0 %1439  ;;  %v1506_v16 = vstv %s3595_s7 }
 0x249   : > { %v1304_v36 = vadd.f32 %v1300_v14, %v1290_v10  ;;  %v1445_v35 = vadd.f32 %v1440_v54, %v1431_v60  ;;  %v1507_v43 = vmul.f32 %v1506_v16, %v3266_v33  ;;  %v1832_v33 = vmul.f32 %v1830_v58, %v3562_v44 }
 0x24a   : > { %1753 = vrot.lane.b32.xlu1 %v1748_v62, %s3739_s27  ;;  %s3603_s27 = sld [smem:[#allocation8 + $0x54]] }
 0x24c   : > { %v1314_v57 = vpop.permute.xlu1 %1313  ;;  %v1454_v21 = vpop.permute.xlu0 %1453 }
 0x24d   : > { %v1318_v13 = vadd.f32 %v1314_v57, %v1304_v36  ;;  %v1459_v24 = vadd.f32 %v1454_v21, %v1445_v35 }
 0x24e   : > { %1767 = vrot.lane.b32.xlu1 %v1762_v15, %s3743_s28 }
 0x24f   : > { %v1326_v56 = vadd.f32 %v1324_v31, %v1318_v13 }
 0x250   : > { %v1344_v59 = vpop.permute.xlu1 %1343  ;;  %v1468_v11 = vpop.permute.xlu0 %1467  ;;  %v1514_v7 = vstv %s3603_s27 }
 0x251   : > { %v1334_v5 = vadd.f32 %v1332_v32, %v1326_v56  ;;  %v1473_v52 = vadd.f32 %v1468_v11, %v1459_v24  ;;  %v1515_v4 = vmul.f32 %v1514_v7, %v3280_v29  ;;  %v1846_v29 = vmul.f32 %v1844_v50, %v3549_v40 }
 0x252   : > { %1781 = vrot.lane.b32.xlu1 %v1776_v47, %s3743_s28  ;;  %v1508_v47 = vmul.f32 %v1506_v16, %v3391_v23  ;;  %s3638_s28 = sld [smem:[#allocation8 + $0x5b]] }
 0x253   : > { %v1348_v3 = vadd.f32 %v1344_v59, %v1334_v5 }
 0x254   : > { %v1358_v41 = vpop.permute.xlu1 %1357  ;;  %v1482_v1 = vpop.permute.xlu0 %1481 }
 0x255   : > { %v1487_v53 = vadd.f32 %v1482_v1, %v1473_v52  ;;  %v1362_v37 = vadd.f32 %v1358_v41, %v1348_v3  ;;  %v1516_v41 = vmul.f32 %v1514_v7, %v3404_v18 }
 0x256   : > { %1795 = vrot.lane.b32.xlu1 %v1790_v17, %s3741_s17 }
 0x258   : > { %v1372_v38 = vpop.permute.xlu1 %1371  ;;  %v1496_v8 = vpop.permute.xlu0 %1495 }
 0x259   : > { %v1501_v30 = vadd.f32 %v1496_v8, %v1487_v53  ;;  %v1376_v9 = vadd.f32 %v1372_v38, %v1362_v37 }
 0x25a   : > { %1809 = vrot.lane.b32.xlu1 %v1804_v55, %s3741_s17  ;;  %s1995_s17 = sshll.u32 %s2486_s5, 4 }
 0x25b   : > { %v1509_v39 = vadd.f32 %v1507_v43, %v1501_v30 }
 0x25c   : > { %v1386_v42 = vpop.permute.xlu1 %1385  ;;  %v1526_v2 = vpop.permute.xlu0 %1525 }
 0x25d   : > { %v1517_v19 = vadd.f32 %v1515_v4, %v1509_v39  ;;  %v1390_v51 = vadd.f32 %v1386_v42, %v1376_v9  ;;  %v1698_v4 = vstv %s3638_s28 }
 0x25e   : > { %1823 = vrot.lane.b32.xlu1 %v1818_v27, %s3742_s0  ;;  %v1699_v7 = vmul.f32 %v1698_v4, %v3441_v25 }
 0x25f   : > { %v1531_v54 = vadd.f32 %v1526_v2, %v1517_v19 }
 0x260   : > { %v1400_v34 = vpop.permute.xlu1 %1399  ;;  %v1540_v49 = vpop.permute.xlu0 %1539 }
 0x261   : > { %v1404_v10 = vadd.f32 %v1400_v34, %v1390_v51  ;;  %v1545_v36 = vadd.f32 %v1540_v49, %v1531_v54 }
 0x262   : > { %1837 = vrot.lane.b32.xlu1 %v1832_v33, %s3742_s0  ;;  %s3635_s0 = sld [smem:[#allocation8 + $0x2a]] }
 0x264   : > { %v1414_v46 = vpop.permute.xlu1 %1413  ;;  %v1554_v6 = vpop.permute.xlu0 %1553 }
 0x265   : > { %v1418_v50 = vadd.f32 %v1414_v46, %v1404_v10  ;;  %v1559_v21 = vadd.f32 %v1554_v6, %v1545_v36 }
 0x266   : > { %1851 = vrot.lane.b32.xlu1 %v1846_v29, %s3738_s19 }
 0x268   : > { %v1428_v12 = vpop.permute.xlu1 %1427  ;;  %v1568_v45 = vpop.permute.xlu0 %1567  ;;  %v1690_v23 = vstv %s3635_s0 }
 0x269   : > { %v1432_v62 = vadd.f32 %v1428_v12, %v1418_v50  ;;  %v1573_v31 = vadd.f32 %v1568_v45, %v1559_v21  ;;  %v1691_v42 = vmul.f32 %v1690_v23, %v3428_v20 }
 0x26a   : > { %1865 = vrot.lane.b32.xlu1 %v1860_v22, %s3738_s19  ;;  %s173_s19 = scalar_lea.vmem [#allocation9], %s1995_s17 }
 0x26b   : > { %s1900_s3 = sshll.u32 %s173_s19, 4  ;;  %s3654_s3 = int_to_ptr.vmem [resolvable:$true] %s1900_s3 }
 0x26c   : > { %v1442_v58 = vpop.permute.xlu1 %1441  ;;  %v1582_v28 = vpop.permute.xlu0 %1581  ;;  %s2261_s1 = scalar_lea.vmem %s3654_s3, 256  ;;  %p2268_p2 = scmp.lt.s32.totalorder %s3654_s3, %s2266_s20 }
 0x26d   : > { %v1446_v57 = vadd.f32 %v1442_v58, %v1432_v62  ;;  %v1587_v60 = vadd.f32 %v1582_v28, %v1573_v31  ;;  %p2262_p9 = scmp.ne.s32.totalorder %s3654_s3, %s2261_s1  ;;  %p2269_p1 = scmp.lt.s32.totalorder %s2267_s14, %s2261_s1 }
 0x26f   : > { %p2263_p13 = pnand %p2262_p9, %p3744_p11  ;;  %p2270_p0 = por %p2269_p1, %p2268_p2 }
 0x270   : > { %v1456_v61 = vpop.permute.xlu1 %1455  ;;  %v1596_v14 = vpop.permute.xlu0 %1595 }
 0x271   : > { %v1460_v15 = vadd.f32 %v1456_v61, %v1446_v57  ;;  %v1601_v11 = vadd.f32 %v1596_v14, %v1587_v60  ;;  %p2264_p10 = pneg %p2263_p13 }
 0x273   : > { %p2271_p3 = pnand %p2270_p0, %p2264_p10 }
 0x274   : > { %v1470_v48 = vpop.permute.xlu1 %1469  ;;  %v1610_v0 = vpop.permute.xlu0 %1609 }
 0x275   : > { %v1474_v13 = vadd.f32 %v1470_v48, %v1460_v15  ;;  %v1615_v5 = vadd.f32 %v1610_v0, %v1601_v11 }
 0x278   : > { %v1484_v63 = vpop.permute.xlu1 %1483  ;;  %v1624_v26 = vpop.permute.xlu0 %1623 }
 0x279   : > { %v1488_v32 = vadd.f32 %v1484_v63, %v1474_v13  ;;  %v1629_v52 = vadd.f32 %v1624_v26, %v1615_v5 }
 0x27c   : > { %v1498_v56 = vpop.permute.xlu1 %1497  ;;  %v1638_v59 = vpop.permute.xlu0 %1637 }
 0x27d   : > { %v1502_v35 = vadd.f32 %v1498_v56, %v1488_v32  ;;  %v1643_v38 = vadd.f32 %v1638_v59, %v1629_v52  ;;  %v1692_v32 = vmul.f32 %v1690_v23, %v3549_v40 }
 0x27f   : > { %v1510_v24 = vadd.f32 %v1508_v47, %v1502_v35  ;;  %v1700_v47 = vmul.f32 %v1698_v4, %v3562_v44 }
 0x280   : > { %v1528_v1 = vpop.permute.xlu1 %1527  ;;  %v1652_v17 = vpop.permute.xlu0 %1651 }
 0x281   : > { %v1518_v53 = vadd.f32 %v1516_v41, %v1510_v24  ;;  %v1657_v43 = vadd.f32 %v1652_v17, %v1643_v38 }
 0x283   : > { %v1532_v29 = vadd.f32 %v1528_v1, %v1518_v53 }
 0x284   : > { %v1542_v8 = vpop.permute.xlu1 %1541  ;;  %v1666_v55 = vpop.permute.xlu0 %1665 }
 0x285   : > { %v1671_v16 = vadd.f32 %v1666_v55, %v1657_v43  ;;  %v1546_v45 = vadd.f32 %v1542_v8, %v1532_v29 }
 0x288   : > { %v1556_v30 = vpop.permute.xlu1 %1555  ;;  %v1680_v39 = vpop.permute.xlu0 %1679 }
 0x289   : > { %v1685_v2 = vadd.f32 %v1680_v39, %v1671_v16  ;;  %v1560_v22 = vadd.f32 %v1556_v30, %v1546_v45 }
 0x28b   : > { %v1693_v18 = vadd.f32 %v1691_v42, %v1685_v2 }
 0x28c   : > { %v1570_v27 = vpop.permute.xlu1 %1569  ;;  %v1710_v19 = vpop.permute.xlu0 %1709 }
 0x28d   : > { %v1701_v34 = vadd.f32 %v1699_v7, %v1693_v18  ;;  %v1574_v58 = vadd.f32 %v1570_v27, %v1560_v22 }
 0x28f   : > { %v1715_v10 = vadd.f32 %v1710_v19, %v1701_v34 }
 0x290   : > { %v1584_v49 = vpop.permute.xlu1 %1583  ;;  %v1724_v33 = vpop.permute.xlu0 %1723 }
 0x291   : > { %v1588_v20 = vadd.f32 %v1584_v49, %v1574_v58  ;;  %v1729_v50 = vadd.f32 %v1724_v33, %v1715_v10 }
 0x294   : > { %v1598_v46 = vpop.permute.xlu1 %1597  ;;  %v1738_v6 = vpop.permute.xlu0 %1737 }
 0x295   : > { %v1602_v25 = vadd.f32 %v1598_v46, %v1588_v20  ;;  %v1743_v48 = vadd.f32 %v1738_v6, %v1729_v50 }
 0x298   : > { %v1612_v3 = vpop.permute.xlu1 %1611  ;;  %v1752_v12 = vpop.permute.xlu0 %1751 }
 0x299   : > { %v1616_v61 = vadd.f32 %v1612_v3, %v1602_v25  ;;  %v1757_v21 = vadd.f32 %v1752_v12, %v1743_v48 }
 0x29c   : > { %v1626_v37 = vpop.permute.xlu1 %1625  ;;  %v1766_v9 = vpop.permute.xlu0 %1765 }
 0x29d   : > { %v1630_v62 = vadd.f32 %v1626_v37, %v1616_v61  ;;  %v1771_v63 = vadd.f32 %v1766_v9, %v1757_v21 }
 0x2a0   : > { %v1640_v28 = vpop.permute.xlu1 %1639  ;;  %v1780_v51 = vpop.permute.xlu0 %1779 }
 0x2a1   : > { %v1644_v0 = vadd.f32 %v1640_v28, %v1630_v62  ;;  %v1785_v60 = vadd.f32 %v1780_v51, %v1771_v63 }
 0x2a4   : > { %v1654_v14 = vpop.permute.xlu1 %1653  ;;  %v1794_v54 = vpop.permute.xlu0 %1793 }
 0x2a5   : > { %v1658_v15 = vadd.f32 %v1654_v14, %v1644_v0  ;;  %v1799_v59 = vadd.f32 %v1794_v54, %v1785_v60 }
 0x2a8   : > { %v1668_v36 = vpop.permute.xlu1 %1667  ;;  %v1808_v57 = vpop.permute.xlu0 %1807 }
 0x2a9   : > { %v1672_v26 = vadd.f32 %v1668_v36, %v1658_v15  ;;  %v1813_v24 = vadd.f32 %v1808_v57, %v1799_v59 }
 0x2ac   : > { %v1682_v31 = vpop.permute.xlu1 %1681  ;;  %v1822_v13 = vpop.permute.xlu0 %1821 }
 0x2ad   : > { %v1686_v56 = vadd.f32 %v1682_v31, %v1672_v26  ;;  %v1827_v1 = vadd.f32 %v1822_v13, %v1813_v24 }
 0x2af   : > { %v1694_v11 = vadd.f32 %v1692_v32, %v1686_v56 }
 0x2b0   : > { %v1712_v35 = vpop.permute.xlu1 %1711  ;;  %v1836_v5 = vpop.permute.xlu0 %1835 }
 0x2b1   : > { %v1702_v41 = vadd.f32 %v1700_v47, %v1694_v11  ;;  %v1841_v53 = vadd.f32 %v1836_v5, %v1827_v1 }
 0x2b3   : > { %v1716_v39 = vadd.f32 %v1712_v35, %v1702_v41 }
 0x2b4   : > { %v1726_v17 = vpop.permute.xlu1 %1725  ;;  %v1850_v52 = vpop.permute.xlu0 %1849 }
 0x2b5   : > { %v1855_v38 = vadd.f32 %v1850_v52, %v1841_v53  ;;  %v1730_v4 = vadd.f32 %v1726_v17, %v1716_v39 }
 0x2b8   : > { %v1740_v8 = vpop.permute.xlu1 %1739  ;;  %v1864_v55 = vpop.permute.xlu0 %1863 }
 0x2b9   : > { %v1869_v43 = vadd.f32 %v1864_v55, %v1855_v38  ;;  %v1744_v2 = vadd.f32 %v1740_v8, %v1730_v4 }
 0x2bb   : > { %v2125_v16 = vmul.f32 -1.442695, %v1869_v43 }
 0x2bc   : > { %v1754_v30 = vpop.permute.xlu1 %1753 }
 0x2bd   : > { %2210 = vpow2.f32 %v2125_v16  ;;  %v1758_v27 = vadd.f32 %v1754_v30, %v1744_v2 }
 0x2c0   : > { %v1768_v40 = vpop.permute.xlu1 %1767 }
 0x2c1   : > { %v1772_v19 = vadd.f32 %v1768_v40, %v1758_v27 }
 0x2c4   : > { %v1782_v23 = vpop.permute.xlu1 %1781 }
 0x2c5   : > { %v1786_v49 = vadd.f32 %v1782_v23, %v1772_v19 }
 0x2c8   : > { %v1796_v44 = vpop.permute.xlu1 %1795 }
 0x2c9   : > { %v1800_v33 = vadd.f32 %v1796_v44, %v1786_v49 }
 0x2ca   : > { %v2211_v42 = vpop.eup %2210 }
 0x2cb   : > { %v1877_v18 = vadd.f32 1.0, %v2211_v42 }
 0x2cc   : > { %v1810_v7 = vpop.permute.xlu1 %1809 }
 0x2cd   : > { %2212 = vrcp.f32 %v1877_v18  ;;  %v1814_v6 = vadd.f32 %v1810_v7, %v1800_v33 }
 0x2d0   : > { %v1824_v34 = vpop.permute.xlu1 %1823 }
 0x2d1   : > { %v1828_v29 = vadd.f32 %v1824_v34, %v1814_v6 }
 0x2d4   : > { %v1838_v46 = vpop.permute.xlu1 %1837 }
 0x2d5   : > { %v1842_v12 = vadd.f32 %v1838_v46, %v1828_v29 }
 0x2d8   : > { %v1852_v3 = vpop.permute.xlu1 %1851 }
 0x2d9   : > { %v1856_v22 = vadd.f32 %v1852_v3, %v1842_v12 }
 0x2da   : > { %v2213_v45 = vpop.eup %2212 }
 0x2db   : > { %1884 = vst.msk [vmem:[%s173_s19] sm:$0xff] %vm1883_vm5, %v2213_v45 }
 0x2dc   : > { %v1866_v37 = vpop.permute.xlu1 %1865 }
 0x2dd   : > { %v1870_v9 = vadd.f32 %v1866_v37, %v1856_v22 }
 0x2df   : > { %v2126_v58 = vmul.f32 -1.442695, %v1870_v9 }
 0x2e1   : > { %2214 = vpow2.f32 %v2126_v58 }
 0x2ee   : > { %v2215_v20 = vpop.eup %2214 }
 0x2ef   : > { %v1878_v28 = vadd.f32 1.0, %v2215_v20 }
 0x2f1   : > { %2216 = vrcp.f32 %v1878_v28 }
 0x2fe   : > { %v2217_v51 = vpop.eup %2216 }
 0x2ff   : > { %1885 = vst.msk [vmem:[%s173_s19 + $0x8] sm:$0xff] %vm1883_vm5, %v2217_v51 }
 0x300   : > { %2274 = shalt.err (!%p2271_p3)
}
 0x301   : > { %s2275_s18 = scalar_lea.hbm %s3652_s30, 256  ;;  %s2279_s6 = scalar_lea.hbm %s3700_s2, 512 }
 0x302   : > { %p2276_p12 = scmp.ne.s32.totalorder %s3652_s30, %s2275_s18  ;;  %p2280_p6 = scmp.lt.s32.totalorder %s3652_s30, %s3700_s2 }
 0x303   : > { %p2281_p4 = scmp.lt.s32.totalorder %s2279_s6, %s2275_s18 }
 0x304   : > { %p2277_p5 = pnand %p2276_p12, %p3744_p11 }
 0x305   : > { %p2282_p8 = por %p2281_p4, %p2280_p6 }
 0x306   : > { %p2278_p7 = pneg %p2277_p5 }
 0x308   : > { %p2283_p9 = pnand %p2282_p8, %p2278_p7 }
 0x30a   : > { %2286 = shalt.err (!%p2283_p9)
}
 0x30b   : > { %s2350_s10 = smov 128   ;;  %s2351_s11 = smov 8  }
 0x30c   : > { %2140 = dma.vmem_to_hbm [thread:$0]  (%p3744_p11), %s3654_s3, 256, %s3652_s30, %s1887_s15, %s2350_s10, %s2350_s10, %s2351_s11  }
 0x30d PF: > { %s1915_s7 = sand.u32 1, %s2317_s9   ;;  %p3745_p13 = scmp.ne.s32.totalorder %s3724_s16, 0 }
 0x30e   : > { %p3746_p10 = scmp.ge.s32.totalorder %s2329_s12, 2  ;;  %s1916_s27 = scalar_lea.sflag [#allocation6], %s1915_s7 }
 0x310   : > { %p2151_p2 = pnand %p3746_p10, %p3745_p13 }
 0x312   : > { %p2152_p1 = pneg %p2151_p2 }
 0x314   : > { %2312 = dma.done.wait (%p2152_p1), %s1916_s27, 256  }
 0x315   : > { %2314 = vsyncadd (%p2152_p1), %s1916_s27, 4294967040  ;;  %s3747_s9 = sld [smem:[#allocation13_spill]]  ;;  %p16_p0 = scmp.ge.s32.totalorder %s2418_s21, 4  }
 0x316   : > { %s3748_s10 = sld [smem:[#allocation14_spill]]  ;;  %s3750_s12 = smov %s2418_s21 }
 0x317   : > { %s3749_s11 = sld [smem:[#allocation15_spill]]  ;;  %18 = sbr.rel (!%p16_p0) target bundleno = 9 (0x9), region = 80 }
 0x31c   :  { %1921 = vsyncpa [#allocation5], 1 }
 0x31d   :  { %1923 = vsyncpa [#allocation5 + $0x1], 1 }
 0x31e   :  { %1924 = vsyncpa [#allocation6], 1 }
 0x31f   :  { %1926 = vsyncpa [#allocation6 + $0x1], 1 }
 0x320   :  { %1927 = vsyncpa [#allocation7], 1 }
 0x321   :  { %1929 = vsyncpa [#allocation7 + $0x1], 1 }

</bundles_post_ra>
